<compile_context>
chip_gen: v7x
topology: tpu7x:2x2x1
jax: 0.10.0
libtpu: 0.0.40
codegen_flags: <defaults>
</compile_context>

<pallas_src>
import functools
import math

import numpy as np
import jax
import jax.numpy as jnp
from jax.experimental import pallas as pl
from jax.experimental.pallas import tpu as pltpu  # noqa: F401  (TPU backend assumed)

# ----------------------------- configuration -------------------------------
D_MODEL = 32
N_HEADS = 4
D_HEAD = D_MODEL // N_HEADS
N_LAYERS = 2
DFF = 64
VOCAB = 16
SEQ = 8
BATCH = 2
N_ITERS = 2
LN_EPS = 1e-5
OUT_LANES = 128                      # lane-dense padded logits width (>= VOCAB)
NEG_INF = -1e30
SCALE = 1.0 / math.sqrt(D_HEAD)


# ------------------------------- kernel --------------------------------------
def _layer_norm(h, g, b):
    mu = jnp.mean(h, axis=-1, keepdims=True)
    var = jnp.mean((h - mu) ** 2, axis=-1, keepdims=True)
    return (h - mu) * jax.lax.rsqrt(var + LN_EPS) * g + b


def fused_forward_kernel(emb_ref, bias_ref, hmask_ref,
                         wqkv_ref, bqkv_ref, wo_ref, bo_ref,
                         ln1g_ref, ln1b_ref, w1_ref, b1_ref,
                         w2_ref, b2_ref, ln2g_ref, ln2b_ref,
                         wout_ref, bout_ref, o_ref, *, n_iters):
    f32 = jnp.float32
    emb = emb_ref[...]                     # (B*S, D)   batch folded into rows
    bias = bias_ref[...]                   # (B*S, B*S) block-diagonal additive mask
    n_layers = wqkv_ref.shape[0]
    d = emb.shape[1]

    x = emb
    for _ in range(n_iters):               # recurrent iterations (static)
        x = x + emb                         # input_recall ('add')
        for l in range(n_layers):           # compute_iteration (static)
            # ---- fused QKV projection: one (BS,D)@(D,3D) MXU op ----
            qkv = jnp.dot(x, wqkv_ref[l], preferred_element_type=f32) + bqkv_ref[l]
            q = qkv[:, 0:d]
            k = qkv[:, d:2 * d]
            v = qkv[:, 2 * d:3 * d]

            # ---- multi-head self-attention via lane masks ----
            # head h contributes only through its D_HEAD lanes; the batch
            # block-diagonal bias keeps folded batches from attending to
            # each other.  No per-head extract / concatenate.
            attn = jnp.zeros(emb.shape, f32)
            for h in range(N_HEADS):
                m = hmask_ref[h]             # (1, D): 1.0 on head-h lanes
                # s[i,j] = sum_d (q*m)[i,d] * k[j,d]   ("NT" matmul, no transpose op)
                s = jax.lax.dot_general(q * m, k, (((1,), (1,)), ((), ())),
                                        preferred_element_type=f32)
                s = s * SCALE + bias
                s = s - jnp.max(s, axis=-1, keepdims=True)
                p = jnp.exp(s)
                p = p * pl.reciprocal(jnp.sum(p, axis=-1, keepdims=True), approx=True)
                attn = attn + m * jnp.dot(p, v, preferred_element_type=f32)

            attn = jnp.dot(attn, wo_ref[l], preferred_element_type=f32) + bo_ref[l]

            # ---- post-norm encoder block tail ----
            h1 = _layer_norm(x + attn, ln1g_ref[l], ln1b_ref[l])
            f = jnp.dot(h1, w1_ref[l], preferred_element_type=f32) + b1_ref[l]
            f = jnp.maximum(f, 0.0)          # relu
            f = jnp.dot(f, w2_ref[l], preferred_element_type=f32) + b2_ref[l]
            x = _layer_norm(h1 + f, ln2g_ref[l], ln2b_ref[l])

    # to_token_logits, emitted as a lane-dense 128-wide (zero-padded) slab.
    o_ref[...] = (jnp.dot(x, wout_ref[...], preferred_element_type=f32)
                  + bout_ref[...])


# ------------------------------ wrapper --------------------------------------
def _forward_impl(tokens, params, *, n_iters=N_ITERS):
    """RecurrentTransformerModel.forward(x, n_iters) with the config above."""
    B, S = tokens.shape
    BS = B * S

    # Embedding lookup (tiny gather; fused by XLA around the single pallas_call).
    emb = jnp.take(params['embed'], tokens.reshape(-1), axis=0)      # (B*S, D)

    # Static (compile-time) masks.
    bid = np.repeat(np.arange(B), S)
    attn_bias = np.where(bid[:, None] == bid[None, :], 0.0, NEG_INF).astype(np.float32)
    head_mask = (np.arange(D_MODEL)[None, :] // D_HEAD ==
                 np.arange(N_HEADS)[:, None]).astype(np.float32)[:, None, :]  # (H,1,D)

    # Zero-pad output projection to a 128-lane-dense store.
    wout_p = jnp.pad(params['wout'], ((0, 0), (0, OUT_LANES - VOCAB)))
    bout_p = jnp.pad(params['bout'], ((0, 0), (0, OUT_LANES - VOCAB)))

    out = pl.pallas_call(
        functools.partial(fused_forward_kernel, n_iters=n_iters),
        out_shape=jax.ShapeDtypeStruct((BS, OUT_LANES), jnp.float32),
    )(emb, jnp.asarray(attn_bias), jnp.asarray(head_mask),
      params['wqkv'], params['bqkv'], params['wo'], params['bo'],
      params['ln1g'], params['ln1b'], params['w1'], params['b1'],
      params['w2'], params['b2'], params['ln2g'], params['ln2b'],
      wout_p, bout_p)

    return out[:, :VOCAB].reshape(B, S, VOCAB)


forward = jax.jit(_forward_impl, static_argnames=("n_iters",))


# ------------------------- deterministic parameters --------------------------
def init_params(key):
    def dense(k, fan_in, shape):
        return jax.random.normal(k, shape, jnp.float32) / math.sqrt(fan_in)

    keys = jax.random.split(key, 3 + 10 * N_LAYERS)
    wqkv, bqkv, wo, bo, w1, b1, w2, b2 = ([] for _ in range(8))
    for l in range(N_LAYERS):
        (kq, kk, kv, ko, k1, k2, kbq, kbo, kb1, kb2) = keys[3 + 10 * l: 3 + 10 * (l + 1)]
        wqkv.append(jnp.concatenate([dense(kq, D_MODEL, (D_MODEL, D_MODEL)),
                                     dense(kk, D_MODEL, (D_MODEL, D_MODEL)),
                                     dense(kv, D_MODEL, (D_MODEL, D_MODEL))], axis=1))
        bqkv.append(0.02 * jax.random.normal(kbq, (1, 3 * D_MODEL), jnp.float32))
        wo.append(dense(ko, D_MODEL, (D_MODEL, D_MODEL)))
        bo.append(0.02 * jax.random.normal(kbo, (1, D_MODEL), jnp.float32))
        w1.append(dense(k1, D_MODEL, (D_MODEL, DFF)))
        b1.append(0.02 * jax.random.normal(kb1, (1, DFF), jnp.float32))
        w2.append(dense(k2, DFF, (DFF, D_MODEL)))
        b2.append(0.02 * jax.random.normal(kb2, (1, D_MODEL), jnp.float32))
    L = N_LAYERS
    return {
        'embed': jax.random.normal(keys[0], (VOCAB, D_MODEL), jnp.float32),
        'wqkv': jnp.stack(wqkv), 'bqkv': jnp.stack(bqkv),
        'wo': jnp.stack(wo), 'bo': jnp.stack(bo),
        'ln1g': jnp.ones((L, 1, D_MODEL), jnp.float32),
        'ln1b': jnp.zeros((L, 1, D_MODEL), jnp.float32),
        'w1': jnp.stack(w1), 'b1': jnp.stack(b1),
        'w2': jnp.stack(w2), 'b2': jnp.stack(b2),
        'ln2g': jnp.ones((L, 1, D_MODEL), jnp.float32),
        'ln2b': jnp.zeros((L, 1, D_MODEL), jnp.float32),
        'wout': dense(keys[1], D_MODEL, (D_MODEL, VOCAB)),
        'bout': 0.02 * jax.random.normal(keys[2], (1, VOCAB), jnp.float32),
    }


# ---------------------------- pure-JAX reference -----------------------------
def ref_forward(tokens, params, n_iters=N_ITERS):
    def ln(h, g, b):
        mu = h.mean(-1, keepdims=True)
        var = ((h - mu) ** 2).mean(-1, keepdims=True)
        return (h - mu) / jnp.sqrt(var + LN_EPS) * g + b

    emb = jnp.take(params['embed'], tokens, axis=0)          # (B, S, D)
    B, S, _ = emb.shape
    x = emb
    for _ in range(n_iters):
        x = x + emb
        for l in range(N_LAYERS):
            wqkv, bqkv = params['wqkv'][l], params['bqkv'][l]
            q = x @ wqkv[:, :D_MODEL] + bqkv[:, :D_MODEL]
            k = x @ wqkv[:, D_MODEL:2 * D_MODEL] + bqkv[:, D_MODEL:2 * D_MODEL]
            v = x @ wqkv[:, 2 * D_MODEL:] + bqkv[:, 2 * D_MODEL:]
            qh = q.reshape(B, S, N_HEADS, D_HEAD).transpose(0, 2, 1, 3)
            kh = k.reshape(B, S, N_HEADS, D_HEAD).transpose(0, 2, 1, 3)
            vh = v.reshape(B, S, N_HEADS, D_HEAD).transpose(0, 2, 1, 3)
            s = (qh @ kh.transpose(0, 1, 3, 2)) / math.sqrt(D_HEAD)
            a = jax.nn.softmax(s, axis=-1)
            o = (a @ vh).transpose(0, 2, 1, 3).reshape(B, S, D_MODEL)
            o = o @ params['wo'][l] + params['bo'][l]
            h1 = ln(x + o, params['ln1g'][l], params['ln1b'][l])
            f = jnp.maximum(h1 @ params['w1'][l] + params['b1'][l], 0.0)
            f = f @ params['w2'][l] + params['b2'][l]
            x = ln(h1 + f, params['ln2g'][l], params['ln2b'][l])
    return x @ params['wout'] + params['bout']


# --------------------------------- main ---------------------------------------
if __name__ == "__main__":
    key = jax.random.PRNGKey(0)
    kp, kt = jax.random.split(key)
    params = init_params(kp)
    tokens = jax.random.randint(kt, (BATCH, SEQ), 0, VOCAB, dtype=jnp.int32)

    logits = jax.block_until_ready(forward(tokens, params, n_iters=N_ITERS))
    assert logits.shape == (BATCH, SEQ, VOCAB)

    ref = jax.block_until_ready(ref_forward(tokens, params, n_iters=N_ITERS))
    assert jnp.allclose(logits, ref, rtol=5e-2, atol=5e-2), \
        f"max abs err {jnp.max(jnp.abs(logits - ref))}"

    print("KERNEL_OK")
</pallas_src>

<mosaic_0001>
module attributes {stable_mosaic.version = 11 : i64} {
  func.func @fused_forward_kernel(%arg0: memref<16x32xf32, #tpu.memory_space<vmem>>, %arg1: memref<16x16xf32, #tpu.memory_space<vmem>>, %arg2: memref<4x1x32xf32, #tpu.memory_space<vmem>>, %arg3: memref<2x32x96xf32, #tpu.memory_space<vmem>>, %arg4: memref<2x1x96xf32, #tpu.memory_space<vmem>>, %arg5: memref<2x32x32xf32, #tpu.memory_space<vmem>>, %arg6: memref<2x1x32xf32, #tpu.memory_space<vmem>>, %arg7: memref<2x1x32xf32, #tpu.memory_space<vmem>>, %arg8: memref<2x1x32xf32, #tpu.memory_space<vmem>>, %arg9: memref<2x32x64xf32, #tpu.memory_space<vmem>>, %arg10: memref<2x1x64xf32, #tpu.memory_space<vmem>>, %arg11: memref<2x64x32xf32, #tpu.memory_space<vmem>>, %arg12: memref<2x1x32xf32, #tpu.memory_space<vmem>>, %arg13: memref<2x1x32xf32, #tpu.memory_space<vmem>>, %arg14: memref<2x1x32xf32, #tpu.memory_space<vmem>>, %arg15: memref<32x128xf32, #tpu.memory_space<vmem>>, %arg16: memref<1x128xf32, #tpu.memory_space<vmem>>, %arg17: memref<16x128xf32, #tpu.memory_space<vmem>>) attributes {dimension_semantics = [], scalar_prefetch = 0 : i64, scratch_operands = 0 : i64, tpu.core_type = #tpu.core_type<tc>} {
    %c0 = arith.constant 0 : index
    %c0_0 = arith.constant 0 : index
    %0 = vector.load %arg0[%c0, %c0_0] : memref<16x32xf32, #tpu.memory_space<vmem>>, vector<16x32xf32>
    %c0_1 = arith.constant 0 : index
    %c0_2 = arith.constant 0 : index
    %1 = vector.load %arg1[%c0_1, %c0_2] : memref<16x16xf32, #tpu.memory_space<vmem>>, vector<16x16xf32>
    %2 = arith.addf %0, %0 : vector<16x32xf32>
    %c0_3 = arith.constant 0 : index
    %c0_4 = arith.constant 0 : index
    %c0_5 = arith.constant 0 : index
    %3 = vector.load %arg3[%c0_3, %c0_4, %c0_5] : memref<2x32x96xf32, #tpu.memory_space<vmem>>, vector<1x32x96xf32>
    %4 = vector.shape_cast %3 : vector<1x32x96xf32> to vector<32x96xf32>
    %cst = arith.constant dense<0.000000e+00> : vector<16x96xf32>
    %5 = tpu.matmul %2, %4, %cst {dimension_numbers = #tpu.dot_dimension_numbers<[1], [0], [0], [1], [0, 0, 1, 1], [], []>} : vector<16x32xf32>, vector<32x96xf32>, vector<16x96xf32> -> vector<16x96xf32>
    %c0_6 = arith.constant 0 : index
    %c0_7 = arith.constant 0 : index
    %c0_8 = arith.constant 0 : index
    %6 = vector.load %arg4[%c0_6, %c0_7, %c0_8] : memref<2x1x96xf32, #tpu.memory_space<vmem>>, vector<1x1x96xf32>
    %7 = vector.shape_cast %6 : vector<1x1x96xf32> to vector<1x96xf32>
    %8 = vector.broadcast %7 : vector<1x96xf32> to vector<16x96xf32>
    %9 = arith.addf %5, %8 : vector<16x96xf32>
    %10 = vector.extract_strided_slice %9 {offsets = [0, 0], sizes = [16, 32], strides = [1, 1]} : vector<16x96xf32> to vector<16x32xf32>
    %11 = vector.extract_strided_slice %9 {offsets = [0, 32], sizes = [16, 32], strides = [1, 1]} : vector<16x96xf32> to vector<16x32xf32>
    %12 = vector.extract_strided_slice %9 {offsets = [0, 64], sizes = [16, 32], strides = [1, 1]} : vector<16x96xf32> to vector<16x32xf32>
    %cst_9 = arith.constant 0.000000e+00 : f32
    %13 = vector.broadcast %cst_9 : f32 to vector<16x32xf32>
    %c0_10 = arith.constant 0 : index
    %c0_11 = arith.constant 0 : index
    %c0_12 = arith.constant 0 : index
    %14 = vector.load %arg2[%c0_10, %c0_11, %c0_12] : memref<4x1x32xf32, #tpu.memory_space<vmem>>, vector<1x1x32xf32>
    %15 = vector.shape_cast %14 : vector<1x1x32xf32> to vector<1x32xf32>
    %16 = vector.broadcast %15 : vector<1x32xf32> to vector<16x32xf32>
    %17 = arith.mulf %10, %16 : vector<16x32xf32>
    %cst_13 = arith.constant dense<0.000000e+00> : vector<16x16xf32>
    %18 = tpu.matmul %17, %11, %cst_13 {dimension_numbers = #tpu.dot_dimension_numbers<[1], [1], [0], [0], [0, 0, 1, 0], [], []>} : vector<16x32xf32>, vector<16x32xf32>, vector<16x16xf32> -> vector<16x16xf32>
    %cst_14 = arith.constant 0.353553385 : f32
    %19 = vector.broadcast %cst_14 : f32 to vector<16x16xf32>
    %20 = arith.mulf %18, %19 : vector<16x16xf32>
    %21 = arith.addf %20, %1 : vector<16x16xf32>
    %cst_15 = arith.constant dense<0xFF800000> : vector<16xf32>
    %22 = vector.multi_reduction <maximumf>, %21, %cst_15 [1] : vector<16x16xf32> to vector<16xf32>
    %23 = vector.shape_cast %22 : vector<16xf32> to vector<16x1xf32>
    %24 = vector.broadcast %23 : vector<16x1xf32> to vector<16x16xf32>
    %25 = arith.subf %21, %24 : vector<16x16xf32>
    %26 = math.exp %25 : vector<16x16xf32>
    %cst_16 = arith.constant dense<0.000000e+00> : vector<16xf32>
    %27 = vector.multi_reduction <add>, %26, %cst_16 [1] : vector<16x16xf32> to vector<16xf32>
    %28 = vector.shape_cast %27 : vector<16xf32> to vector<16x1xf32>
    %29 = tpu.reciprocal %28 {approx = true} : vector<16x1xf32> -> vector<16x1xf32>
    %30 = vector.broadcast %29 : vector<16x1xf32> to vector<16x16xf32>
    %31 = arith.mulf %26, %30 : vector<16x16xf32>
    %cst_17 = arith.constant dense<0.000000e+00> : vector<16x32xf32>
    %32 = tpu.matmul %31, %12, %cst_17 {dimension_numbers = #tpu.dot_dimension_numbers<[1], [0], [0], [1], [0, 0, 1, 1], [], []>} : vector<16x16xf32>, vector<16x32xf32>, vector<16x32xf32> -> vector<16x32xf32>
    %33 = vector.broadcast %15 : vector<1x32xf32> to vector<16x32xf32>
    %34 = arith.mulf %33, %32 : vector<16x32xf32>
    %35 = arith.addf %13, %34 : vector<16x32xf32>
    %c1 = arith.constant 1 : index
    %c0_18 = arith.constant 0 : index
    %c0_19 = arith.constant 0 : index
    %36 = vector.load %arg2[%c1, %c0_18, %c0_19] : memref<4x1x32xf32, #tpu.memory_space<vmem>>, vector<1x1x32xf32>
    %37 = vector.shape_cast %36 : vector<1x1x32xf32> to vector<1x32xf32>
    %38 = vector.broadcast %37 : vector<1x32xf32> to vector<16x32xf32>
    %39 = arith.mulf %10, %38 : vector<16x32xf32>
    %cst_20 = arith.constant dense<0.000000e+00> : vector<16x16xf32>
    %40 = tpu.matmul %39, %11, %cst_20 {dimension_numbers = #tpu.dot_dimension_numbers<[1], [1], [0], [0], [0, 0, 1, 0], [], []>} : vector<16x32xf32>, vector<16x32xf32>, vector<16x16xf32> -> vector<16x16xf32>
    %cst_21 = arith.constant 0.353553385 : f32
    %41 = vector.broadcast %cst_21 : f32 to vector<16x16xf32>
    %42 = arith.mulf %40, %41 : vector<16x16xf32>
    %43 = arith.addf %42, %1 : vector<16x16xf32>
    %cst_22 = arith.constant dense<0xFF800000> : vector<16xf32>
    %44 = vector.multi_reduction <maximumf>, %43, %cst_22 [1] : vector<16x16xf32> to vector<16xf32>
    %45 = vector.shape_cast %44 : vector<16xf32> to vector<16x1xf32>
    %46 = vector.broadcast %45 : vector<16x1xf32> to vector<16x16xf32>
    %47 = arith.subf %43, %46 : vector<16x16xf32>
    %48 = math.exp %47 : vector<16x16xf32>
    %cst_23 = arith.constant dense<0.000000e+00> : vector<16xf32>
    %49 = vector.multi_reduction <add>, %48, %cst_23 [1] : vector<16x16xf32> to vector<16xf32>
    %50 = vector.shape_cast %49 : vector<16xf32> to vector<16x1xf32>
    %51 = tpu.reciprocal %50 {approx = true} : vector<16x1xf32> -> vector<16x1xf32>
    %52 = vector.broadcast %51 : vector<16x1xf32> to vector<16x16xf32>
    %53 = arith.mulf %48, %52 : vector<16x16xf32>
    %cst_24 = arith.constant dense<0.000000e+00> : vector<16x32xf32>
    %54 = tpu.matmul %53, %12, %cst_24 {dimension_numbers = #tpu.dot_dimension_numbers<[1], [0], [0], [1], [0, 0, 1, 1], [], []>} : vector<16x16xf32>, vector<16x32xf32>, vector<16x32xf32> -> vector<16x32xf32>
    %55 = vector.broadcast %37 : vector<1x32xf32> to vector<16x32xf32>
    %56 = arith.mulf %55, %54 : vector<16x32xf32>
    %57 = arith.addf %35, %56 : vector<16x32xf32>
    %c2 = arith.constant 2 : index
    %c0_25 = arith.constant 0 : index
    %c0_26 = arith.constant 0 : index
    %58 = vector.load %arg2[%c2, %c0_25, %c0_26] : memref<4x1x32xf32, #tpu.memory_space<vmem>>, vector<1x1x32xf32>
    %59 = vector.shape_cast %58 : vector<1x1x32xf32> to vector<1x32xf32>
    %60 = vector.broadcast %59 : vector<1x32xf32> to vector<16x32xf32>
    %61 = arith.mulf %10, %60 : vector<16x32xf32>
    %cst_27 = arith.constant dense<0.000000e+00> : vector<16x16xf32>
    %62 = tpu.matmul %61, %11, %cst_27 {dimension_numbers = #tpu.dot_dimension_numbers<[1], [1], [0], [0], [0, 0, 1, 0], [], []>} : vector<16x32xf32>, vector<16x32xf32>, vector<16x16xf32> -> vector<16x16xf32>
    %cst_28 = arith.constant 0.353553385 : f32
    %63 = vector.broadcast %cst_28 : f32 to vector<16x16xf32>
    %64 = arith.mulf %62, %63 : vector<16x16xf32>
    %65 = arith.addf %64, %1 : vector<16x16xf32>
    %cst_29 = arith.constant dense<0xFF800000> : vector<16xf32>
    %66 = vector.multi_reduction <maximumf>, %65, %cst_29 [1] : vector<16x16xf32> to vector<16xf32>
    %67 = vector.shape_cast %66 : vector<16xf32> to vector<16x1xf32>
    %68 = vector.broadcast %67 : vector<16x1xf32> to vector<16x16xf32>
    %69 = arith.subf %65, %68 : vector<16x16xf32>
    %70 = math.exp %69 : vector<16x16xf32>
    %cst_30 = arith.constant dense<0.000000e+00> : vector<16xf32>
    %71 = vector.multi_reduction <add>, %70, %cst_30 [1] : vector<16x16xf32> to vector<16xf32>
    %72 = vector.shape_cast %71 : vector<16xf32> to vector<16x1xf32>
    %73 = tpu.reciprocal %72 {approx = true} : vector<16x1xf32> -> vector<16x1xf32>
    %74 = vector.broadcast %73 : vector<16x1xf32> to vector<16x16xf32>
    %75 = arith.mulf %70, %74 : vector<16x16xf32>
    %cst_31 = arith.constant dense<0.000000e+00> : vector<16x32xf32>
    %76 = tpu.matmul %75, %12, %cst_31 {dimension_numbers = #tpu.dot_dimension_numbers<[1], [0], [0], [1], [0, 0, 1, 1], [], []>} : vector<16x16xf32>, vector<16x32xf32>, vector<16x32xf32> -> vector<16x32xf32>
    %77 = vector.broadcast %59 : vector<1x32xf32> to vector<16x32xf32>
    %78 = arith.mulf %77, %76 : vector<16x32xf32>
    %79 = arith.addf %57, %78 : vector<16x32xf32>
    %c3 = arith.constant 3 : index
    %c0_32 = arith.constant 0 : index
    %c0_33 = arith.constant 0 : index
    %80 = vector.load %arg2[%c3, %c0_32, %c0_33] : memref<4x1x32xf32, #tpu.memory_space<vmem>>, vector<1x1x32xf32>
    %81 = vector.shape_cast %80 : vector<1x1x32xf32> to vector<1x32xf32>
    %82 = vector.broadcast %81 : vector<1x32xf32> to vector<16x32xf32>
    %83 = arith.mulf %10, %82 : vector<16x32xf32>
    %cst_34 = arith.constant dense<0.000000e+00> : vector<16x16xf32>
    %84 = tpu.matmul %83, %11, %cst_34 {dimension_numbers = #tpu.dot_dimension_numbers<[1], [1], [0], [0], [0, 0, 1, 0], [], []>} : vector<16x32xf32>, vector<16x32xf32>, vector<16x16xf32> -> vector<16x16xf32>
    %cst_35 = arith.constant 0.353553385 : f32
    %85 = vector.broadcast %cst_35 : f32 to vector<16x16xf32>
    %86 = arith.mulf %84, %85 : vector<16x16xf32>
    %87 = arith.addf %86, %1 : vector<16x16xf32>
    %cst_36 = arith.constant dense<0xFF800000> : vector<16xf32>
    %88 = vector.multi_reduction <maximumf>, %87, %cst_36 [1] : vector<16x16xf32> to vector<16xf32>
    %89 = vector.shape_cast %88 : vector<16xf32> to vector<16x1xf32>
    %90 = vector.broadcast %89 : vector<16x1xf32> to vector<16x16xf32>
    %91 = arith.subf %87, %90 : vector<16x16xf32>
    %92 = math.exp %91 : vector<16x16xf32>
    %cst_37 = arith.constant dense<0.000000e+00> : vector<16xf32>
    %93 = vector.multi_reduction <add>, %92, %cst_37 [1] : vector<16x16xf32> to vector<16xf32>
    %94 = vector.shape_cast %93 : vector<16xf32> to vector<16x1xf32>
    %95 = tpu.reciprocal %94 {approx = true} : vector<16x1xf32> -> vector<16x1xf32>
    %96 = vector.broadcast %95 : vector<16x1xf32> to vector<16x16xf32>
    %97 = arith.mulf %92, %96 : vector<16x16xf32>
    %cst_38 = arith.constant dense<0.000000e+00> : vector<16x32xf32>
    %98 = tpu.matmul %97, %12, %cst_38 {dimension_numbers = #tpu.dot_dimension_numbers<[1], [0], [0], [1], [0, 0, 1, 1], [], []>} : vector<16x16xf32>, vector<16x32xf32>, vector<16x32xf32> -> vector<16x32xf32>
    %99 = vector.broadcast %81 : vector<1x32xf32> to vector<16x32xf32>
    %100 = arith.mulf %99, %98 : vector<16x32xf32>
    %101 = arith.addf %79, %100 : vector<16x32xf32>
    %c0_39 = arith.constant 0 : index
    %c0_40 = arith.constant 0 : index
    %c0_41 = arith.constant 0 : index
    %102 = vector.load %arg5[%c0_39, %c0_40, %c0_41] : memref<2x32x32xf32, #tpu.memory_space<vmem>>, vector<1x32x32xf32>
    %103 = vector.shape_cast %102 : vector<1x32x32xf32> to vector<32x32xf32>
    %cst_42 = arith.constant dense<0.000000e+00> : vector<16x32xf32>
    %104 = tpu.matmul %101, %103, %cst_42 {dimension_numbers = #tpu.dot_dimension_numbers<[1], [0], [0], [1], [0, 0, 1, 1], [], []>} : vector<16x32xf32>, vector<32x32xf32>, vector<16x32xf32> -> vector<16x32xf32>
    %c0_43 = arith.constant 0 : index
    %c0_44 = arith.constant 0 : index
    %c0_45 = arith.constant 0 : index
    %105 = vector.load %arg6[%c0_43, %c0_44, %c0_45] : memref<2x1x32xf32, #tpu.memory_space<vmem>>, vector<1x1x32xf32>
    %106 = vector.shape_cast %105 : vector<1x1x32xf32> to vector<1x32xf32>
    %107 = vector.broadcast %106 : vector<1x32xf32> to vector<16x32xf32>
    %108 = arith.addf %104, %107 : vector<16x32xf32>
    %109 = arith.addf %2, %108 : vector<16x32xf32>
    %c0_46 = arith.constant 0 : index
    %c0_47 = arith.constant 0 : index
    %c0_48 = arith.constant 0 : index
    %110 = vector.load %arg7[%c0_46, %c0_47, %c0_48] : memref<2x1x32xf32, #tpu.memory_space<vmem>>, vector<1x1x32xf32>
    %111 = vector.shape_cast %110 : vector<1x1x32xf32> to vector<1x32xf32>
    %c0_49 = arith.constant 0 : index
    %c0_50 = arith.constant 0 : index
    %c0_51 = arith.constant 0 : index
    %112 = vector.load %arg8[%c0_49, %c0_50, %c0_51] : memref<2x1x32xf32, #tpu.memory_space<vmem>>, vector<1x1x32xf32>
    %113 = vector.shape_cast %112 : vector<1x1x32xf32> to vector<1x32xf32>
    %cst_52 = arith.constant dense<0.000000e+00> : vector<16xf32>
    %114 = vector.multi_reduction <add>, %109, %cst_52 [1] : vector<16x32xf32> to vector<16xf32>
    %115 = vector.shape_cast %114 : vector<16xf32> to vector<16x1xf32>
    %cst_53 = arith.constant 3.200000e+01 : f32
    %116 = vector.broadcast %cst_53 : f32 to vector<16x1xf32>
    %117 = arith.divf %115, %116 : vector<16x1xf32>
    %118 = vector.broadcast %117 : vector<16x1xf32> to vector<16x32xf32>
    %119 = arith.subf %109, %118 : vector<16x32xf32>
    %120 = arith.mulf %119, %119 : vector<16x32xf32>
    %cst_54 = arith.constant dense<0.000000e+00> : vector<16xf32>
    %121 = vector.multi_reduction <add>, %120, %cst_54 [1] : vector<16x32xf32> to vector<16xf32>
    %122 = vector.shape_cast %121 : vector<16xf32> to vector<16x1xf32>
    %cst_55 = arith.constant 3.200000e+01 : f32
    %123 = vector.broadcast %cst_55 : f32 to vector<16x1xf32>
    %124 = arith.divf %122, %123 : vector<16x1xf32>
    %125 = vector.broadcast %117 : vector<16x1xf32> to vector<16x32xf32>
    %126 = arith.subf %109, %125 : vector<16x32xf32>
    %cst_56 = arith.constant 9.99999974E-6 : f32
    %127 = vector.broadcast %cst_56 : f32 to vector<16x1xf32>
    %128 = arith.addf %124, %127 : vector<16x1xf32>
    %129 = math.rsqrt %128 : vector<16x1xf32>
    %130 = vector.broadcast %129 : vector<16x1xf32> to vector<16x32xf32>
    %131 = arith.mulf %126, %130 : vector<16x32xf32>
    %132 = vector.broadcast %111 : vector<1x32xf32> to vector<16x32xf32>
    %133 = arith.mulf %131, %132 : vector<16x32xf32>
    %134 = vector.broadcast %113 : vector<1x32xf32> to vector<16x32xf32>
    %135 = arith.addf %133, %134 : vector<16x32xf32>
    %c0_57 = arith.constant 0 : index
    %c0_58 = arith.constant 0 : index
    %c0_59 = arith.constant 0 : index
    %136 = vector.load %arg9[%c0_57, %c0_58, %c0_59] : memref<2x32x64xf32, #tpu.memory_space<vmem>>, vector<1x32x64xf32>
    %137 = vector.shape_cast %136 : vector<1x32x64xf32> to vector<32x64xf32>
    %cst_60 = arith.constant dense<0.000000e+00> : vector<16x64xf32>
    %138 = tpu.matmul %135, %137, %cst_60 {dimension_numbers = #tpu.dot_dimension_numbers<[1], [0], [0], [1], [0, 0, 1, 1], [], []>} : vector<16x32xf32>, vector<32x64xf32>, vector<16x64xf32> -> vector<16x64xf32>
    %c0_61 = arith.constant 0 : index
    %c0_62 = arith.constant 0 : index
    %c0_63 = arith.constant 0 : index
    %139 = vector.load %arg10[%c0_61, %c0_62, %c0_63] : memref<2x1x64xf32, #tpu.memory_space<vmem>>, vector<1x1x64xf32>
    %140 = vector.shape_cast %139 : vector<1x1x64xf32> to vector<1x64xf32>
    %141 = vector.broadcast %140 : vector<1x64xf32> to vector<16x64xf32>
    %142 = arith.addf %138, %141 : vector<16x64xf32>
    %cst_64 = arith.constant 0.000000e+00 : f32
    %143 = vector.broadcast %cst_64 : f32 to vector<16x64xf32>
    %144 = arith.maximumf %142, %143 : vector<16x64xf32>
    %c0_65 = arith.constant 0 : index
    %c0_66 = arith.constant 0 : index
    %c0_67 = arith.constant 0 : index
    %145 = vector.load %arg11[%c0_65, %c0_66, %c0_67] : memref<2x64x32xf32, #tpu.memory_space<vmem>>, vector<1x64x32xf32>
    %146 = vector.shape_cast %145 : vector<1x64x32xf32> to vector<64x32xf32>
    %cst_68 = arith.constant dense<0.000000e+00> : vector<16x32xf32>
    %147 = tpu.matmul %144, %146, %cst_68 {dimension_numbers = #tpu.dot_dimension_numbers<[1], [0], [0], [1], [0, 0, 1, 1], [], []>} : vector<16x64xf32>, vector<64x32xf32>, vector<16x32xf32> -> vector<16x32xf32>
    %c0_69 = arith.constant 0 : index
    %c0_70 = arith.constant 0 : index
    %c0_71 = arith.constant 0 : index
    %148 = vector.load %arg12[%c0_69, %c0_70, %c0_71] : memref<2x1x32xf32, #tpu.memory_space<vmem>>, vector<1x1x32xf32>
    %149 = vector.shape_cast %148 : vector<1x1x32xf32> to vector<1x32xf32>
    %150 = vector.broadcast %149 : vector<1x32xf32> to vector<16x32xf32>
    %151 = arith.addf %147, %150 : vector<16x32xf32>
    %152 = arith.addf %135, %151 : vector<16x32xf32>
    %c0_72 = arith.constant 0 : index
    %c0_73 = arith.constant 0 : index
    %c0_74 = arith.constant 0 : index
    %153 = vector.load %arg13[%c0_72, %c0_73, %c0_74] : memref<2x1x32xf32, #tpu.memory_space<vmem>>, vector<1x1x32xf32>
    %154 = vector.shape_cast %153 : vector<1x1x32xf32> to vector<1x32xf32>
    %c0_75 = arith.constant 0 : index
    %c0_76 = arith.constant 0 : index
    %c0_77 = arith.constant 0 : index
    %155 = vector.load %arg14[%c0_75, %c0_76, %c0_77] : memref<2x1x32xf32, #tpu.memory_space<vmem>>, vector<1x1x32xf32>
    %156 = vector.shape_cast %155 : vector<1x1x32xf32> to vector<1x32xf32>
    %cst_78 = arith.constant dense<0.000000e+00> : vector<16xf32>
    %157 = vector.multi_reduction <add>, %152, %cst_78 [1] : vector<16x32xf32> to vector<16xf32>
    %158 = vector.shape_cast %157 : vector<16xf32> to vector<16x1xf32>
    %cst_79 = arith.constant 3.200000e+01 : f32
    %159 = vector.broadcast %cst_79 : f32 to vector<16x1xf32>
    %160 = arith.divf %158, %159 : vector<16x1xf32>
    %161 = vector.broadcast %160 : vector<16x1xf32> to vector<16x32xf32>
    %162 = arith.subf %152, %161 : vector<16x32xf32>
    %163 = arith.mulf %162, %162 : vector<16x32xf32>
    %cst_80 = arith.constant dense<0.000000e+00> : vector<16xf32>
    %164 = vector.multi_reduction <add>, %163, %cst_80 [1] : vector<16x32xf32> to vector<16xf32>
    %165 = vector.shape_cast %164 : vector<16xf32> to vector<16x1xf32>
    %cst_81 = arith.constant 3.200000e+01 : f32
    %166 = vector.broadcast %cst_81 : f32 to vector<16x1xf32>
    %167 = arith.divf %165, %166 : vector<16x1xf32>
    %168 = vector.broadcast %160 : vector<16x1xf32> to vector<16x32xf32>
    %169 = arith.subf %152, %168 : vector<16x32xf32>
    %cst_82 = arith.constant 9.99999974E-6 : f32
    %170 = vector.broadcast %cst_82 : f32 to vector<16x1xf32>
    %171 = arith.addf %167, %170 : vector<16x1xf32>
    %172 = math.rsqrt %171 : vector<16x1xf32>
    %173 = vector.broadcast %172 : vector<16x1xf32> to vector<16x32xf32>
    %174 = arith.mulf %169, %173 : vector<16x32xf32>
    %175 = vector.broadcast %154 : vector<1x32xf32> to vector<16x32xf32>
    %176 = arith.mulf %174, %175 : vector<16x32xf32>
    %177 = vector.broadcast %156 : vector<1x32xf32> to vector<16x32xf32>
    %178 = arith.addf %176, %177 : vector<16x32xf32>
    %c1_83 = arith.constant 1 : index
    %c0_84 = arith.constant 0 : index
    %c0_85 = arith.constant 0 : index
    %179 = vector.load %arg3[%c1_83, %c0_84, %c0_85] : memref<2x32x96xf32, #tpu.memory_space<vmem>>, vector<1x32x96xf32>
    %180 = vector.shape_cast %179 : vector<1x32x96xf32> to vector<32x96xf32>
    %cst_86 = arith.constant dense<0.000000e+00> : vector<16x96xf32>
    %181 = tpu.matmul %178, %180, %cst_86 {dimension_numbers = #tpu.dot_dimension_numbers<[1], [0], [0], [1], [0, 0, 1, 1], [], []>} : vector<16x32xf32>, vector<32x96xf32>, vector<16x96xf32> -> vector<16x96xf32>
    %c1_87 = arith.constant 1 : index
    %c0_88 = arith.constant 0 : index
    %c0_89 = arith.constant 0 : index
    %182 = vector.load %arg4[%c1_87, %c0_88, %c0_89] : memref<2x1x96xf32, #tpu.memory_space<vmem>>, vector<1x1x96xf32>
    %183 = vector.shape_cast %182 : vector<1x1x96xf32> to vector<1x96xf32>
    %184 = vector.broadcast %183 : vector<1x96xf32> to vector<16x96xf32>
    %185 = arith.addf %181, %184 : vector<16x96xf32>
    %186 = vector.extract_strided_slice %185 {offsets = [0, 0], sizes = [16, 32], strides = [1, 1]} : vector<16x96xf32> to vector<16x32xf32>
    %187 = vector.extract_strided_slice %185 {offsets = [0, 32], sizes = [16, 32], strides = [1, 1]} : vector<16x96xf32> to vector<16x32xf32>
    %188 = vector.extract_strided_slice %185 {offsets = [0, 64], sizes = [16, 32], strides = [1, 1]} : vector<16x96xf32> to vector<16x32xf32>
    %cst_90 = arith.constant 0.000000e+00 : f32
    %189 = vector.broadcast %cst_90 : f32 to vector<16x32xf32>
    %c0_91 = arith.constant 0 : index
    %c0_92 = arith.constant 0 : index
    %c0_93 = arith.constant 0 : index
    %190 = vector.load %arg2[%c0_91, %c0_92, %c0_93] : memref<4x1x32xf32, #tpu.memory_space<vmem>>, vector<1x1x32xf32>
    %191 = vector.shape_cast %190 : vector<1x1x32xf32> to vector<1x32xf32>
    %192 = vector.broadcast %191 : vector<1x32xf32> to vector<16x32xf32>
    %193 = arith.mulf %186, %192 : vector<16x32xf32>
    %cst_94 = arith.constant dense<0.000000e+00> : vector<16x16xf32>
    %194 = tpu.matmul %193, %187, %cst_94 {dimension_numbers = #tpu.dot_dimension_numbers<[1], [1], [0], [0], [0, 0, 1, 0], [], []>} : vector<16x32xf32>, vector<16x32xf32>, vector<16x16xf32> -> vector<16x16xf32>
    %cst_95 = arith.constant 0.353553385 : f32
    %195 = vector.broadcast %cst_95 : f32 to vector<16x16xf32>
    %196 = arith.mulf %194, %195 : vector<16x16xf32>
    %197 = arith.addf %196, %1 : vector<16x16xf32>
    %cst_96 = arith.constant dense<0xFF800000> : vector<16xf32>
    %198 = vector.multi_reduction <maximumf>, %197, %cst_96 [1] : vector<16x16xf32> to vector<16xf32>
    %199 = vector.shape_cast %198 : vector<16xf32> to vector<16x1xf32>
    %200 = vector.broadcast %199 : vector<16x1xf32> to vector<16x16xf32>
    %201 = arith.subf %197, %200 : vector<16x16xf32>
    %202 = math.exp %201 : vector<16x16xf32>
    %cst_97 = arith.constant dense<0.000000e+00> : vector<16xf32>
    %203 = vector.multi_reduction <add>, %202, %cst_97 [1] : vector<16x16xf32> to vector<16xf32>
    %204 = vector.shape_cast %203 : vector<16xf32> to vector<16x1xf32>
    %205 = tpu.reciprocal %204 {approx = true} : vector<16x1xf32> -> vector<16x1xf32>
    %206 = vector.broadcast %205 : vector<16x1xf32> to vector<16x16xf32>
    %207 = arith.mulf %202, %206 : vector<16x16xf32>
    %cst_98 = arith.constant dense<0.000000e+00> : vector<16x32xf32>
    %208 = tpu.matmul %207, %188, %cst_98 {dimension_numbers = #tpu.dot_dimension_numbers<[1], [0], [0], [1], [0, 0, 1, 1], [], []>} : vector<16x16xf32>, vector<16x32xf32>, vector<16x32xf32> -> vector<16x32xf32>
    %209 = vector.broadcast %191 : vector<1x32xf32> to vector<16x32xf32>
    %210 = arith.mulf %209, %208 : vector<16x32xf32>
    %211 = arith.addf %189, %210 : vector<16x32xf32>
    %c1_99 = arith.constant 1 : index
    %c0_100 = arith.constant 0 : index
    %c0_101 = arith.constant 0 : index
    %212 = vector.load %arg2[%c1_99, %c0_100, %c0_101] : memref<4x1x32xf32, #tpu.memory_space<vmem>>, vector<1x1x32xf32>
    %213 = vector.shape_cast %212 : vector<1x1x32xf32> to vector<1x32xf32>
    %214 = vector.broadcast %213 : vector<1x32xf32> to vector<16x32xf32>
    %215 = arith.mulf %186, %214 : vector<16x32xf32>
    %cst_102 = arith.constant dense<0.000000e+00> : vector<16x16xf32>
    %216 = tpu.matmul %215, %187, %cst_102 {dimension_numbers = #tpu.dot_dimension_numbers<[1], [1], [0], [0], [0, 0, 1, 0], [], []>} : vector<16x32xf32>, vector<16x32xf32>, vector<16x16xf32> -> vector<16x16xf32>
    %cst_103 = arith.constant 0.353553385 : f32
    %217 = vector.broadcast %cst_103 : f32 to vector<16x16xf32>
    %218 = arith.mulf %216, %217 : vector<16x16xf32>
    %219 = arith.addf %218, %1 : vector<16x16xf32>
    %cst_104 = arith.constant dense<0xFF800000> : vector<16xf32>
    %220 = vector.multi_reduction <maximumf>, %219, %cst_104 [1] : vector<16x16xf32> to vector<16xf32>
    %221 = vector.shape_cast %220 : vector<16xf32> to vector<16x1xf32>
    %222 = vector.broadcast %221 : vector<16x1xf32> to vector<16x16xf32>
    %223 = arith.subf %219, %222 : vector<16x16xf32>
    %224 = math.exp %223 : vector<16x16xf32>
    %cst_105 = arith.constant dense<0.000000e+00> : vector<16xf32>
    %225 = vector.multi_reduction <add>, %224, %cst_105 [1] : vector<16x16xf32> to vector<16xf32>
    %226 = vector.shape_cast %225 : vector<16xf32> to vector<16x1xf32>
    %227 = tpu.reciprocal %226 {approx = true} : vector<16x1xf32> -> vector<16x1xf32>
    %228 = vector.broadcast %227 : vector<16x1xf32> to vector<16x16xf32>
    %229 = arith.mulf %224, %228 : vector<16x16xf32>
    %cst_106 = arith.constant dense<0.000000e+00> : vector<16x32xf32>
    %230 = tpu.matmul %229, %188, %cst_106 {dimension_numbers = #tpu.dot_dimension_numbers<[1], [0], [0], [1], [0, 0, 1, 1], [], []>} : vector<16x16xf32>, vector<16x32xf32>, vector<16x32xf32> -> vector<16x32xf32>
    %231 = vector.broadcast %213 : vector<1x32xf32> to vector<16x32xf32>
    %232 = arith.mulf %231, %230 : vector<16x32xf32>
    %233 = arith.addf %211, %232 : vector<16x32xf32>
    %c2_107 = arith.constant 2 : index
    %c0_108 = arith.constant 0 : index
    %c0_109 = arith.constant 0 : index
    %234 = vector.load %arg2[%c2_107, %c0_108, %c0_109] : memref<4x1x32xf32, #tpu.memory_space<vmem>>, vector<1x1x32xf32>
    %235 = vector.shape_cast %234 : vector<1x1x32xf32> to vector<1x32xf32>
    %236 = vector.broadcast %235 : vector<1x32xf32> to vector<16x32xf32>
    %237 = arith.mulf %186, %236 : vector<16x32xf32>
    %cst_110 = arith.constant dense<0.000000e+00> : vector<16x16xf32>
    %238 = tpu.matmul %237, %187, %cst_110 {dimension_numbers = #tpu.dot_dimension_numbers<[1], [1], [0], [0], [0, 0, 1, 0], [], []>} : vector<16x32xf32>, vector<16x32xf32>, vector<16x16xf32> -> vector<16x16xf32>
    %cst_111 = arith.constant 0.353553385 : f32
    %239 = vector.broadcast %cst_111 : f32 to vector<16x16xf32>
    %240 = arith.mulf %238, %239 : vector<16x16xf32>
    %241 = arith.addf %240, %1 : vector<16x16xf32>
    %cst_112 = arith.constant dense<0xFF800000> : vector<16xf32>
    %242 = vector.multi_reduction <maximumf>, %241, %cst_112 [1] : vector<16x16xf32> to vector<16xf32>
    %243 = vector.shape_cast %242 : vector<16xf32> to vector<16x1xf32>
    %244 = vector.broadcast %243 : vector<16x1xf32> to vector<16x16xf32>
    %245 = arith.subf %241, %244 : vector<16x16xf32>
    %246 = math.exp %245 : vector<16x16xf32>
    %cst_113 = arith.constant dense<0.000000e+00> : vector<16xf32>
    %247 = vector.multi_reduction <add>, %246, %cst_113 [1] : vector<16x16xf32> to vector<16xf32>
    %248 = vector.shape_cast %247 : vector<16xf32> to vector<16x1xf32>
    %249 = tpu.reciprocal %248 {approx = true} : vector<16x1xf32> -> vector<16x1xf32>
    %250 = vector.broadcast %249 : vector<16x1xf32> to vector<16x16xf32>
    %251 = arith.mulf %246, %250 : vector<16x16xf32>
    %cst_114 = arith.constant dense<0.000000e+00> : vector<16x32xf32>
    %252 = tpu.matmul %251, %188, %cst_114 {dimension_numbers = #tpu.dot_dimension_numbers<[1], [0], [0], [1], [0, 0, 1, 1], [], []>} : vector<16x16xf32>, vector<16x32xf32>, vector<16x32xf32> -> vector<16x32xf32>
    %253 = vector.broadcast %235 : vector<1x32xf32> to vector<16x32xf32>
    %254 = arith.mulf %253, %252 : vector<16x32xf32>
    %255 = arith.addf %233, %254 : vector<16x32xf32>
    %c3_115 = arith.constant 3 : index
    %c0_116 = arith.constant 0 : index
    %c0_117 = arith.constant 0 : index
    %256 = vector.load %arg2[%c3_115, %c0_116, %c0_117] : memref<4x1x32xf32, #tpu.memory_space<vmem>>, vector<1x1x32xf32>
    %257 = vector.shape_cast %256 : vector<1x1x32xf32> to vector<1x32xf32>
    %258 = vector.broadcast %257 : vector<1x32xf32> to vector<16x32xf32>
    %259 = arith.mulf %186, %258 : vector<16x32xf32>
    %cst_118 = arith.constant dense<0.000000e+00> : vector<16x16xf32>
    %260 = tpu.matmul %259, %187, %cst_118 {dimension_numbers = #tpu.dot_dimension_numbers<[1], [1], [0], [0], [0, 0, 1, 0], [], []>} : vector<16x32xf32>, vector<16x32xf32>, vector<16x16xf32> -> vector<16x16xf32>
    %cst_119 = arith.constant 0.353553385 : f32
    %261 = vector.broadcast %cst_119 : f32 to vector<16x16xf32>
    %262 = arith.mulf %260, %261 : vector<16x16xf32>
    %263 = arith.addf %262, %1 : vector<16x16xf32>
    %cst_120 = arith.constant dense<0xFF800000> : vector<16xf32>
    %264 = vector.multi_reduction <maximumf>, %263, %cst_120 [1] : vector<16x16xf32> to vector<16xf32>
    %265 = vector.shape_cast %264 : vector<16xf32> to vector<16x1xf32>
    %266 = vector.broadcast %265 : vector<16x1xf32> to vector<16x16xf32>
    %267 = arith.subf %263, %266 : vector<16x16xf32>
    %268 = math.exp %267 : vector<16x16xf32>
    %cst_121 = arith.constant dense<0.000000e+00> : vector<16xf32>
    %269 = vector.multi_reduction <add>, %268, %cst_121 [1] : vector<16x16xf32> to vector<16xf32>
    %270 = vector.shape_cast %269 : vector<16xf32> to vector<16x1xf32>
    %271 = tpu.reciprocal %270 {approx = true} : vector<16x1xf32> -> vector<16x1xf32>
    %272 = vector.broadcast %271 : vector<16x1xf32> to vector<16x16xf32>
    %273 = arith.mulf %268, %272 : vector<16x16xf32>
    %cst_122 = arith.constant dense<0.000000e+00> : vector<16x32xf32>
    %274 = tpu.matmul %273, %188, %cst_122 {dimension_numbers = #tpu.dot_dimension_numbers<[1], [0], [0], [1], [0, 0, 1, 1], [], []>} : vector<16x16xf32>, vector<16x32xf32>, vector<16x32xf32> -> vector<16x32xf32>
    %275 = vector.broadcast %257 : vector<1x32xf32> to vector<16x32xf32>
    %276 = arith.mulf %275, %274 : vector<16x32xf32>
    %277 = arith.addf %255, %276 : vector<16x32xf32>
    %c1_123 = arith.constant 1 : index
    %c0_124 = arith.constant 0 : index
    %c0_125 = arith.constant 0 : index
    %278 = vector.load %arg5[%c1_123, %c0_124, %c0_125] : memref<2x32x32xf32, #tpu.memory_space<vmem>>, vector<1x32x32xf32>
    %279 = vector.shape_cast %278 : vector<1x32x32xf32> to vector<32x32xf32>
    %cst_126 = arith.constant dense<0.000000e+00> : vector<16x32xf32>
    %280 = tpu.matmul %277, %279, %cst_126 {dimension_numbers = #tpu.dot_dimension_numbers<[1], [0], [0], [1], [0, 0, 1, 1], [], []>} : vector<16x32xf32>, vector<32x32xf32>, vector<16x32xf32> -> vector<16x32xf32>
    %c1_127 = arith.constant 1 : index
    %c0_128 = arith.constant 0 : index
    %c0_129 = arith.constant 0 : index
    %281 = vector.load %arg6[%c1_127, %c0_128, %c0_129] : memref<2x1x32xf32, #tpu.memory_space<vmem>>, vector<1x1x32xf32>
    %282 = vector.shape_cast %281 : vector<1x1x32xf32> to vector<1x32xf32>
    %283 = vector.broadcast %282 : vector<1x32xf32> to vector<16x32xf32>
    %284 = arith.addf %280, %283 : vector<16x32xf32>
    %285 = arith.addf %178, %284 : vector<16x32xf32>
    %c1_130 = arith.constant 1 : index
    %c0_131 = arith.constant 0 : index
    %c0_132 = arith.constant 0 : index
    %286 = vector.load %arg7[%c1_130, %c0_131, %c0_132] : memref<2x1x32xf32, #tpu.memory_space<vmem>>, vector<1x1x32xf32>
    %287 = vector.shape_cast %286 : vector<1x1x32xf32> to vector<1x32xf32>
    %c1_133 = arith.constant 1 : index
    %c0_134 = arith.constant 0 : index
    %c0_135 = arith.constant 0 : index
    %288 = vector.load %arg8[%c1_133, %c0_134, %c0_135] : memref<2x1x32xf32, #tpu.memory_space<vmem>>, vector<1x1x32xf32>
    %289 = vector.shape_cast %288 : vector<1x1x32xf32> to vector<1x32xf32>
    %cst_136 = arith.constant dense<0.000000e+00> : vector<16xf32>
    %290 = vector.multi_reduction <add>, %285, %cst_136 [1] : vector<16x32xf32> to vector<16xf32>
    %291 = vector.shape_cast %290 : vector<16xf32> to vector<16x1xf32>
    %cst_137 = arith.constant 3.200000e+01 : f32
    %292 = vector.broadcast %cst_137 : f32 to vector<16x1xf32>
    %293 = arith.divf %291, %292 : vector<16x1xf32>
    %294 = vector.broadcast %293 : vector<16x1xf32> to vector<16x32xf32>
    %295 = arith.subf %285, %294 : vector<16x32xf32>
    %296 = arith.mulf %295, %295 : vector<16x32xf32>
    %cst_138 = arith.constant dense<0.000000e+00> : vector<16xf32>
    %297 = vector.multi_reduction <add>, %296, %cst_138 [1] : vector<16x32xf32> to vector<16xf32>
    %298 = vector.shape_cast %297 : vector<16xf32> to vector<16x1xf32>
    %cst_139 = arith.constant 3.200000e+01 : f32
    %299 = vector.broadcast %cst_139 : f32 to vector<16x1xf32>
    %300 = arith.divf %298, %299 : vector<16x1xf32>
    %301 = vector.broadcast %293 : vector<16x1xf32> to vector<16x32xf32>
    %302 = arith.subf %285, %301 : vector<16x32xf32>
    %cst_140 = arith.constant 9.99999974E-6 : f32
    %303 = vector.broadcast %cst_140 : f32 to vector<16x1xf32>
    %304 = arith.addf %300, %303 : vector<16x1xf32>
    %305 = math.rsqrt %304 : vector<16x1xf32>
    %306 = vector.broadcast %305 : vector<16x1xf32> to vector<16x32xf32>
    %307 = arith.mulf %302, %306 : vector<16x32xf32>
    %308 = vector.broadcast %287 : vector<1x32xf32> to vector<16x32xf32>
    %309 = arith.mulf %307, %308 : vector<16x32xf32>
    %310 = vector.broadcast %289 : vector<1x32xf32> to vector<16x32xf32>
    %311 = arith.addf %309, %310 : vector<16x32xf32>
    %c1_141 = arith.constant 1 : index
    %c0_142 = arith.constant 0 : index
    %c0_143 = arith.constant 0 : index
    %312 = vector.load %arg9[%c1_141, %c0_142, %c0_143] : memref<2x32x64xf32, #tpu.memory_space<vmem>>, vector<1x32x64xf32>
    %313 = vector.shape_cast %312 : vector<1x32x64xf32> to vector<32x64xf32>
    %cst_144 = arith.constant dense<0.000000e+00> : vector<16x64xf32>
    %314 = tpu.matmul %311, %313, %cst_144 {dimension_numbers = #tpu.dot_dimension_numbers<[1], [0], [0], [1], [0, 0, 1, 1], [], []>} : vector<16x32xf32>, vector<32x64xf32>, vector<16x64xf32> -> vector<16x64xf32>
    %c1_145 = arith.constant 1 : index
    %c0_146 = arith.constant 0 : index
    %c0_147 = arith.constant 0 : index
    %315 = vector.load %arg10[%c1_145, %c0_146, %c0_147] : memref<2x1x64xf32, #tpu.memory_space<vmem>>, vector<1x1x64xf32>
    %316 = vector.shape_cast %315 : vector<1x1x64xf32> to vector<1x64xf32>
    %317 = vector.broadcast %316 : vector<1x64xf32> to vector<16x64xf32>
    %318 = arith.addf %314, %317 : vector<16x64xf32>
    %cst_148 = arith.constant 0.000000e+00 : f32
    %319 = vector.broadcast %cst_148 : f32 to vector<16x64xf32>
    %320 = arith.maximumf %318, %319 : vector<16x64xf32>
    %c1_149 = arith.constant 1 : index
    %c0_150 = arith.constant 0 : index
    %c0_151 = arith.constant 0 : index
    %321 = vector.load %arg11[%c1_149, %c0_150, %c0_151] : memref<2x64x32xf32, #tpu.memory_space<vmem>>, vector<1x64x32xf32>
    %322 = vector.shape_cast %321 : vector<1x64x32xf32> to vector<64x32xf32>
    %cst_152 = arith.constant dense<0.000000e+00> : vector<16x32xf32>
    %323 = tpu.matmul %320, %322, %cst_152 {dimension_numbers = #tpu.dot_dimension_numbers<[1], [0], [0], [1], [0, 0, 1, 1], [], []>} : vector<16x64xf32>, vector<64x32xf32>, vector<16x32xf32> -> vector<16x32xf32>
    %c1_153 = arith.constant 1 : index
    %c0_154 = arith.constant 0 : index
    %c0_155 = arith.constant 0 : index
    %324 = vector.load %arg12[%c1_153, %c0_154, %c0_155] : memref<2x1x32xf32, #tpu.memory_space<vmem>>, vector<1x1x32xf32>
    %325 = vector.shape_cast %324 : vector<1x1x32xf32> to vector<1x32xf32>
    %326 = vector.broadcast %325 : vector<1x32xf32> to vector<16x32xf32>
    %327 = arith.addf %323, %326 : vector<16x32xf32>
    %328 = arith.addf %311, %327 : vector<16x32xf32>
    %c1_156 = arith.constant 1 : index
    %c0_157 = arith.constant 0 : index
    %c0_158 = arith.constant 0 : index
    %329 = vector.load %arg13[%c1_156, %c0_157, %c0_158] : memref<2x1x32xf32, #tpu.memory_space<vmem>>, vector<1x1x32xf32>
    %330 = vector.shape_cast %329 : vector<1x1x32xf32> to vector<1x32xf32>
    %c1_159 = arith.constant 1 : index
    %c0_160 = arith.constant 0 : index
    %c0_161 = arith.constant 0 : index
    %331 = vector.load %arg14[%c1_159, %c0_160, %c0_161] : memref<2x1x32xf32, #tpu.memory_space<vmem>>, vector<1x1x32xf32>
    %332 = vector.shape_cast %331 : vector<1x1x32xf32> to vector<1x32xf32>
    %cst_162 = arith.constant dense<0.000000e+00> : vector<16xf32>
    %333 = vector.multi_reduction <add>, %328, %cst_162 [1] : vector<16x32xf32> to vector<16xf32>
    %334 = vector.shape_cast %333 : vector<16xf32> to vector<16x1xf32>
    %cst_163 = arith.constant 3.200000e+01 : f32
    %335 = vector.broadcast %cst_163 : f32 to vector<16x1xf32>
    %336 = arith.divf %334, %335 : vector<16x1xf32>
    %337 = vector.broadcast %336 : vector<16x1xf32> to vector<16x32xf32>
    %338 = arith.subf %328, %337 : vector<16x32xf32>
    %339 = arith.mulf %338, %338 : vector<16x32xf32>
    %cst_164 = arith.constant dense<0.000000e+00> : vector<16xf32>
    %340 = vector.multi_reduction <add>, %339, %cst_164 [1] : vector<16x32xf32> to vector<16xf32>
    %341 = vector.shape_cast %340 : vector<16xf32> to vector<16x1xf32>
    %cst_165 = arith.constant 3.200000e+01 : f32
    %342 = vector.broadcast %cst_165 : f32 to vector<16x1xf32>
    %343 = arith.divf %341, %342 : vector<16x1xf32>
    %344 = vector.broadcast %336 : vector<16x1xf32> to vector<16x32xf32>
    %345 = arith.subf %328, %344 : vector<16x32xf32>
    %cst_166 = arith.constant 9.99999974E-6 : f32
    %346 = vector.broadcast %cst_166 : f32 to vector<16x1xf32>
    %347 = arith.addf %343, %346 : vector<16x1xf32>
    %348 = math.rsqrt %347 : vector<16x1xf32>
    %349 = vector.broadcast %348 : vector<16x1xf32> to vector<16x32xf32>
    %350 = arith.mulf %345, %349 : vector<16x32xf32>
    %351 = vector.broadcast %330 : vector<1x32xf32> to vector<16x32xf32>
    %352 = arith.mulf %350, %351 : vector<16x32xf32>
    %353 = vector.broadcast %332 : vector<1x32xf32> to vector<16x32xf32>
    %354 = arith.addf %352, %353 : vector<16x32xf32>
    %355 = arith.addf %354, %0 : vector<16x32xf32>
    %c0_167 = arith.constant 0 : index
    %c0_168 = arith.constant 0 : index
    %c0_169 = arith.constant 0 : index
    %356 = vector.load %arg3[%c0_167, %c0_168, %c0_169] : memref<2x32x96xf32, #tpu.memory_space<vmem>>, vector<1x32x96xf32>
    %357 = vector.shape_cast %356 : vector<1x32x96xf32> to vector<32x96xf32>
    %cst_170 = arith.constant dense<0.000000e+00> : vector<16x96xf32>
    %358 = tpu.matmul %355, %357, %cst_170 {dimension_numbers = #tpu.dot_dimension_numbers<[1], [0], [0], [1], [0, 0, 1, 1], [], []>} : vector<16x32xf32>, vector<32x96xf32>, vector<16x96xf32> -> vector<16x96xf32>
    %c0_171 = arith.constant 0 : index
    %c0_172 = arith.constant 0 : index
    %c0_173 = arith.constant 0 : index
    %359 = vector.load %arg4[%c0_171, %c0_172, %c0_173] : memref<2x1x96xf32, #tpu.memory_space<vmem>>, vector<1x1x96xf32>
    %360 = vector.shape_cast %359 : vector<1x1x96xf32> to vector<1x96xf32>
    %361 = vector.broadcast %360 : vector<1x96xf32> to vector<16x96xf32>
    %362 = arith.addf %358, %361 : vector<16x96xf32>
    %363 = vector.extract_strided_slice %362 {offsets = [0, 0], sizes = [16, 32], strides = [1, 1]} : vector<16x96xf32> to vector<16x32xf32>
    %364 = vector.extract_strided_slice %362 {offsets = [0, 32], sizes = [16, 32], strides = [1, 1]} : vector<16x96xf32> to vector<16x32xf32>
    %365 = vector.extract_strided_slice %362 {offsets = [0, 64], sizes = [16, 32], strides = [1, 1]} : vector<16x96xf32> to vector<16x32xf32>
    %cst_174 = arith.constant 0.000000e+00 : f32
    %366 = vector.broadcast %cst_174 : f32 to vector<16x32xf32>
    %c0_175 = arith.constant 0 : index
    %c0_176 = arith.constant 0 : index
    %c0_177 = arith.constant 0 : index
    %367 = vector.load %arg2[%c0_175, %c0_176, %c0_177] : memref<4x1x32xf32, #tpu.memory_space<vmem>>, vector<1x1x32xf32>
    %368 = vector.shape_cast %367 : vector<1x1x32xf32> to vector<1x32xf32>
    %369 = vector.broadcast %368 : vector<1x32xf32> to vector<16x32xf32>
    %370 = arith.mulf %363, %369 : vector<16x32xf32>
    %cst_178 = arith.constant dense<0.000000e+00> : vector<16x16xf32>
    %371 = tpu.matmul %370, %364, %cst_178 {dimension_numbers = #tpu.dot_dimension_numbers<[1], [1], [0], [0], [0, 0, 1, 0], [], []>} : vector<16x32xf32>, vector<16x32xf32>, vector<16x16xf32> -> vector<16x16xf32>
    %cst_179 = arith.constant 0.353553385 : f32
    %372 = vector.broadcast %cst_179 : f32 to vector<16x16xf32>
    %373 = arith.mulf %371, %372 : vector<16x16xf32>
    %374 = arith.addf %373, %1 : vector<16x16xf32>
    %cst_180 = arith.constant dense<0xFF800000> : vector<16xf32>
    %375 = vector.multi_reduction <maximumf>, %374, %cst_180 [1] : vector<16x16xf32> to vector<16xf32>
    %376 = vector.shape_cast %375 : vector<16xf32> to vector<16x1xf32>
    %377 = vector.broadcast %376 : vector<16x1xf32> to vector<16x16xf32>
    %378 = arith.subf %374, %377 : vector<16x16xf32>
    %379 = math.exp %378 : vector<16x16xf32>
    %cst_181 = arith.constant dense<0.000000e+00> : vector<16xf32>
    %380 = vector.multi_reduction <add>, %379, %cst_181 [1] : vector<16x16xf32> to vector<16xf32>
    %381 = vector.shape_cast %380 : vector<16xf32> to vector<16x1xf32>
    %382 = tpu.reciprocal %381 {approx = true} : vector<16x1xf32> -> vector<16x1xf32>
    %383 = vector.broadcast %382 : vector<16x1xf32> to vector<16x16xf32>
    %384 = arith.mulf %379, %383 : vector<16x16xf32>
    %cst_182 = arith.constant dense<0.000000e+00> : vector<16x32xf32>
    %385 = tpu.matmul %384, %365, %cst_182 {dimension_numbers = #tpu.dot_dimension_numbers<[1], [0], [0], [1], [0, 0, 1, 1], [], []>} : vector<16x16xf32>, vector<16x32xf32>, vector<16x32xf32> -> vector<16x32xf32>
    %386 = vector.broadcast %368 : vector<1x32xf32> to vector<16x32xf32>
    %387 = arith.mulf %386, %385 : vector<16x32xf32>
    %388 = arith.addf %366, %387 : vector<16x32xf32>
    %c1_183 = arith.constant 1 : index
    %c0_184 = arith.constant 0 : index
    %c0_185 = arith.constant 0 : index
    %389 = vector.load %arg2[%c1_183, %c0_184, %c0_185] : memref<4x1x32xf32, #tpu.memory_space<vmem>>, vector<1x1x32xf32>
    %390 = vector.shape_cast %389 : vector<1x1x32xf32> to vector<1x32xf32>
    %391 = vector.broadcast %390 : vector<1x32xf32> to vector<16x32xf32>
    %392 = arith.mulf %363, %391 : vector<16x32xf32>
    %cst_186 = arith.constant dense<0.000000e+00> : vector<16x16xf32>
    %393 = tpu.matmul %392, %364, %cst_186 {dimension_numbers = #tpu.dot_dimension_numbers<[1], [1], [0], [0], [0, 0, 1, 0], [], []>} : vector<16x32xf32>, vector<16x32xf32>, vector<16x16xf32> -> vector<16x16xf32>
    %cst_187 = arith.constant 0.353553385 : f32
    %394 = vector.broadcast %cst_187 : f32 to vector<16x16xf32>
    %395 = arith.mulf %393, %394 : vector<16x16xf32>
    %396 = arith.addf %395, %1 : vector<16x16xf32>
    %cst_188 = arith.constant dense<0xFF800000> : vector<16xf32>
    %397 = vector.multi_reduction <maximumf>, %396, %cst_188 [1] : vector<16x16xf32> to vector<16xf32>
    %398 = vector.shape_cast %397 : vector<16xf32> to vector<16x1xf32>
    %399 = vector.broadcast %398 : vector<16x1xf32> to vector<16x16xf32>
    %400 = arith.subf %396, %399 : vector<16x16xf32>
    %401 = math.exp %400 : vector<16x16xf32>
    %cst_189 = arith.constant dense<0.000000e+00> : vector<16xf32>
    %402 = vector.multi_reduction <add>, %401, %cst_189 [1] : vector<16x16xf32> to vector<16xf32>
    %403 = vector.shape_cast %402 : vector<16xf32> to vector<16x1xf32>
    %404 = tpu.reciprocal %403 {approx = true} : vector<16x1xf32> -> vector<16x1xf32>
    %405 = vector.broadcast %404 : vector<16x1xf32> to vector<16x16xf32>
    %406 = arith.mulf %401, %405 : vector<16x16xf32>
    %cst_190 = arith.constant dense<0.000000e+00> : vector<16x32xf32>
    %407 = tpu.matmul %406, %365, %cst_190 {dimension_numbers = #tpu.dot_dimension_numbers<[1], [0], [0], [1], [0, 0, 1, 1], [], []>} : vector<16x16xf32>, vector<16x32xf32>, vector<16x32xf32> -> vector<16x32xf32>
    %408 = vector.broadcast %390 : vector<1x32xf32> to vector<16x32xf32>
    %409 = arith.mulf %408, %407 : vector<16x32xf32>
    %410 = arith.addf %388, %409 : vector<16x32xf32>
    %c2_191 = arith.constant 2 : index
    %c0_192 = arith.constant 0 : index
    %c0_193 = arith.constant 0 : index
    %411 = vector.load %arg2[%c2_191, %c0_192, %c0_193] : memref<4x1x32xf32, #tpu.memory_space<vmem>>, vector<1x1x32xf32>
    %412 = vector.shape_cast %411 : vector<1x1x32xf32> to vector<1x32xf32>
    %413 = vector.broadcast %412 : vector<1x32xf32> to vector<16x32xf32>
    %414 = arith.mulf %363, %413 : vector<16x32xf32>
    %cst_194 = arith.constant dense<0.000000e+00> : vector<16x16xf32>
    %415 = tpu.matmul %414, %364, %cst_194 {dimension_numbers = #tpu.dot_dimension_numbers<[1], [1], [0], [0], [0, 0, 1, 0], [], []>} : vector<16x32xf32>, vector<16x32xf32>, vector<16x16xf32> -> vector<16x16xf32>
    %cst_195 = arith.constant 0.353553385 : f32
    %416 = vector.broadcast %cst_195 : f32 to vector<16x16xf32>
    %417 = arith.mulf %415, %416 : vector<16x16xf32>
    %418 = arith.addf %417, %1 : vector<16x16xf32>
    %cst_196 = arith.constant dense<0xFF800000> : vector<16xf32>
    %419 = vector.multi_reduction <maximumf>, %418, %cst_196 [1] : vector<16x16xf32> to vector<16xf32>
    %420 = vector.shape_cast %419 : vector<16xf32> to vector<16x1xf32>
    %421 = vector.broadcast %420 : vector<16x1xf32> to vector<16x16xf32>
    %422 = arith.subf %418, %421 : vector<16x16xf32>
    %423 = math.exp %422 : vector<16x16xf32>
    %cst_197 = arith.constant dense<0.000000e+00> : vector<16xf32>
    %424 = vector.multi_reduction <add>, %423, %cst_197 [1] : vector<16x16xf32> to vector<16xf32>
    %425 = vector.shape_cast %424 : vector<16xf32> to vector<16x1xf32>
    %426 = tpu.reciprocal %425 {approx = true} : vector<16x1xf32> -> vector<16x1xf32>
    %427 = vector.broadcast %426 : vector<16x1xf32> to vector<16x16xf32>
    %428 = arith.mulf %423, %427 : vector<16x16xf32>
    %cst_198 = arith.constant dense<0.000000e+00> : vector<16x32xf32>
    %429 = tpu.matmul %428, %365, %cst_198 {dimension_numbers = #tpu.dot_dimension_numbers<[1], [0], [0], [1], [0, 0, 1, 1], [], []>} : vector<16x16xf32>, vector<16x32xf32>, vector<16x32xf32> -> vector<16x32xf32>
    %430 = vector.broadcast %412 : vector<1x32xf32> to vector<16x32xf32>
    %431 = arith.mulf %430, %429 : vector<16x32xf32>
    %432 = arith.addf %410, %431 : vector<16x32xf32>
    %c3_199 = arith.constant 3 : index
    %c0_200 = arith.constant 0 : index
    %c0_201 = arith.constant 0 : index
    %433 = vector.load %arg2[%c3_199, %c0_200, %c0_201] : memref<4x1x32xf32, #tpu.memory_space<vmem>>, vector<1x1x32xf32>
    %434 = vector.shape_cast %433 : vector<1x1x32xf32> to vector<1x32xf32>
    %435 = vector.broadcast %434 : vector<1x32xf32> to vector<16x32xf32>
    %436 = arith.mulf %363, %435 : vector<16x32xf32>
    %cst_202 = arith.constant dense<0.000000e+00> : vector<16x16xf32>
    %437 = tpu.matmul %436, %364, %cst_202 {dimension_numbers = #tpu.dot_dimension_numbers<[1], [1], [0], [0], [0, 0, 1, 0], [], []>} : vector<16x32xf32>, vector<16x32xf32>, vector<16x16xf32> -> vector<16x16xf32>
    %cst_203 = arith.constant 0.353553385 : f32
    %438 = vector.broadcast %cst_203 : f32 to vector<16x16xf32>
    %439 = arith.mulf %437, %438 : vector<16x16xf32>
    %440 = arith.addf %439, %1 : vector<16x16xf32>
    %cst_204 = arith.constant dense<0xFF800000> : vector<16xf32>
    %441 = vector.multi_reduction <maximumf>, %440, %cst_204 [1] : vector<16x16xf32> to vector<16xf32>
    %442 = vector.shape_cast %441 : vector<16xf32> to vector<16x1xf32>
    %443 = vector.broadcast %442 : vector<16x1xf32> to vector<16x16xf32>
    %444 = arith.subf %440, %443 : vector<16x16xf32>
    %445 = math.exp %444 : vector<16x16xf32>
    %cst_205 = arith.constant dense<0.000000e+00> : vector<16xf32>
    %446 = vector.multi_reduction <add>, %445, %cst_205 [1] : vector<16x16xf32> to vector<16xf32>
    %447 = vector.shape_cast %446 : vector<16xf32> to vector<16x1xf32>
    %448 = tpu.reciprocal %447 {approx = true} : vector<16x1xf32> -> vector<16x1xf32>
    %449 = vector.broadcast %448 : vector<16x1xf32> to vector<16x16xf32>
    %450 = arith.mulf %445, %449 : vector<16x16xf32>
    %cst_206 = arith.constant dense<0.000000e+00> : vector<16x32xf32>
    %451 = tpu.matmul %450, %365, %cst_206 {dimension_numbers = #tpu.dot_dimension_numbers<[1], [0], [0], [1], [0, 0, 1, 1], [], []>} : vector<16x16xf32>, vector<16x32xf32>, vector<16x32xf32> -> vector<16x32xf32>
    %452 = vector.broadcast %434 : vector<1x32xf32> to vector<16x32xf32>
    %453 = arith.mulf %452, %451 : vector<16x32xf32>
    %454 = arith.addf %432, %453 : vector<16x32xf32>
    %c0_207 = arith.constant 0 : index
    %c0_208 = arith.constant 0 : index
    %c0_209 = arith.constant 0 : index
    %455 = vector.load %arg5[%c0_207, %c0_208, %c0_209] : memref<2x32x32xf32, #tpu.memory_space<vmem>>, vector<1x32x32xf32>
    %456 = vector.shape_cast %455 : vector<1x32x32xf32> to vector<32x32xf32>
    %cst_210 = arith.constant dense<0.000000e+00> : vector<16x32xf32>
    %457 = tpu.matmul %454, %456, %cst_210 {dimension_numbers = #tpu.dot_dimension_numbers<[1], [0], [0], [1], [0, 0, 1, 1], [], []>} : vector<16x32xf32>, vector<32x32xf32>, vector<16x32xf32> -> vector<16x32xf32>
    %c0_211 = arith.constant 0 : index
    %c0_212 = arith.constant 0 : index
    %c0_213 = arith.constant 0 : index
    %458 = vector.load %arg6[%c0_211, %c0_212, %c0_213] : memref<2x1x32xf32, #tpu.memory_space<vmem>>, vector<1x1x32xf32>
    %459 = vector.shape_cast %458 : vector<1x1x32xf32> to vector<1x32xf32>
    %460 = vector.broadcast %459 : vector<1x32xf32> to vector<16x32xf32>
    %461 = arith.addf %457, %460 : vector<16x32xf32>
    %462 = arith.addf %355, %461 : vector<16x32xf32>
    %c0_214 = arith.constant 0 : index
    %c0_215 = arith.constant 0 : index
    %c0_216 = arith.constant 0 : index
    %463 = vector.load %arg7[%c0_214, %c0_215, %c0_216] : memref<2x1x32xf32, #tpu.memory_space<vmem>>, vector<1x1x32xf32>
    %464 = vector.shape_cast %463 : vector<1x1x32xf32> to vector<1x32xf32>
    %c0_217 = arith.constant 0 : index
    %c0_218 = arith.constant 0 : index
    %c0_219 = arith.constant 0 : index
    %465 = vector.load %arg8[%c0_217, %c0_218, %c0_219] : memref<2x1x32xf32, #tpu.memory_space<vmem>>, vector<1x1x32xf32>
    %466 = vector.shape_cast %465 : vector<1x1x32xf32> to vector<1x32xf32>
    %cst_220 = arith.constant dense<0.000000e+00> : vector<16xf32>
    %467 = vector.multi_reduction <add>, %462, %cst_220 [1] : vector<16x32xf32> to vector<16xf32>
    %468 = vector.shape_cast %467 : vector<16xf32> to vector<16x1xf32>
    %cst_221 = arith.constant 3.200000e+01 : f32
    %469 = vector.broadcast %cst_221 : f32 to vector<16x1xf32>
    %470 = arith.divf %468, %469 : vector<16x1xf32>
    %471 = vector.broadcast %470 : vector<16x1xf32> to vector<16x32xf32>
    %472 = arith.subf %462, %471 : vector<16x32xf32>
    %473 = arith.mulf %472, %472 : vector<16x32xf32>
    %cst_222 = arith.constant dense<0.000000e+00> : vector<16xf32>
    %474 = vector.multi_reduction <add>, %473, %cst_222 [1] : vector<16x32xf32> to vector<16xf32>
    %475 = vector.shape_cast %474 : vector<16xf32> to vector<16x1xf32>
    %cst_223 = arith.constant 3.200000e+01 : f32
    %476 = vector.broadcast %cst_223 : f32 to vector<16x1xf32>
    %477 = arith.divf %475, %476 : vector<16x1xf32>
    %478 = vector.broadcast %470 : vector<16x1xf32> to vector<16x32xf32>
    %479 = arith.subf %462, %478 : vector<16x32xf32>
    %cst_224 = arith.constant 9.99999974E-6 : f32
    %480 = vector.broadcast %cst_224 : f32 to vector<16x1xf32>
    %481 = arith.addf %477, %480 : vector<16x1xf32>
    %482 = math.rsqrt %481 : vector<16x1xf32>
    %483 = vector.broadcast %482 : vector<16x1xf32> to vector<16x32xf32>
    %484 = arith.mulf %479, %483 : vector<16x32xf32>
    %485 = vector.broadcast %464 : vector<1x32xf32> to vector<16x32xf32>
    %486 = arith.mulf %484, %485 : vector<16x32xf32>
    %487 = vector.broadcast %466 : vector<1x32xf32> to vector<16x32xf32>
    %488 = arith.addf %486, %487 : vector<16x32xf32>
    %c0_225 = arith.constant 0 : index
    %c0_226 = arith.constant 0 : index
    %c0_227 = arith.constant 0 : index
    %489 = vector.load %arg9[%c0_225, %c0_226, %c0_227] : memref<2x32x64xf32, #tpu.memory_space<vmem>>, vector<1x32x64xf32>
    %490 = vector.shape_cast %489 : vector<1x32x64xf32> to vector<32x64xf32>
    %cst_228 = arith.constant dense<0.000000e+00> : vector<16x64xf32>
    %491 = tpu.matmul %488, %490, %cst_228 {dimension_numbers = #tpu.dot_dimension_numbers<[1], [0], [0], [1], [0, 0, 1, 1], [], []>} : vector<16x32xf32>, vector<32x64xf32>, vector<16x64xf32> -> vector<16x64xf32>
    %c0_229 = arith.constant 0 : index
    %c0_230 = arith.constant 0 : index
    %c0_231 = arith.constant 0 : index
    %492 = vector.load %arg10[%c0_229, %c0_230, %c0_231] : memref<2x1x64xf32, #tpu.memory_space<vmem>>, vector<1x1x64xf32>
    %493 = vector.shape_cast %492 : vector<1x1x64xf32> to vector<1x64xf32>
    %494 = vector.broadcast %493 : vector<1x64xf32> to vector<16x64xf32>
    %495 = arith.addf %491, %494 : vector<16x64xf32>
    %cst_232 = arith.constant 0.000000e+00 : f32
    %496 = vector.broadcast %cst_232 : f32 to vector<16x64xf32>
    %497 = arith.maximumf %495, %496 : vector<16x64xf32>
    %c0_233 = arith.constant 0 : index
    %c0_234 = arith.constant 0 : index
    %c0_235 = arith.constant 0 : index
    %498 = vector.load %arg11[%c0_233, %c0_234, %c0_235] : memref<2x64x32xf32, #tpu.memory_space<vmem>>, vector<1x64x32xf32>
    %499 = vector.shape_cast %498 : vector<1x64x32xf32> to vector<64x32xf32>
    %cst_236 = arith.constant dense<0.000000e+00> : vector<16x32xf32>
    %500 = tpu.matmul %497, %499, %cst_236 {dimension_numbers = #tpu.dot_dimension_numbers<[1], [0], [0], [1], [0, 0, 1, 1], [], []>} : vector<16x64xf32>, vector<64x32xf32>, vector<16x32xf32> -> vector<16x32xf32>
    %c0_237 = arith.constant 0 : index
    %c0_238 = arith.constant 0 : index
    %c0_239 = arith.constant 0 : index
    %501 = vector.load %arg12[%c0_237, %c0_238, %c0_239] : memref<2x1x32xf32, #tpu.memory_space<vmem>>, vector<1x1x32xf32>
    %502 = vector.shape_cast %501 : vector<1x1x32xf32> to vector<1x32xf32>
    %503 = vector.broadcast %502 : vector<1x32xf32> to vector<16x32xf32>
    %504 = arith.addf %500, %503 : vector<16x32xf32>
    %505 = arith.addf %488, %504 : vector<16x32xf32>
    %c0_240 = arith.constant 0 : index
    %c0_241 = arith.constant 0 : index
    %c0_242 = arith.constant 0 : index
    %506 = vector.load %arg13[%c0_240, %c0_241, %c0_242] : memref<2x1x32xf32, #tpu.memory_space<vmem>>, vector<1x1x32xf32>
    %507 = vector.shape_cast %506 : vector<1x1x32xf32> to vector<1x32xf32>
    %c0_243 = arith.constant 0 : index
    %c0_244 = arith.constant 0 : index
    %c0_245 = arith.constant 0 : index
    %508 = vector.load %arg14[%c0_243, %c0_244, %c0_245] : memref<2x1x32xf32, #tpu.memory_space<vmem>>, vector<1x1x32xf32>
    %509 = vector.shape_cast %508 : vector<1x1x32xf32> to vector<1x32xf32>
    %cst_246 = arith.constant dense<0.000000e+00> : vector<16xf32>
    %510 = vector.multi_reduction <add>, %505, %cst_246 [1] : vector<16x32xf32> to vector<16xf32>
    %511 = vector.shape_cast %510 : vector<16xf32> to vector<16x1xf32>
    %cst_247 = arith.constant 3.200000e+01 : f32
    %512 = vector.broadcast %cst_247 : f32 to vector<16x1xf32>
    %513 = arith.divf %511, %512 : vector<16x1xf32>
    %514 = vector.broadcast %513 : vector<16x1xf32> to vector<16x32xf32>
    %515 = arith.subf %505, %514 : vector<16x32xf32>
    %516 = arith.mulf %515, %515 : vector<16x32xf32>
    %cst_248 = arith.constant dense<0.000000e+00> : vector<16xf32>
    %517 = vector.multi_reduction <add>, %516, %cst_248 [1] : vector<16x32xf32> to vector<16xf32>
    %518 = vector.shape_cast %517 : vector<16xf32> to vector<16x1xf32>
    %cst_249 = arith.constant 3.200000e+01 : f32
    %519 = vector.broadcast %cst_249 : f32 to vector<16x1xf32>
    %520 = arith.divf %518, %519 : vector<16x1xf32>
    %521 = vector.broadcast %513 : vector<16x1xf32> to vector<16x32xf32>
    %522 = arith.subf %505, %521 : vector<16x32xf32>
    %cst_250 = arith.constant 9.99999974E-6 : f32
    %523 = vector.broadcast %cst_250 : f32 to vector<16x1xf32>
    %524 = arith.addf %520, %523 : vector<16x1xf32>
    %525 = math.rsqrt %524 : vector<16x1xf32>
    %526 = vector.broadcast %525 : vector<16x1xf32> to vector<16x32xf32>
    %527 = arith.mulf %522, %526 : vector<16x32xf32>
    %528 = vector.broadcast %507 : vector<1x32xf32> to vector<16x32xf32>
    %529 = arith.mulf %527, %528 : vector<16x32xf32>
    %530 = vector.broadcast %509 : vector<1x32xf32> to vector<16x32xf32>
    %531 = arith.addf %529, %530 : vector<16x32xf32>
    %c1_251 = arith.constant 1 : index
    %c0_252 = arith.constant 0 : index
    %c0_253 = arith.constant 0 : index
    %532 = vector.load %arg3[%c1_251, %c0_252, %c0_253] : memref<2x32x96xf32, #tpu.memory_space<vmem>>, vector<1x32x96xf32>
    %533 = vector.shape_cast %532 : vector<1x32x96xf32> to vector<32x96xf32>
    %cst_254 = arith.constant dense<0.000000e+00> : vector<16x96xf32>
    %534 = tpu.matmul %531, %533, %cst_254 {dimension_numbers = #tpu.dot_dimension_numbers<[1], [0], [0], [1], [0, 0, 1, 1], [], []>} : vector<16x32xf32>, vector<32x96xf32>, vector<16x96xf32> -> vector<16x96xf32>
    %c1_255 = arith.constant 1 : index
    %c0_256 = arith.constant 0 : index
    %c0_257 = arith.constant 0 : index
    %535 = vector.load %arg4[%c1_255, %c0_256, %c0_257] : memref<2x1x96xf32, #tpu.memory_space<vmem>>, vector<1x1x96xf32>
    %536 = vector.shape_cast %535 : vector<1x1x96xf32> to vector<1x96xf32>
    %537 = vector.broadcast %536 : vector<1x96xf32> to vector<16x96xf32>
    %538 = arith.addf %534, %537 : vector<16x96xf32>
    %539 = vector.extract_strided_slice %538 {offsets = [0, 0], sizes = [16, 32], strides = [1, 1]} : vector<16x96xf32> to vector<16x32xf32>
    %540 = vector.extract_strided_slice %538 {offsets = [0, 32], sizes = [16, 32], strides = [1, 1]} : vector<16x96xf32> to vector<16x32xf32>
    %541 = vector.extract_strided_slice %538 {offsets = [0, 64], sizes = [16, 32], strides = [1, 1]} : vector<16x96xf32> to vector<16x32xf32>
    %cst_258 = arith.constant 0.000000e+00 : f32
    %542 = vector.broadcast %cst_258 : f32 to vector<16x32xf32>
    %c0_259 = arith.constant 0 : index
    %c0_260 = arith.constant 0 : index
    %c0_261 = arith.constant 0 : index
    %543 = vector.load %arg2[%c0_259, %c0_260, %c0_261] : memref<4x1x32xf32, #tpu.memory_space<vmem>>, vector<1x1x32xf32>
    %544 = vector.shape_cast %543 : vector<1x1x32xf32> to vector<1x32xf32>
    %545 = vector.broadcast %544 : vector<1x32xf32> to vector<16x32xf32>
    %546 = arith.mulf %539, %545 : vector<16x32xf32>
    %cst_262 = arith.constant dense<0.000000e+00> : vector<16x16xf32>
    %547 = tpu.matmul %546, %540, %cst_262 {dimension_numbers = #tpu.dot_dimension_numbers<[1], [1], [0], [0], [0, 0, 1, 0], [], []>} : vector<16x32xf32>, vector<16x32xf32>, vector<16x16xf32> -> vector<16x16xf32>
    %cst_263 = arith.constant 0.353553385 : f32
    %548 = vector.broadcast %cst_263 : f32 to vector<16x16xf32>
    %549 = arith.mulf %547, %548 : vector<16x16xf32>
    %550 = arith.addf %549, %1 : vector<16x16xf32>
    %cst_264 = arith.constant dense<0xFF800000> : vector<16xf32>
    %551 = vector.multi_reduction <maximumf>, %550, %cst_264 [1] : vector<16x16xf32> to vector<16xf32>
    %552 = vector.shape_cast %551 : vector<16xf32> to vector<16x1xf32>
    %553 = vector.broadcast %552 : vector<16x1xf32> to vector<16x16xf32>
    %554 = arith.subf %550, %553 : vector<16x16xf32>
    %555 = math.exp %554 : vector<16x16xf32>
    %cst_265 = arith.constant dense<0.000000e+00> : vector<16xf32>
    %556 = vector.multi_reduction <add>, %555, %cst_265 [1] : vector<16x16xf32> to vector<16xf32>
    %557 = vector.shape_cast %556 : vector<16xf32> to vector<16x1xf32>
    %558 = tpu.reciprocal %557 {approx = true} : vector<16x1xf32> -> vector<16x1xf32>
    %559 = vector.broadcast %558 : vector<16x1xf32> to vector<16x16xf32>
    %560 = arith.mulf %555, %559 : vector<16x16xf32>
    %cst_266 = arith.constant dense<0.000000e+00> : vector<16x32xf32>
    %561 = tpu.matmul %560, %541, %cst_266 {dimension_numbers = #tpu.dot_dimension_numbers<[1], [0], [0], [1], [0, 0, 1, 1], [], []>} : vector<16x16xf32>, vector<16x32xf32>, vector<16x32xf32> -> vector<16x32xf32>
    %562 = vector.broadcast %544 : vector<1x32xf32> to vector<16x32xf32>
    %563 = arith.mulf %562, %561 : vector<16x32xf32>
    %564 = arith.addf %542, %563 : vector<16x32xf32>
    %c1_267 = arith.constant 1 : index
    %c0_268 = arith.constant 0 : index
    %c0_269 = arith.constant 0 : index
    %565 = vector.load %arg2[%c1_267, %c0_268, %c0_269] : memref<4x1x32xf32, #tpu.memory_space<vmem>>, vector<1x1x32xf32>
    %566 = vector.shape_cast %565 : vector<1x1x32xf32> to vector<1x32xf32>
    %567 = vector.broadcast %566 : vector<1x32xf32> to vector<16x32xf32>
    %568 = arith.mulf %539, %567 : vector<16x32xf32>
    %cst_270 = arith.constant dense<0.000000e+00> : vector<16x16xf32>
    %569 = tpu.matmul %568, %540, %cst_270 {dimension_numbers = #tpu.dot_dimension_numbers<[1], [1], [0], [0], [0, 0, 1, 0], [], []>} : vector<16x32xf32>, vector<16x32xf32>, vector<16x16xf32> -> vector<16x16xf32>
    %cst_271 = arith.constant 0.353553385 : f32
    %570 = vector.broadcast %cst_271 : f32 to vector<16x16xf32>
    %571 = arith.mulf %569, %570 : vector<16x16xf32>
    %572 = arith.addf %571, %1 : vector<16x16xf32>
    %cst_272 = arith.constant dense<0xFF800000> : vector<16xf32>
    %573 = vector.multi_reduction <maximumf>, %572, %cst_272 [1] : vector<16x16xf32> to vector<16xf32>
    %574 = vector.shape_cast %573 : vector<16xf32> to vector<16x1xf32>
    %575 = vector.broadcast %574 : vector<16x1xf32> to vector<16x16xf32>
    %576 = arith.subf %572, %575 : vector<16x16xf32>
    %577 = math.exp %576 : vector<16x16xf32>
    %cst_273 = arith.constant dense<0.000000e+00> : vector<16xf32>
    %578 = vector.multi_reduction <add>, %577, %cst_273 [1] : vector<16x16xf32> to vector<16xf32>
    %579 = vector.shape_cast %578 : vector<16xf32> to vector<16x1xf32>
    %580 = tpu.reciprocal %579 {approx = true} : vector<16x1xf32> -> vector<16x1xf32>
    %581 = vector.broadcast %580 : vector<16x1xf32> to vector<16x16xf32>
    %582 = arith.mulf %577, %581 : vector<16x16xf32>
    %cst_274 = arith.constant dense<0.000000e+00> : vector<16x32xf32>
    %583 = tpu.matmul %582, %541, %cst_274 {dimension_numbers = #tpu.dot_dimension_numbers<[1], [0], [0], [1], [0, 0, 1, 1], [], []>} : vector<16x16xf32>, vector<16x32xf32>, vector<16x32xf32> -> vector<16x32xf32>
    %584 = vector.broadcast %566 : vector<1x32xf32> to vector<16x32xf32>
    %585 = arith.mulf %584, %583 : vector<16x32xf32>
    %586 = arith.addf %564, %585 : vector<16x32xf32>
    %c2_275 = arith.constant 2 : index
    %c0_276 = arith.constant 0 : index
    %c0_277 = arith.constant 0 : index
    %587 = vector.load %arg2[%c2_275, %c0_276, %c0_277] : memref<4x1x32xf32, #tpu.memory_space<vmem>>, vector<1x1x32xf32>
    %588 = vector.shape_cast %587 : vector<1x1x32xf32> to vector<1x32xf32>
    %589 = vector.broadcast %588 : vector<1x32xf32> to vector<16x32xf32>
    %590 = arith.mulf %539, %589 : vector<16x32xf32>
    %cst_278 = arith.constant dense<0.000000e+00> : vector<16x16xf32>
    %591 = tpu.matmul %590, %540, %cst_278 {dimension_numbers = #tpu.dot_dimension_numbers<[1], [1], [0], [0], [0, 0, 1, 0], [], []>} : vector<16x32xf32>, vector<16x32xf32>, vector<16x16xf32> -> vector<16x16xf32>
    %cst_279 = arith.constant 0.353553385 : f32
    %592 = vector.broadcast %cst_279 : f32 to vector<16x16xf32>
    %593 = arith.mulf %591, %592 : vector<16x16xf32>
    %594 = arith.addf %593, %1 : vector<16x16xf32>
    %cst_280 = arith.constant dense<0xFF800000> : vector<16xf32>
    %595 = vector.multi_reduction <maximumf>, %594, %cst_280 [1] : vector<16x16xf32> to vector<16xf32>
    %596 = vector.shape_cast %595 : vector<16xf32> to vector<16x1xf32>
    %597 = vector.broadcast %596 : vector<16x1xf32> to vector<16x16xf32>
    %598 = arith.subf %594, %597 : vector<16x16xf32>
    %599 = math.exp %598 : vector<16x16xf32>
    %cst_281 = arith.constant dense<0.000000e+00> : vector<16xf32>
    %600 = vector.multi_reduction <add>, %599, %cst_281 [1] : vector<16x16xf32> to vector<16xf32>
    %601 = vector.shape_cast %600 : vector<16xf32> to vector<16x1xf32>
    %602 = tpu.reciprocal %601 {approx = true} : vector<16x1xf32> -> vector<16x1xf32>
    %603 = vector.broadcast %602 : vector<16x1xf32> to vector<16x16xf32>
    %604 = arith.mulf %599, %603 : vector<16x16xf32>
    %cst_282 = arith.constant dense<0.000000e+00> : vector<16x32xf32>
    %605 = tpu.matmul %604, %541, %cst_282 {dimension_numbers = #tpu.dot_dimension_numbers<[1], [0], [0], [1], [0, 0, 1, 1], [], []>} : vector<16x16xf32>, vector<16x32xf32>, vector<16x32xf32> -> vector<16x32xf32>
    %606 = vector.broadcast %588 : vector<1x32xf32> to vector<16x32xf32>
    %607 = arith.mulf %606, %605 : vector<16x32xf32>
    %608 = arith.addf %586, %607 : vector<16x32xf32>
    %c3_283 = arith.constant 3 : index
    %c0_284 = arith.constant 0 : index
    %c0_285 = arith.constant 0 : index
    %609 = vector.load %arg2[%c3_283, %c0_284, %c0_285] : memref<4x1x32xf32, #tpu.memory_space<vmem>>, vector<1x1x32xf32>
    %610 = vector.shape_cast %609 : vector<1x1x32xf32> to vector<1x32xf32>
    %611 = vector.broadcast %610 : vector<1x32xf32> to vector<16x32xf32>
    %612 = arith.mulf %539, %611 : vector<16x32xf32>
    %cst_286 = arith.constant dense<0.000000e+00> : vector<16x16xf32>
    %613 = tpu.matmul %612, %540, %cst_286 {dimension_numbers = #tpu.dot_dimension_numbers<[1], [1], [0], [0], [0, 0, 1, 0], [], []>} : vector<16x32xf32>, vector<16x32xf32>, vector<16x16xf32> -> vector<16x16xf32>
    %cst_287 = arith.constant 0.353553385 : f32
    %614 = vector.broadcast %cst_287 : f32 to vector<16x16xf32>
    %615 = arith.mulf %613, %614 : vector<16x16xf32>
    %616 = arith.addf %615, %1 : vector<16x16xf32>
    %cst_288 = arith.constant dense<0xFF800000> : vector<16xf32>
    %617 = vector.multi_reduction <maximumf>, %616, %cst_288 [1] : vector<16x16xf32> to vector<16xf32>
    %618 = vector.shape_cast %617 : vector<16xf32> to vector<16x1xf32>
    %619 = vector.broadcast %618 : vector<16x1xf32> to vector<16x16xf32>
    %620 = arith.subf %616, %619 : vector<16x16xf32>
    %621 = math.exp %620 : vector<16x16xf32>
    %cst_289 = arith.constant dense<0.000000e+00> : vector<16xf32>
    %622 = vector.multi_reduction <add>, %621, %cst_289 [1] : vector<16x16xf32> to vector<16xf32>
    %623 = vector.shape_cast %622 : vector<16xf32> to vector<16x1xf32>
    %624 = tpu.reciprocal %623 {approx = true} : vector<16x1xf32> -> vector<16x1xf32>
    %625 = vector.broadcast %624 : vector<16x1xf32> to vector<16x16xf32>
    %626 = arith.mulf %621, %625 : vector<16x16xf32>
    %cst_290 = arith.constant dense<0.000000e+00> : vector<16x32xf32>
    %627 = tpu.matmul %626, %541, %cst_290 {dimension_numbers = #tpu.dot_dimension_numbers<[1], [0], [0], [1], [0, 0, 1, 1], [], []>} : vector<16x16xf32>, vector<16x32xf32>, vector<16x32xf32> -> vector<16x32xf32>
    %628 = vector.broadcast %610 : vector<1x32xf32> to vector<16x32xf32>
    %629 = arith.mulf %628, %627 : vector<16x32xf32>
    %630 = arith.addf %608, %629 : vector<16x32xf32>
    %c1_291 = arith.constant 1 : index
    %c0_292 = arith.constant 0 : index
    %c0_293 = arith.constant 0 : index
    %631 = vector.load %arg5[%c1_291, %c0_292, %c0_293] : memref<2x32x32xf32, #tpu.memory_space<vmem>>, vector<1x32x32xf32>
    %632 = vector.shape_cast %631 : vector<1x32x32xf32> to vector<32x32xf32>
    %cst_294 = arith.constant dense<0.000000e+00> : vector<16x32xf32>
    %633 = tpu.matmul %630, %632, %cst_294 {dimension_numbers = #tpu.dot_dimension_numbers<[1], [0], [0], [1], [0, 0, 1, 1], [], []>} : vector<16x32xf32>, vector<32x32xf32>, vector<16x32xf32> -> vector<16x32xf32>
    %c1_295 = arith.constant 1 : index
    %c0_296 = arith.constant 0 : index
    %c0_297 = arith.constant 0 : index
    %634 = vector.load %arg6[%c1_295, %c0_296, %c0_297] : memref<2x1x32xf32, #tpu.memory_space<vmem>>, vector<1x1x32xf32>
    %635 = vector.shape_cast %634 : vector<1x1x32xf32> to vector<1x32xf32>
    %636 = vector.broadcast %635 : vector<1x32xf32> to vector<16x32xf32>
    %637 = arith.addf %633, %636 : vector<16x32xf32>
    %638 = arith.addf %531, %637 : vector<16x32xf32>
    %c1_298 = arith.constant 1 : index
    %c0_299 = arith.constant 0 : index
    %c0_300 = arith.constant 0 : index
    %639 = vector.load %arg7[%c1_298, %c0_299, %c0_300] : memref<2x1x32xf32, #tpu.memory_space<vmem>>, vector<1x1x32xf32>
    %640 = vector.shape_cast %639 : vector<1x1x32xf32> to vector<1x32xf32>
    %c1_301 = arith.constant 1 : index
    %c0_302 = arith.constant 0 : index
    %c0_303 = arith.constant 0 : index
    %641 = vector.load %arg8[%c1_301, %c0_302, %c0_303] : memref<2x1x32xf32, #tpu.memory_space<vmem>>, vector<1x1x32xf32>
    %642 = vector.shape_cast %641 : vector<1x1x32xf32> to vector<1x32xf32>
    %cst_304 = arith.constant dense<0.000000e+00> : vector<16xf32>
    %643 = vector.multi_reduction <add>, %638, %cst_304 [1] : vector<16x32xf32> to vector<16xf32>
    %644 = vector.shape_cast %643 : vector<16xf32> to vector<16x1xf32>
    %cst_305 = arith.constant 3.200000e+01 : f32
    %645 = vector.broadcast %cst_305 : f32 to vector<16x1xf32>
    %646 = arith.divf %644, %645 : vector<16x1xf32>
    %647 = vector.broadcast %646 : vector<16x1xf32> to vector<16x32xf32>
    %648 = arith.subf %638, %647 : vector<16x32xf32>
    %649 = arith.mulf %648, %648 : vector<16x32xf32>
    %cst_306 = arith.constant dense<0.000000e+00> : vector<16xf32>
    %650 = vector.multi_reduction <add>, %649, %cst_306 [1] : vector<16x32xf32> to vector<16xf32>
    %651 = vector.shape_cast %650 : vector<16xf32> to vector<16x1xf32>
    %cst_307 = arith.constant 3.200000e+01 : f32
    %652 = vector.broadcast %cst_307 : f32 to vector<16x1xf32>
    %653 = arith.divf %651, %652 : vector<16x1xf32>
    %654 = vector.broadcast %646 : vector<16x1xf32> to vector<16x32xf32>
    %655 = arith.subf %638, %654 : vector<16x32xf32>
    %cst_308 = arith.constant 9.99999974E-6 : f32
    %656 = vector.broadcast %cst_308 : f32 to vector<16x1xf32>
    %657 = arith.addf %653, %656 : vector<16x1xf32>
    %658 = math.rsqrt %657 : vector<16x1xf32>
    %659 = vector.broadcast %658 : vector<16x1xf32> to vector<16x32xf32>
    %660 = arith.mulf %655, %659 : vector<16x32xf32>
    %661 = vector.broadcast %640 : vector<1x32xf32> to vector<16x32xf32>
    %662 = arith.mulf %660, %661 : vector<16x32xf32>
    %663 = vector.broadcast %642 : vector<1x32xf32> to vector<16x32xf32>
    %664 = arith.addf %662, %663 : vector<16x32xf32>
    %c1_309 = arith.constant 1 : index
    %c0_310 = arith.constant 0 : index
    %c0_311 = arith.constant 0 : index
    %665 = vector.load %arg9[%c1_309, %c0_310, %c0_311] : memref<2x32x64xf32, #tpu.memory_space<vmem>>, vector<1x32x64xf32>
    %666 = vector.shape_cast %665 : vector<1x32x64xf32> to vector<32x64xf32>
    %cst_312 = arith.constant dense<0.000000e+00> : vector<16x64xf32>
    %667 = tpu.matmul %664, %666, %cst_312 {dimension_numbers = #tpu.dot_dimension_numbers<[1], [0], [0], [1], [0, 0, 1, 1], [], []>} : vector<16x32xf32>, vector<32x64xf32>, vector<16x64xf32> -> vector<16x64xf32>
    %c1_313 = arith.constant 1 : index
    %c0_314 = arith.constant 0 : index
    %c0_315 = arith.constant 0 : index
    %668 = vector.load %arg10[%c1_313, %c0_314, %c0_315] : memref<2x1x64xf32, #tpu.memory_space<vmem>>, vector<1x1x64xf32>
    %669 = vector.shape_cast %668 : vector<1x1x64xf32> to vector<1x64xf32>
    %670 = vector.broadcast %669 : vector<1x64xf32> to vector<16x64xf32>
    %671 = arith.addf %667, %670 : vector<16x64xf32>
    %cst_316 = arith.constant 0.000000e+00 : f32
    %672 = vector.broadcast %cst_316 : f32 to vector<16x64xf32>
    %673 = arith.maximumf %671, %672 : vector<16x64xf32>
    %c1_317 = arith.constant 1 : index
    %c0_318 = arith.constant 0 : index
    %c0_319 = arith.constant 0 : index
    %674 = vector.load %arg11[%c1_317, %c0_318, %c0_319] : memref<2x64x32xf32, #tpu.memory_space<vmem>>, vector<1x64x32xf32>
    %675 = vector.shape_cast %674 : vector<1x64x32xf32> to vector<64x32xf32>
    %cst_320 = arith.constant dense<0.000000e+00> : vector<16x32xf32>
    %676 = tpu.matmul %673, %675, %cst_320 {dimension_numbers = #tpu.dot_dimension_numbers<[1], [0], [0], [1], [0, 0, 1, 1], [], []>} : vector<16x64xf32>, vector<64x32xf32>, vector<16x32xf32> -> vector<16x32xf32>
    %c1_321 = arith.constant 1 : index
    %c0_322 = arith.constant 0 : index
    %c0_323 = arith.constant 0 : index
    %677 = vector.load %arg12[%c1_321, %c0_322, %c0_323] : memref<2x1x32xf32, #tpu.memory_space<vmem>>, vector<1x1x32xf32>
    %678 = vector.shape_cast %677 : vector<1x1x32xf32> to vector<1x32xf32>
    %679 = vector.broadcast %678 : vector<1x32xf32> to vector<16x32xf32>
    %680 = arith.addf %676, %679 : vector<16x32xf32>
    %681 = arith.addf %664, %680 : vector<16x32xf32>
    %c1_324 = arith.constant 1 : index
    %c0_325 = arith.constant 0 : index
    %c0_326 = arith.constant 0 : index
    %682 = vector.load %arg13[%c1_324, %c0_325, %c0_326] : memref<2x1x32xf32, #tpu.memory_space<vmem>>, vector<1x1x32xf32>
    %683 = vector.shape_cast %682 : vector<1x1x32xf32> to vector<1x32xf32>
    %c1_327 = arith.constant 1 : index
    %c0_328 = arith.constant 0 : index
    %c0_329 = arith.constant 0 : index
    %684 = vector.load %arg14[%c1_327, %c0_328, %c0_329] : memref<2x1x32xf32, #tpu.memory_space<vmem>>, vector<1x1x32xf32>
    %685 = vector.shape_cast %684 : vector<1x1x32xf32> to vector<1x32xf32>
    %cst_330 = arith.constant dense<0.000000e+00> : vector<16xf32>
    %686 = vector.multi_reduction <add>, %681, %cst_330 [1] : vector<16x32xf32> to vector<16xf32>
    %687 = vector.shape_cast %686 : vector<16xf32> to vector<16x1xf32>
    %cst_331 = arith.constant 3.200000e+01 : f32
    %688 = vector.broadcast %cst_331 : f32 to vector<16x1xf32>
    %689 = arith.divf %687, %688 : vector<16x1xf32>
    %690 = vector.broadcast %689 : vector<16x1xf32> to vector<16x32xf32>
    %691 = arith.subf %681, %690 : vector<16x32xf32>
    %692 = arith.mulf %691, %691 : vector<16x32xf32>
    %cst_332 = arith.constant dense<0.000000e+00> : vector<16xf32>
    %693 = vector.multi_reduction <add>, %692, %cst_332 [1] : vector<16x32xf32> to vector<16xf32>
    %694 = vector.shape_cast %693 : vector<16xf32> to vector<16x1xf32>
    %cst_333 = arith.constant 3.200000e+01 : f32
    %695 = vector.broadcast %cst_333 : f32 to vector<16x1xf32>
    %696 = arith.divf %694, %695 : vector<16x1xf32>
    %697 = vector.broadcast %689 : vector<16x1xf32> to vector<16x32xf32>
    %698 = arith.subf %681, %697 : vector<16x32xf32>
    %cst_334 = arith.constant 9.99999974E-6 : f32
    %699 = vector.broadcast %cst_334 : f32 to vector<16x1xf32>
    %700 = arith.addf %696, %699 : vector<16x1xf32>
    %701 = math.rsqrt %700 : vector<16x1xf32>
    %702 = vector.broadcast %701 : vector<16x1xf32> to vector<16x32xf32>
    %703 = arith.mulf %698, %702 : vector<16x32xf32>
    %704 = vector.broadcast %683 : vector<1x32xf32> to vector<16x32xf32>
    %705 = arith.mulf %703, %704 : vector<16x32xf32>
    %706 = vector.broadcast %685 : vector<1x32xf32> to vector<16x32xf32>
    %707 = arith.addf %705, %706 : vector<16x32xf32>
    %c0_335 = arith.constant 0 : index
    %c0_336 = arith.constant 0 : index
    %708 = vector.load %arg15[%c0_335, %c0_336] : memref<32x128xf32, #tpu.memory_space<vmem>>, vector<32x128xf32>
    %cst_337 = arith.constant dense<0.000000e+00> : vector<16x128xf32>
    %709 = tpu.matmul %707, %708, %cst_337 {dimension_numbers = #tpu.dot_dimension_numbers<[1], [0], [0], [1], [0, 0, 1, 1], [], []>} : vector<16x32xf32>, vector<32x128xf32>, vector<16x128xf32> -> vector<16x128xf32>
    %c0_338 = arith.constant 0 : index
    %c0_339 = arith.constant 0 : index
    %710 = vector.load %arg16[%c0_338, %c0_339] : memref<1x128xf32, #tpu.memory_space<vmem>>, vector<1x128xf32>
    %711 = vector.broadcast %710 : vector<1x128xf32> to vector<16x128xf32>
    %712 = arith.addf %709, %711 : vector<16x128xf32>
    %c0_340 = arith.constant 0 : index
    %c0_341 = arith.constant 0 : index
    %713 = vector.load %arg17[%c0_340, %c0_341] : memref<16x128xf32, #tpu.memory_space<vmem>>, vector<16x128xf32>
    tpu.vector_store %arg17[%c0_340, %c0_341], %712 {strides = array<i32>} : memref<16x128xf32, #tpu.memory_space<vmem>>, vector<16x128xf32>,
    return
  }
}

</mosaic_0001>

<bundles_post_ra>
// kernel: _forward_impl.1
= control target key start
LH: loop header
LB: loop body
LE: loop exit
PB: predicated region body
PF: predicated region fallthrough
CT: control target
= control target key end

     0   :  { %vm73_vm0 = vcmask 261120   ;;  %s6516_s28 = smov 96   ;;  %vm259_vm2 = vcmask 130048   ;;  %s6517_s19 = smov 64   ;;  %vm1227_vm3 = vcmask 523264   ;;  %s7565_s3 = inlined_call_operand.vmem [shape: f32[2,32,96], index: 3, kind: input, shape index: {}]   ;;  %s7566_s0 = inlined_call_operand.vmem [shape: f32[16,32], index: 0, kind: input, shape index: {}]   ;;  %s7567_s4 = inlined_call_operand.vmem [shape: f32[2,1,96], index: 4, kind: input, shape index: {}]   ;;  %s7568_s2 = inlined_call_operand.vmem [shape: f32[4,1,32], index: 2, kind: input, shape index: {}]   ;;  %s7569_s1 = inlined_call_operand.vmem [shape: f32[16,16], index: 1, kind: input, shape index: {}]   ;;  %s7570_s5 = inlined_call_operand.vmem [shape: f32[2,32,32], index: 5, kind: input, shape index: {}]   ;;  %s7571_s6 = inlined_call_operand.vmem [shape: f32[2,1,32], index: 6, kind: input, shape index: {}]   ;;  %s7572_s9 = inlined_call_operand.vmem [shape: f32[2,32,64], index: 9, kind: input, shape index: {}]   ;;  %s7573_s11 = inlined_call_operand.vmem [shape: f32[2,64,32], index: 11, kind: input, shape index: {}]   ;;  %s7574_s7 = inlined_call_operand.vmem [shape: f32[2,1,32], index: 7, kind: input, shape index: {}]   ;;  %s7575_s8 = inlined_call_operand.vmem [shape: f32[2,1,32], index: 8, kind: input, shape index: {}]   ;;  %s7576_s10 = inlined_call_operand.vmem [shape: f32[2,1,64], index: 10, kind: input, shape index: {}]   ;;  %s7577_s12 = inlined_call_operand.vmem [shape: f32[2,1,32], index: 12, kind: input, shape index: {}]   ;;  %s7578_s13 = inlined_call_operand.vmem [shape: f32[2,1,32], index: 13, kind: input, shape index: {}]   ;;  %s7579_s14 = inlined_call_operand.vmem [shape: f32[2,1,32], index: 14, kind: input, shape index: {}]   ;;  %s7580_s15 = inlined_call_operand.vmem [shape: f32[32,128], index: 15, kind: input, shape index: {}]   ;;  %s7581_s16 = inlined_call_operand.vmem [shape: f32[1,128], index: 16, kind: input, shape index: {}]   ;;  %s7582_s17 = inlined_call_operand.vmem [shape: f32[16,128], index: 17, kind: output, shape index: {}]  }
   0x1   :  { %7585 = sst [smem:[#allocation2_spill]] %s7565_s3  ;;  %v5089_v10 = vld [vmem:[%s7567_s4] ss:$0 sm:$0xff]  ;;  %vm6662_vm1 = vmpackc.low %vm73_vm0, %vm73_vm0  ;;  %v6680_v25 = vld [vmem:[%s7569_s1 + $0x8] sm:$0xff] }
   0x2   :  { %7586 = sst [smem:[#allocation3_spill]] %s7566_s0  ;;  %s7587_s26 = sld [smem:[#allocation2_spill]]  ;;  %v6650_v14 = vld [vmem:[%s7568_s2] ss:$0 sm:$0xff]  ;;  %v6709_v52 = vld [vmem:[%s7568_s2 + $0x1] ss:$0 sm:$0xff] }
   0x3   :  { %s7588_s20 = sld [smem:[#allocation3_spill]]  ;;  %v6685_v28 = vld [vmem:[%s7569_s1] sm:$0xff] }
   0x8   :  { %v62_v0 = vld [vmem:[%s7587_s26] sm:$0xff]  ;;  %v63_v1 = vld [vmem:[%s7587_s26 + $0x8] sm:$0xff]  ;;  %v64_v2 = vld [vmem:[%s7587_s26 + $0x10] sm:$0xff] }
   0x9   :  { %v6617_v3 = vpack.c.bf16 %v63_v1, %v62_v0  ;;  %v65_v4 = vld [vmem:[%s7587_s26 + $0x18] sm:$0xff]  ;;  %v56_v5 = vld [vmem:[%s7588_s20] sm:$0xff]  ;;  %v57_v8 = vld [vmem:[%s7588_s20 + $0x8] sm:$0xff] }
   0xa   :  { %v6625_v6 = vpack.c.bf16 %v65_v4, %v64_v2  ;;  %v6627_v7 = vadd.f32 %v56_v5, %v56_v5  ;;  %v6637_v9 = vadd.f32 %v57_v8, %v57_v8 }
   0xb   :  { %5961 = vmatprep.subr.bf16.mxu0 %v6617_v3 }
   0xc   :  { %5963 = vmatpush3.bf16.msra.mxu0 %v6617_v3  ;;  %5525 = vmatprep.mubr.msk.f32.mxu0 %vm73_vm0, %v6627_v7 }
   0xd   :  { %5965 = vmatprep.subr.bf16.mxu0 %v6625_v6 }
  0x10   :  { %5967 = vmatpush3.bf16.msra.mxu0 %v6625_v6 }
  0x13   :  { %5526 = vmatmul.mubr.msk.f32.vlgmr.msra.gmra.mrb[0].mxu0 %vm73_vm0, %v6637_v9 }
  0xe6   :  { %v5527_v11 = vpop.f32.mrb[0].mxu0 }
  0xe7   :  { %v6645_v12 = vadd.f32 %v5527_v11, %v5089_v10  ;;  %v146_v13 = vpop.f32.mrb[1].mxu0 }
  0xe8   :  { %v6652_v15 = vadd.f32 %v5089_v10, %v146_v13 }
  0xe9   :  { %v163_v23 = vmul.f32 %v6650_v14, %v6645_v12  ;;  %v382_v56 = vmul.f32 %v6709_v52, %v6645_v12 }
  0xea   :  { %v6290_v16 = vpack.i.bf16 %v6645_v12, %v6652_v15  ;;  %v162_v17 = vmul.f32 %v6650_v14, %v6652_v15  ;;  %v381_v55 = vmul.f32 %v6709_v52, %v6652_v15 }
  0xec   :  { %6291 = vrot.lane.b32.xlu0 %v6290_v16, %s6516_s28  ;;  %5532 = vmatprep.mubr.msk.f32.mxu1 %vm73_vm0, %v162_v17 }
 0x15e   :  { %v6292_v18 = vpop.permute.xlu0 %6291 }
 0x15f   :  { %v6294_v19 = vunpack.i.h.bf16 %v6292_v18  ;;  %v6293_v20 = vunpack.i.l.bf16 %v6292_v18 }
 0x161   :  { %v6666_v22 = vpack.c.bf16 %v6294_v19, %v6293_v20 }
 0x163   :  { %5970 = vmatprep.subr.msk.bf16.mxu1 %vm6662_vm1, %v6666_v22 }
 0x164   :  { %5973 = vmatpush3.bf16.xpose.msk.msra.mxu1 %vm6662_vm1, %v6666_v22 }
 0x16b   :  { %5533 = vmatmul.mubr.msk.f32.vlgmr.msra.gmra.mrb[0].mxu1 %vm73_vm0, %v163_v23 }
 0x23e   :  { %v5534_v24 = vpop.f32.mrb[0].mxu1 }
 0x23f   :  { %v256_v26 = vmul.f32 0.35355338, %v5534_v24  ;;  %v246_v27 = vpop.f32.mrb[1].mxu1 }
 0x240   :  { %v255_v29 = vmul.f32 0.35355338, %v246_v27  ;;  %v6737_v27 = vld [vmem:[%s7568_s2 + $0x2] ss:$0 sm:$0xff] }
 0x241   :  { %v258_v30 = vadd.f32 %v256_v26, %v6680_v25 }
 0x242   :  { %v257_v31 = vadd.f32 %v255_v29, %v6685_v28 }
 0x243   :  { %v263_v32 = vsel %vm259_vm2, %v258_v30, -inf }
 0x244   :  { %264 = vmax.xlane.f32.xlu1 %v263_v32  ;;  %v260_v33 = vsel %vm259_vm2, %v257_v31, -inf  ;;  %v584_v32 = vmul.f32 %v6737_v27, %v6645_v12 }
 0x245   :  { %261 = vmax.xlane.f32.xlu0 %v260_v33 }
 0x2d1   :  { %v265_v34 = vpop.xlane.xlu1 %264 }
 0x2d2   :  { %v267_v35 = vsub.f32 %v258_v30, %v265_v34  ;;  %v262_v36 = vpop.xlane.xlu0 %261 }
 0x2d3   :  { %v266_v37 = vsub.f32 %v257_v31, %v262_v36  ;;  %v583_v31 = vmul.f32 %v6737_v27, %v6652_v15 }
 0x2d4   :  { %v270_v38 = vmul.f32 1.442695, %v267_v35 }
 0x2d5   :  { %v268_v39 = vmul.f32 1.442695, %v266_v37 }
 0x2d6   :  { %6330 = vpow2.f32 %v270_v38 }
 0x2d7   :  { %6332 = vpow2.f32 %v268_v39 }
 0x2e0   :  { %v6331_v40 = vpop.eup %6330 }
 0x2e1   :  { %v275_v41 = vsel %vm259_vm2, %v6331_v40, 0.0  ;;  %v6333_v42 = vpop.eup %6332 }
 0x2e2   :  { %276 = vadd.xlane.f32.xlu1 %v275_v41  ;;  %v272_v43 = vsel %vm259_vm2, %v6333_v42, 0.0 }
 0x2e6   :  { %273 = vadd.xlane.f32.xlu1 %v272_v43 }
 0x2f7   :  { %6296 = vrot.lane.b32.xlu1 %v6290_v16, %s6517_s19 }
 0x36f   :  { %v277_v44 = vpop.xlane.xlu1 %276 }
 0x370   :  { %6334 = vrcp.f32 %v277_v44 }
 0x373   :  { %v274_v45 = vpop.xlane.xlu1 %273 }
 0x374   :  { %6336 = vrcp.f32 %v274_v45 }
 0x377   :  { %v6297_v46 = vpop.permute.xlu1 %6296 }
 0x378   :  { %v6299_v47 = vunpack.i.h.bf16 %v6297_v46  ;;  %v6298_v48 = vunpack.i.l.bf16 %v6297_v46 }
 0x37a   :  { %v6694_v49 = vpack.c.bf16 %v6299_v47, %v6298_v48  ;;  %v6335_v50 = vpop.eup %6334 }
 0x37b   :  { %v281_v54 = vmul.f32 %v6335_v50, %v6331_v40 }
 0x37c   :  { %5975 = vmatprep.subr.bf16.mxu1 %v6694_v49  ;;  %5985 = vmatprep.subr.bf16.mxu0 %v6694_v49 }
 0x37d   :  { %5977 = vmatpush3.bf16.msra.mxu1 %v6694_v49  ;;  %5987 = vmatpush3.bf16.msra.mxu0 %v6694_v49 }
 0x37e   :  { %v6337_v51 = vpop.eup %6336  ;;  %5980 = vmatprep.subr.msk.bf16.mxu1 %vm6662_vm1, %v6666_v22  ;;  %5990 = vmatprep.subr.msk.bf16.mxu0 %vm6662_vm1, %v6666_v22 }
 0x37f   :  { %v280_v53 = vmul.f32 %v6337_v51, %v6333_v42 }
 0x381   :  { %5539 = vmatprep.mubr.msk.f32.mxu1 %vm259_vm2, %v280_v53 }
 0x382   :  { %5540 = vmatmul.mubr.msk.f32.vlgmr.msra.gmra.mrb[2].mxu1 %vm259_vm2, %v281_v54 }
 0x383   :  { %5546 = vmatprep.mubr.msk.f32.mxu1 %vm73_vm0, %v381_v55 }
 0x386   :  { %5983 = vmatpush3.bf16.xpose.msk.msra.mxu1 %vm6662_vm1, %v6666_v22 }
 0x387   :  { %5995 = vmatprep.subr.bf16.mxu1 %v6694_v49 }
 0x38d   :  { %5547 = vmatmul.mubr.msk.f32.vlgmr.msra.gmra.mrb[4].mxu1 %vm73_vm0, %v382_v56 }
 0x38e   :  { %5997 = vmatpush3.bf16.msra.mxu1 %v6694_v49 }
 0x38f   :  { %6000 = vmatprep.subr.msk.bf16.mxu1 %vm6662_vm1, %v6666_v22 }
 0x455   :  { %v5541_v57 = vpop.f32.mrb[2].mxu1 }
 0x456   :  { %v360_v58 = vpop.f32.mrb[3].mxu1  ;;  %v370_v34 = vmul.f32 %v5541_v57, %v6650_v14 }
 0x457   :  { %v369_v37 = vmul.f32 %v6650_v14, %v360_v58 }
 0x460   :  { %v5548_v59 = vpop.f32.mrb[4].mxu1 }
 0x461   :  { %v465_v60 = vmul.f32 0.35355338, %v5548_v59  ;;  %v455_v61 = vpop.f32.mrb[5].mxu1 }
 0x462   :  { %v464_v62 = vmul.f32 0.35355338, %v455_v61 }
 0x463   :  { %v467_v63 = vadd.f32 %v465_v60, %v6680_v25 }
 0x464   :  { %v466_v0 = vadd.f32 %v464_v62, %v6685_v28 }
 0x465   :  { %v471_v1 = vsel %vm259_vm2, %v467_v63, -inf }
 0x466   :  { %472 = vmax.xlane.f32.xlu0 %v471_v1  ;;  %v468_v2 = vsel %vm259_vm2, %v466_v0, -inf }
 0x467   :  { %469 = vmax.xlane.f32.xlu1 %v468_v2 }
 0x4f3   :  { %v473_v4 = vpop.xlane.xlu0 %472 }
 0x4f4   :  { %v475_v5 = vsub.f32 %v467_v63, %v473_v4  ;;  %v470_v8 = vpop.xlane.xlu1 %469 }
 0x4f5   :  { %v474_v10 = vsub.f32 %v466_v0, %v470_v8  ;;  %v6765_v0 = vld [vmem:[%s7568_s2 + $0x3] ss:$0 sm:$0xff] }
 0x4f6   :  { %v478_v11 = vmul.f32 1.442695, %v475_v5  ;;  %v785_v4 = vmul.f32 %v6765_v0, %v6652_v15  ;;  %v786_v5 = vmul.f32 %v6765_v0, %v6645_v12 }
 0x4f7   :  { %v476_v13 = vmul.f32 1.442695, %v474_v10 }
 0x4f9   :  { %6338 = vpow2.f32 %v476_v13 }
 0x4fa   :  { %6340 = vpow2.f32 %v478_v11 }
 0x503   :  { %v6339_v16 = vpop.eup %6338 }
 0x504   :  { %v480_v17 = vsel %vm259_vm2, %v6339_v16, 0.0  ;;  %v6341_v18 = vpop.eup %6340 }
 0x505   :  { %481 = vadd.xlane.f32.xlu0 %v480_v17  ;;  %v483_v19 = vsel %vm259_vm2, %v6341_v18, 0.0 }
 0x509   :  { %484 = vadd.xlane.f32.xlu0 %v483_v19 }
 0x592   :  { %v482_v20 = vpop.xlane.xlu0 %481 }
 0x593   :  { %6342 = vrcp.f32 %v482_v20 }
 0x596   :  { %v485_v23 = vpop.xlane.xlu0 %484 }
 0x597   :  { %6344 = vrcp.f32 %v485_v23 }
 0x59d   :  { %v6343_v24 = vpop.eup %6342 }
 0x59e   :  { %v488_v26 = vmul.f32 %v6343_v24, %v6339_v16 }
 0x5a0   :  { %5553 = vmatprep.mubr.msk.f32.mxu0 %vm259_vm2, %v488_v26 }
 0x5a1   :  { %v6345_v29 = vpop.eup %6344 }
 0x5a2   :  { %v489_v30 = vmul.f32 %v6345_v29, %v6341_v18 }
 0x5a4   :  { %5554 = vmatmul.mubr.msk.f32.vlgmr.msra.gmra.mrb[2].mxu0 %vm259_vm2, %v489_v30 }
 0x5a5   :  { %5993 = vmatpush3.bf16.xpose.msk.msra.mxu0 %vm6662_vm1, %v6666_v22  ;;  %5560 = vmatprep.mubr.msk.f32.mxu0 %vm73_vm0, %v583_v31 }
 0x5a6   :  { %6005 = vmatprep.subr.bf16.mxu0 %v6694_v49 }
 0x5ac   :  { %5561 = vmatmul.mubr.msk.f32.vlgmr.msra.gmra.mrb[4].mxu0 %vm73_vm0, %v584_v32 }
 0x5ad   :  { %6007 = vmatpush3.bf16.msra.mxu0 %v6694_v49 }
 0x677   :  { %v5555_v33 = vpop.f32.mrb[2].mxu0 }
 0x678   :  { %v572_v35 = vmul.f32 %v5555_v33, %v6709_v52  ;;  %v562_v36 = vpop.f32.mrb[3].mxu0 }
 0x679   :  { %v571_v38 = vmul.f32 %v6709_v52, %v562_v36 }
 0x67a   :  { %v574_v39 = vadd.f32 %v572_v35, %v370_v34 }
 0x67b   :  { %v573_v40 = vadd.f32 %v571_v38, %v369_v37  ;;  %v979_v38 = vld [vmem:[%s7570_s5] sm:$0xff] }
 0x67f   :  { %v5562_v41 = vpop.f32.mrb[4].mxu0 }
 0x680   :  { %v657_v42 = vpop.f32.mrb[5].mxu0  ;;  %v667_v43 = vmul.f32 0.35355338, %v5562_v41 }
 0x681   :  { %v666_v44 = vmul.f32 0.35355338, %v657_v42 }
 0x682   :  { %v669_v47 = vadd.f32 %v667_v43, %v6680_v25 }
 0x683   :  { %v668_v45 = vadd.f32 %v666_v44, %v6685_v28 }
 0x684   :  { %v673_v48 = vsel %vm259_vm2, %v669_v47, -inf }
 0x685   :  { %v670_v46 = vsel %vm259_vm2, %v668_v45, -inf }
 0x686   :  { %671 = vmax.xlane.f32.xlu0 %v670_v46 }
 0x68a   :  { %674 = vmax.xlane.f32.xlu0 %v673_v48  ;;  %v982_v48 = vld [vmem:[%s7570_s5 + $0x18] sm:$0xff] }
 0x713   :  { %v672_v49 = vpop.xlane.xlu0 %671 }
 0x714   :  { %v676_v50 = vsub.f32 %v668_v45, %v672_v49 }
 0x716   :  { %v678_v51 = vmul.f32 1.442695, %v676_v50 }
 0x717   :  { %v675_v53 = vpop.xlane.xlu0 %674 }
 0x718   :  { %6346 = vpow2.f32 %v678_v51  ;;  %v677_v54 = vsub.f32 %v669_v47, %v675_v53  ;;  %v981_v47 = vld [vmem:[%s7570_s5 + $0x10] sm:$0xff] }
 0x719   :  { %v6803_v49 = vpack.c.bf16 %v982_v48, %v981_v47  ;;  %v5127_v47 = vld [vmem:[%s7575_s8] ss:$0 sm:$0xff] }
 0x71a   :  { %v680_v55 = vmul.f32 1.442695, %v677_v54 }
 0x71c   :  { %6348 = vpow2.f32 %v680_v55 }
 0x722   :  { %v6347_v56 = vpop.eup %6346 }
 0x723   :  { %v682_v57 = vsel %vm259_vm2, %v6347_v56, 0.0 }
 0x724   :  { %683 = vadd.xlane.f32.xlu0 %v682_v57  ;;  %v5123_v57 = vld [vmem:[%s7571_s6] ss:$0 sm:$0xff] }
 0x726   :  { %v6349_v58 = vpop.eup %6348 }
 0x727   :  { %v685_v59 = vsel %vm259_vm2, %v6349_v58, 0.0 }
 0x728   :  { %686 = vadd.xlane.f32.xlu0 %v685_v59 }
 0x7b1   :  { %v684_v60 = vpop.xlane.xlu0 %683 }
 0x7b2   :  { %6350 = vrcp.f32 %v684_v60 }
 0x7b5   :  { %v687_v61 = vpop.xlane.xlu0 %686 }
 0x7b6   :  { %6352 = vrcp.f32 %v687_v61 }
 0x7bc   :  { %v6351_v62 = vpop.eup %6350 }
 0x7bd   :  { %v690_v63 = vmul.f32 %v6351_v62, %v6347_v56 }
 0x7bf   :  { %5567 = vmatprep.mubr.msk.f32.mxu1 %vm259_vm2, %v690_v63 }
 0x7c0   :  { %v6353_v1 = vpop.eup %6352 }
 0x7c1   :  { %v691_v2 = vmul.f32 %v6353_v1, %v6349_v58 }
 0x7c3   :  { %5568 = vmatmul.mubr.msk.f32.vlgmr.msra.gmra.mrb[6].mxu1 %vm259_vm2, %v691_v2 }
 0x7c4   :  { %6003 = vmatpush3.bf16.xpose.msk.msra.mxu1 %vm6662_vm1, %v6666_v22  ;;  %5574 = vmatprep.mubr.msk.f32.mxu1 %vm73_vm0, %v785_v4 }
 0x7cb   :  { %5575 = vmatmul.mubr.msk.f32.vlgmr.msra.gmra.mrb[8].mxu1 %vm73_vm0, %v786_v5 }
 0x896   :  { %v5569_v8 = vpop.f32.mrb[6].mxu1 }
 0x897   :  { %v774_v10 = vmul.f32 %v5569_v8, %v6737_v27  ;;  %v764_v11 = vpop.f32.mrb[7].mxu1 }
 0x898   :  { %v773_v13 = vmul.f32 %v6737_v27, %v764_v11 }
 0x899   :  { %v776_v15 = vadd.f32 %v774_v10, %v574_v39  ;;  %v980_v39 = vld [vmem:[%s7570_s5 + $0x8] sm:$0xff] }
 0x89a   :  { %v775_v16 = vadd.f32 %v773_v13, %v573_v40  ;;  %v6791_v40 = vpack.c.bf16 %v980_v39, %v979_v38 }
 0x89c   :  { %6009 = vmatprep.subr.bf16.mxu0 %v6791_v40 }
 0x89e   :  { %v5576_v17 = vpop.f32.mrb[8].mxu1 }
 0x89f   :  { %v869_v18 = vmul.f32 0.35355338, %v5576_v17  ;;  %v859_v19 = vpop.f32.mrb[9].mxu1 }
 0x8a0   :  { %v868_v20 = vmul.f32 0.35355338, %v859_v19 }
 0x8a1   :  { %v871_v22 = vadd.f32 %v869_v18, %v6680_v25  ;;  %v1119_v18 = vld [vmem:[%s7572_s9 + $0x8] sm:$0xff] }
 0x8a2   :  { %v870_v23 = vadd.f32 %v868_v20, %v6685_v28  ;;  %v1120_v20 = vld [vmem:[%s7572_s9 + $0x10] sm:$0xff] }
 0x8a3   :  { %v875_v12 = vsel %vm259_vm2, %v871_v22, -inf }
 0x8a4   :  { %876 = vmax.xlane.f32.xlu1 %v875_v12  ;;  %v872_v24 = vsel %vm259_vm2, %v870_v23, -inf  ;;  %v1212_v12 = vld [vmem:[%s7573_s11] sm:$0xff] }
 0x8a5   :  { %873 = vmax.xlane.f32.xlu0 %v872_v24  ;;  %v1213_v24 = vld [vmem:[%s7573_s11 + $0x8] sm:$0xff] }
 0x931   :  { %v877_v26 = vpop.xlane.xlu1 %876 }
 0x932   :  { %v879_v29 = vsub.f32 %v871_v22, %v877_v26  ;;  %v874_v30 = vpop.xlane.xlu0 %873  ;;  %v1121_v22 = vld [vmem:[%s7572_s9 + $0x18] sm:$0xff]  ;;  %v1214_v26 = vld [vmem:[%s7573_s11 + $0x10] sm:$0xff] }
 0x933   :  { %v878_v31 = vsub.f32 %v870_v23, %v874_v30  ;;  %v6836_v23 = vpack.c.bf16 %v1121_v22, %v1120_v20  ;;  %v1215_v30 = vld [vmem:[%s7573_s11 + $0x18] sm:$0xff] }
 0x934   :  { %v882_v32 = vmul.f32 1.442695, %v879_v29  ;;  %v6849_v29 = vpack.c.bf16 %v1213_v24, %v1212_v12 }
 0x935   :  { %v880_v33 = vmul.f32 1.442695, %v878_v31  ;;  %v6854_v31 = vpack.c.bf16 %v1215_v30, %v1214_v26  ;;  %v5136_v30 = vld [vmem:[%s7587_s26 + $0x20] sm:$0xff] }
 0x936   :  { %6354 = vpow2.f32 %v882_v32  ;;  %v1216_v32 = vld [vmem:[%s7573_s11 + $0x20] sm:$0xff] }
 0x937   :  { %6356 = vpow2.f32 %v880_v33  ;;  %v1217_v33 = vld [vmem:[%s7573_s11 + $0x28] sm:$0xff] }
 0x940   :  { %v6355_v34 = vpop.eup %6354 }
 0x941   :  { %v6357_v35 = vpop.eup %6356  ;;  %v887_v36 = vsel %vm259_vm2, %v6355_v34, 0.0 }
 0x942   :  { %888 = vadd.xlane.f32.xlu1 %v887_v36  ;;  %v884_v37 = vsel %vm259_vm2, %v6357_v35, 0.0 }
 0x943   :  { %885 = vadd.xlane.f32.xlu0 %v884_v37 }
 0x9cf   :  { %v889_v41 = vpop.xlane.xlu1 %888 }
 0x9d0   :  { %6358 = vrcp.f32 %v889_v41  ;;  %v886_v42 = vpop.xlane.xlu0 %885 }
 0x9d1   :  { %6360 = vrcp.f32 %v886_v42 }
 0x9da   :  { %v6359_v43 = vpop.eup %6358 }
 0x9db   :  { %v6361_v44 = vpop.eup %6360  ;;  %v893_v46 = vmul.f32 %v6359_v43, %v6355_v34  ;;  %v6865_v34 = vpack.c.bf16 %v1217_v33, %v1216_v32  ;;  %v5126_v43 = vld [vmem:[%s7574_s7] ss:$0 sm:$0xff]  ;;  %v5137_v32 = vld [vmem:[%s7587_s26 + $0x28] sm:$0xff] }
 0x9dc   :  { %v892_v45 = vmul.f32 %v6361_v44, %v6357_v35  ;;  %v6906_v33 = vpack.c.bf16 %v5137_v32, %v5136_v30 }
 0x9de   :  { %5581 = vmatprep.mubr.msk.f32.mxu0 %vm259_vm2, %v892_v45 }
 0x9df   :  { %5582 = vmatmul.mubr.msk.f32.vlgmr.msra.gmra.mrb[6].mxu0 %vm259_vm2, %v893_v46 }
 0x9e0   :  { %6011 = vmatpush3.bf16.msra.mxu0 %v6791_v40 }
 0x9e1   :  { %6013 = vmatprep.subr.bf16.mxu0 %v6803_v49 }
 0x9e4   :  { %6015 = vmatpush3.bf16.msra.mxu0 %v6803_v49 }
 0x9e5   :  { %6025 = vmatprep.subr.bf16.mxu0 %v6849_v29 }
 0xab2   :  { %v5583_v50 = vpop.f32.mrb[6].mxu0 }
 0xab3   :  { %v976_v51 = vmul.f32 %v5583_v50, %v6765_v0  ;;  %v966_v53 = vpop.f32.mrb[7].mxu0 }
 0xab4   :  { %v975_v54 = vmul.f32 %v6765_v0, %v966_v53 }
 0xab5   :  { %v978_v55 = vadd.f32 %v976_v51, %v776_v15 }
 0xab6   :  { %v977_v56 = vadd.f32 %v975_v54, %v775_v16  ;;  %v1218_v54 = vld [vmem:[%s7573_s11 + $0x30] sm:$0xff] }
 0xab8   :  { %5592 = vmatprep.mubr.msk.f32.mxu0 %vm73_vm0, %v977_v56 }
 0xab9   :  { %5593 = vmatmul.mubr.msk.f32.vlgmr.msra.gmra.mrb[8].mxu0 %vm73_vm0, %v978_v55  ;;  %v1219_v55 = vld [vmem:[%s7573_s11 + $0x38] sm:$0xff] }
 0xaba   :  { %6027 = vmatpush3.bf16.msra.mxu0 %v6849_v29  ;;  %v6884_v56 = vpack.c.bf16 %v1219_v55, %v1218_v54 }
 0xabb   :  { %6029 = vmatprep.subr.bf16.mxu0 %v6854_v31 }
 0xabe   :  { %6031 = vmatpush3.bf16.msra.mxu0 %v6854_v31 }
 0xabf   :  { %6033 = vmatprep.subr.bf16.mxu0 %v6865_v34 }
 0xac2   :  { %6035 = vmatpush3.bf16.msra.mxu0 %v6865_v34 }
 0xac3   :  { %6037 = vmatprep.subr.bf16.mxu0 %v6884_v56 }
 0xac6   :  { %6039 = vmatpush3.bf16.msra.mxu0 %v6884_v56 }
 0xb8c   :  { %v5594_v58 = vpop.f32.mrb[8].mxu0 }
 0xb8d   :  { %v1068_v59 = vadd.f32 %v5594_v58, %v5123_v57  ;;  %v1062_v60 = vpop.f32.mrb[9].mxu0 }
 0xb8e   :  { %v1063_v61 = vadd.f32 %v5123_v57, %v1062_v60  ;;  %v5128_v57 = vld [vmem:[%s7576_s10] ss:$0 sm:$0xff] }
 0xb8f   :  { %v1072_v62 = vadd.f32 %v1068_v59, %v6637_v9 }
 0xb90   :  { %v1071_v63 = vadd.f32 %v1063_v61, %v6627_v7  ;;  %v1118_v7 = vld [vmem:[%s7572_s9] sm:$0xff] }
 0xb91   :  { %v1078_v1 = vsel %vm73_vm0, %v1072_v62, 0.0  ;;  %v6826_v19 = vpack.c.bf16 %v1119_v18, %v1118_v7 }
 0xb92   :  { %1079 = vadd.xlane.f32.xlu1 %v1078_v1  ;;  %v1075_v2 = vsel %vm73_vm0, %v1071_v63, 0.0  ;;  %v5131_v1 = vld [vmem:[%s7577_s12] ss:$0 sm:$0xff] }
 0xb93   :  { %1076 = vadd.xlane.f32.xlu0 %v1075_v2  ;;  %6017 = vmatprep.subr.bf16.mxu1 %v6826_v19 }
 0xb94   :  { %6019 = vmatpush3.bf16.msra.mxu1 %v6826_v19 }
 0xb95   :  { %6021 = vmatprep.subr.bf16.mxu1 %v6836_v23 }
 0xb98   :  { %6023 = vmatpush3.bf16.msra.mxu1 %v6836_v23 }
 0xb99   :  { %6041 = vmatprep.subr.bf16.mxu1 %v6906_v33 }
 0xc1f   :  { %v1080_v4 = vpop.xlane.xlu1 %1079 }
 0xc20   :  { %v1083_v5 = vmul.f32 0.03125, %v1080_v4  ;;  %v1077_v8 = vpop.xlane.xlu0 %1076 }
 0xc21   :  { %v1082_v10 = vmul.f32 0.03125, %v1077_v8 }
 0xc22   :  { %v1085_v11 = vsub.f32 %v1072_v62, %v1083_v5 }
 0xc23   :  { %v1084_v13 = vsub.f32 %v1071_v63, %v1082_v10 }
 0xc24   :  { %v1087_v15 = vmul.f32 %v1085_v11, %v1085_v11 }
 0xc25   :  { %v1086_v16 = vmul.f32 %v1084_v13, %v1084_v13 }
 0xc26   :  { %v1091_v17 = vsel %vm73_vm0, %v1087_v15, 0.0 }
 0xc27   :  { %1092 = vadd.xlane.f32.xlu1 %v1091_v17  ;;  %v1088_v9 = vsel %vm73_vm0, %v1086_v16, 0.0 }
 0xc28   :  { %1089 = vadd.xlane.f32.xlu0 %v1088_v9 }
 0xcb4   :  { %v1093_v35 = vpop.xlane.xlu1 %1092 }
 0xcb5   :  { %v1095_v36 = vmul.f32 0.03125, %v1093_v35  ;;  %v1090_v37 = vpop.xlane.xlu0 %1089  ;;  %v5138_v35 = vld [vmem:[%s7587_s26 + $0x30] sm:$0xff] }
 0xcb6   :  { %v1094_v38 = vmul.f32 0.03125, %v1090_v37 }
 0xcb7   :  { %v1097_v39 = vadd.f32 1e-05, %v1095_v36  ;;  %v5139_v36 = vld [vmem:[%s7587_s26 + $0x38] sm:$0xff] }
 0xcb8   :  { %v1096_v41 = vadd.f32 1e-05, %v1094_v38  ;;  %v6916_v37 = vpack.c.bf16 %v5139_v36, %v5138_v35 }
 0xcb9   :  { %6362 = vrsqrt.f32 %v1097_v39 }
 0xcba   :  { %6364 = vrsqrt.f32 %v1096_v41 }
 0xcc3   :  { %v6363_v42 = vpop.eup %6362 }
 0xcc4   :  { %v6365_v44 = vpop.eup %6364  ;;  %v1101_v45 = vmul.f32 %v6363_v42, %v1085_v11 }
 0xcc5   :  { %v1100_v46 = vmul.f32 %v6365_v44, %v1084_v13 }
 0xcc6   :  { %v1109_v48 = vmul.f32 %v5126_v43, %v1101_v45 }
 0xcc7   :  { %v1108_v50 = vmul.f32 %v5126_v43, %v1100_v46  ;;  %v5134_v46 = vld [vmem:[%s7578_s13] ss:$0 sm:$0xff] }
 0xcc8   :  { %v1117_v53 = vadd.f32 %v5127_v47, %v1109_v48 }
 0xcc9   :  { %v1116_v51 = vadd.f32 %v5127_v47, %v1108_v50 }
 0xccb   :  { %5603 = vmatprep.mubr.msk.f32.mxu1 %vm73_vm0, %v1116_v51 }
 0xccc   :  { %5604 = vmatmul.mubr.msk.f32.vlgmr.msra.gmra.mrb[10].mxu1 %vm73_vm0, %v1117_v53 }
 0xccd   :  { %6043 = vmatpush3.bf16.msra.mxu1 %v6906_v33 }
 0xcce   :  { %6045 = vmatprep.subr.bf16.mxu1 %v6916_v37 }
 0xcd1   :  { %6047 = vmatpush3.bf16.msra.mxu1 %v6916_v37 }
 0xd9f   :  { %v5605_v58 = vpop.f32.mrb[10].mxu1 }
 0xda0   :  { %v1207_v59 = vadd.f32 %v5605_v58, %v5128_v57  ;;  %v1201_v60 = vpop.f32.mrb[11].mxu1  ;;  %v5141_v58 = vld [vmem:[%s7567_s4 + $0x1] ss:$0 sm:$0xff] }
 0xda1   :  { %v1202_v61 = vadd.f32 %v5128_v57, %v1201_v60 }
 0xda2   :  { %v1211_v63 = vmax.f32 %v1207_v59, 0.0 }
 0xda3   :  { %v1210_v62 = vmax.f32 %v1202_v61, 0.0 }
 0xda5   :  { %5622 = vmatprep.mubr.msk.f32.mxu0 %vm1227_vm3, %v1210_v62 }
 0xda6   :  { %5623 = vmatmul.mubr.msk.f32.vlgmr.msra.gmra.mrb[10].mxu0 %vm1227_vm3, %v1211_v63 }
 0xe79   :  { %v5624_v2 = vpop.f32.mrb[10].mxu0 }
 0xe7a   :  { %v1306_v4 = vadd.f32 %v5624_v2, %v5131_v1  ;;  %v1300_v5 = vpop.f32.mrb[11].mxu0 }
 0xe7b   :  { %v1301_v8 = vadd.f32 %v5131_v1, %v1300_v5 }
 0xe7c   :  { %v1310_v10 = vadd.f32 %v1306_v4, %v1117_v53 }
 0xe7d   :  { %v1309_v11 = vadd.f32 %v1301_v8, %v1116_v51  ;;  %v5135_v51 = vld [vmem:[%s7579_s14] ss:$0 sm:$0xff] }
 0xe7e   :  { %v1316_v13 = vsel %vm73_vm0, %v1310_v10, 0.0 }
 0xe7f   :  { %1317 = vadd.xlane.f32.xlu1 %v1316_v13  ;;  %v1313_v15 = vsel %vm73_vm0, %v1309_v11, 0.0 }
 0xe80   :  { %1314 = vadd.xlane.f32.xlu0 %v1313_v15 }
 0xf0c   :  { %v1318_v16 = vpop.xlane.xlu1 %1317 }
 0xf0d   :  { %v1320_v17 = vmul.f32 0.03125, %v1318_v16  ;;  %v1315_v9 = vpop.xlane.xlu0 %1314 }
 0xf0e   :  { %v1319_v7 = vmul.f32 0.03125, %v1315_v9 }
 0xf0f   :  { %v1322_v18 = vsub.f32 %v1310_v10, %v1320_v17 }
 0xf10   :  { %v1321_v20 = vsub.f32 %v1309_v11, %v1319_v7 }
 0xf11   :  { %v1324_v22 = vmul.f32 %v1322_v18, %v1322_v18 }
 0xf12   :  { %v1323_v12 = vmul.f32 %v1321_v20, %v1321_v20 }
 0xf13   :  { %v1328_v24 = vsel %vm73_vm0, %v1324_v22, 0.0 }
 0xf14   :  { %1329 = vadd.xlane.f32.xlu1 %v1328_v24  ;;  %v1325_v26 = vsel %vm73_vm0, %v1323_v12, 0.0 }
 0xf15   :  { %1326 = vadd.xlane.f32.xlu0 %v1325_v26 }
 0xfa1   :  { %v1330_v38 = vpop.xlane.xlu1 %1329 }
 0xfa2   :  { %v1332_v39 = vmul.f32 0.03125, %v1330_v38  ;;  %v1327_v41 = vpop.xlane.xlu0 %1326 }
 0xfa3   :  { %v1331_v42 = vmul.f32 0.03125, %v1327_v41 }
 0xfa4   :  { %v1334_v43 = vadd.f32 1e-05, %v1332_v39 }
 0xfa5   :  { %v1333_v44 = vadd.f32 1e-05, %v1331_v42 }
 0xfa6   :  { %6366 = vrsqrt.f32 %v1334_v43 }
 0xfa7   :  { %6368 = vrsqrt.f32 %v1333_v44 }
 0xfb0   :  { %v6367_v45 = vpop.eup %6366 }
 0xfb1   :  { %v6369_v47 = vpop.eup %6368  ;;  %v1338_v48 = vmul.f32 %v6367_v45, %v1322_v18 }
 0xfb2   :  { %v1337_v50 = vmul.f32 %v6369_v47, %v1321_v20 }
 0xfb3   :  { %v1346_v53 = vmul.f32 %v5134_v46, %v1338_v48 }
 0xfb4   :  { %v1345_v54 = vmul.f32 %v5134_v46, %v1337_v50 }
 0xfb5   :  { %v6928_v57 = vadd.f32 %v5135_v51, %v1346_v53 }
 0xfb6   :  { %v6926_v55 = vadd.f32 %v5135_v51, %v1345_v54 }
 0xfb8   :  { %5633 = vmatprep.mubr.msk.f32.mxu1 %vm73_vm0, %v6926_v55 }
 0xfb9   :  { %5634 = vmatmul.mubr.msk.f32.vlgmr.msra.gmra.mrb[12].mxu1 %vm73_vm0, %v6928_v57 }
0x108c   :  { %v5635_v59 = vpop.f32.mrb[12].mxu1 }
0x108d   :  { %v6937_v60 = vadd.f32 %v5635_v59, %v5141_v58  ;;  %v1440_v61 = vpop.f32.mrb[13].mxu1 }
0x108e   :  { %v6939_v62 = vadd.f32 %v5141_v58, %v1440_v61 }
0x108f   :  { %v1450_v10 = vmul.f32 %v6650_v14, %v6937_v60  ;;  %v1660_v13 = vmul.f32 %v6709_v52, %v6937_v60 }
0x1090   :  { %v6943_v63 = vpack.i.bf16 %v6937_v60, %v6939_v62  ;;  %v1449_v1 = vmul.f32 %v6650_v14, %v6939_v62  ;;  %v1659_v11 = vmul.f32 %v6709_v52, %v6939_v62 }
0x1092   :  { %6301 = vrot.lane.b32.xlu0 %v6943_v63, %s6516_s28  ;;  %5640 = vmatprep.mubr.msk.f32.mxu1 %vm73_vm0, %v1449_v1 }
0x1104   :  { %v6302_v2 = vpop.permute.xlu0 %6301 }
0x1105   :  { %v6304_v4 = vunpack.i.h.bf16 %v6302_v2  ;;  %v6303_v5 = vunpack.i.l.bf16 %v6302_v2 }
0x1107   :  { %v6950_v8 = vpack.c.bf16 %v6304_v4, %v6303_v5 }
0x1109   :  { %6050 = vmatprep.subr.msk.bf16.mxu1 %vm6662_vm1, %v6950_v8 }
0x110a   :  { %6053 = vmatpush3.bf16.xpose.msk.msra.mxu1 %vm6662_vm1, %v6950_v8 }
0x110b   :  { %6060 = vmatprep.subr.msk.bf16.mxu1 %vm6662_vm1, %v6950_v8 }
0x1111   :  { %5641 = vmatmul.mubr.msk.f32.vlgmr.msra.gmra.mrb[14].mxu1 %vm73_vm0, %v1450_v10 }
0x1112   :  { %6063 = vmatpush3.bf16.xpose.msk.msra.mxu1 %vm6662_vm1, %v6950_v8  ;;  %5654 = vmatprep.mubr.msk.f32.mxu1 %vm73_vm0, %v1659_v11 }
0x1119   :  { %5655 = vmatmul.mubr.msk.f32.vlgmr.msra.gmra.mrb[16].mxu1 %vm73_vm0, %v1660_v13 }
0x11e4   :  { %v5642_v15 = vpop.f32.mrb[14].mxu1 }
0x11e5   :  { %v1533_v16 = vpop.f32.mrb[15].mxu1  ;;  %v1543_v17 = vmul.f32 0.35355338, %v5642_v15 }
0x11e6   :  { %v1542_v9 = vmul.f32 0.35355338, %v1533_v16 }
0x11e7   :  { %v1545_v20 = vadd.f32 %v1543_v17, %v6680_v25 }
0x11e8   :  { %v1544_v7 = vadd.f32 %v1542_v9, %v6685_v28 }
0x11e9   :  { %v1549_v30 = vsel %vm259_vm2, %v1545_v20, -inf }
0x11ea   :  { %v1546_v18 = vsel %vm259_vm2, %v1544_v7, -inf }
0x11eb   :  { %1547 = vmax.xlane.f32.xlu1 %v1546_v18 }
0x11ec   :  { %v5656_v22 = vpop.f32.mrb[16].mxu1 }
0x11ed   :  { %v1733_v12 = vpop.f32.mrb[17].mxu1  ;;  %v1743_v24 = vmul.f32 0.35355338, %v5656_v22 }
0x11ee   :  { %v1742_v26 = vmul.f32 0.35355338, %v1733_v12 }
0x11ef   :  { %1550 = vmax.xlane.f32.xlu1 %v1549_v30  ;;  %v1745_v36 = vadd.f32 %v1743_v24, %v6680_v25 }
0x11f0   :  { %v1744_v32 = vadd.f32 %v1742_v26, %v6685_v28 }
0x11f1   :  { %v1749_v38 = vsel %vm259_vm2, %v1745_v36, -inf }
0x11f2   :  { %v1746_v35 = vsel %vm259_vm2, %v1744_v32, -inf }
0x11f3   :  { %1747 = vmax.xlane.f32.xlu1 %v1746_v35  ;;  %v1854_v35 = vmul.f32 %v6737_v27, %v6937_v60 }
0x11f7   :  { %1750 = vmax.xlane.f32.xlu1 %v1749_v38 }
0x1278   :  { %v1548_v39 = vpop.xlane.xlu1 %1547 }
0x1279   :  { %v1552_v41 = vsub.f32 %v1544_v7, %v1548_v39 }
0x127b   :  { %v1554_v42 = vmul.f32 1.442695, %v1552_v41 }
0x127c   :  { %v1551_v43 = vpop.xlane.xlu1 %1550 }
0x127d   :  { %6370 = vpow2.f32 %v1554_v42  ;;  %v1553_v44 = vsub.f32 %v1545_v20, %v1551_v43 }
0x127f   :  { %v1556_v45 = vmul.f32 1.442695, %v1553_v44 }
0x1280   :  { %v1748_v46 = vpop.xlane.xlu1 %1747 }
0x1281   :  { %6372 = vpow2.f32 %v1556_v45  ;;  %v1752_v47 = vsub.f32 %v1744_v32, %v1748_v46  ;;  %v1853_v32 = vmul.f32 %v6737_v27, %v6939_v62 }
0x1283   :  { %v1754_v53 = vmul.f32 1.442695, %v1752_v47 }
0x1284   :  { %v1751_v48 = vpop.xlane.xlu1 %1750 }
0x1285   :  { %v1753_v50 = vsub.f32 %v1745_v36, %v1751_v48 }
0x1287   :  { %v6371_v51 = vpop.eup %6370  ;;  %v1756_v54 = vmul.f32 1.442695, %v1753_v50 }
0x1288   :  { %v1558_v58 = vsel %vm259_vm2, %v6371_v51, 0.0 }
0x1289   :  { %6374 = vpow2.f32 %v1756_v54  ;;  %1559 = vadd.xlane.f32.xlu1 %v1558_v58 }
0x128a   :  { %6376 = vpow2.f32 %v1754_v53 }
0x128b   :  { %v6373_v59 = vpop.eup %6372 }
0x128c   :  { %v1561_v61 = vsel %vm259_vm2, %v6373_v59, 0.0 }
0x128d   :  { %1562 = vadd.xlane.f32.xlu0 %v1561_v61 }
0x1293   :  { %v6375_v1 = vpop.eup %6374 }
0x1294   :  { %v1761_v2 = vsel %vm259_vm2, %v6375_v1, 0.0  ;;  %v6377_v4 = vpop.eup %6376 }
0x1295   :  { %1762 = vadd.xlane.f32.xlu1 %v1761_v2  ;;  %v1758_v5 = vsel %vm259_vm2, %v6377_v4, 0.0 }
0x1299   :  { %1759 = vadd.xlane.f32.xlu1 %v1758_v5 }
0x12aa   :  { %6306 = vrot.lane.b32.xlu1 %v6943_v63, %s6517_s19 }
0x1316   :  { %v1560_v10 = vpop.xlane.xlu1 %1559 }
0x1317   :  { %6378 = vrcp.f32 %v1560_v10 }
0x131a   :  { %v1563_v13 = vpop.xlane.xlu0 %1562 }
0x131b   :  { %6380 = vrcp.f32 %v1563_v13 }
0x1321   :  { %v6379_v11 = vpop.eup %6378 }
0x1322   :  { %v1763_v15 = vpop.xlane.xlu1 %1762  ;;  %v1566_v16 = vmul.f32 %v6379_v11, %v6371_v51 }
0x1324   :  { %5647 = vmatprep.mubr.msk.f32.mxu0 %vm259_vm2, %v1566_v16 }
0x1325   :  { %v6381_v22 = vpop.eup %6380 }
0x1326   :  { %v1760_v17 = vpop.xlane.xlu1 %1759  ;;  %v1567_v12 = vmul.f32 %v6381_v22, %v6373_v59 }
0x1327   :  { %6382 = vrcp.f32 %v1760_v17 }
0x1328   :  { %6384 = vrcp.f32 %v1763_v15 }
0x132a   :  { %v6307_v9 = vpop.permute.xlu1 %6306 }
0x132b   :  { %v6309_v7 = vunpack.i.h.bf16 %v6307_v9  ;;  %v6308_v18 = vunpack.i.l.bf16 %v6307_v9 }
0x132d   :  { %v6054_v20 = vpack.c.bf16 %v6309_v7, %v6308_v18  ;;  %v2047_v18 = vmul.f32 %v6765_v0, %v6939_v62 }
0x132f   :  { %6055 = vmatprep.subr.bf16.mxu0 %v6054_v20  ;;  %6075 = vmatprep.subr.bf16.mxu1 %v6054_v20 }
0x1330   :  { %6057 = vmatpush3.bf16.msra.mxu0 %v6054_v20  ;;  %6077 = vmatpush3.bf16.msra.mxu1 %v6054_v20 }
0x1331   :  { %v6383_v63 = vpop.eup %6382  ;;  %6065 = vmatprep.subr.bf16.mxu0 %v6054_v20  ;;  %6080 = vmatprep.subr.msk.bf16.mxu1 %vm6662_vm1, %v6950_v8 }
0x1332   :  { %v6385_v24 = vpop.eup %6384  ;;  %v1766_v26 = vmul.f32 %v6383_v63, %v6377_v4 }
0x1333   :  { %5648 = vmatmul.mubr.msk.f32.vlgmr.msra.gmra.mrb[12].mxu0 %vm259_vm2, %v1567_v12  ;;  %v1767_v30 = vmul.f32 %v6385_v24, %v6375_v1 }
0x1334   :  { %6067 = vmatpush3.bf16.msra.mxu0 %v6054_v20  ;;  %5661 = vmatprep.mubr.msk.f32.mxu0 %vm259_vm2, %v1766_v26 }
0x1335   :  { %6070 = vmatprep.subr.msk.bf16.mxu0 %vm6662_vm1, %v6950_v8 }
0x1337   :  { %5662 = vmatmul.mubr.msk.f32.vlgmr.msra.gmra.mrb[14].mxu0 %vm259_vm2, %v1767_v30 }
0x1338   :  { %5668 = vmatprep.mubr.msk.f32.mxu0 %vm73_vm0, %v1853_v32 }
0x133d   :  { %6073 = vmatpush3.bf16.xpose.msk.msra.mxu0 %vm6662_vm1, %v6950_v8 }
0x133e   :  { %6085 = vmatprep.subr.bf16.mxu0 %v6054_v20 }
0x1344   :  { %5669 = vmatmul.mubr.msk.f32.vlgmr.msra.gmra.mrb[16].mxu0 %vm73_vm0, %v1854_v35 }
0x1345   :  { %6087 = vmatpush3.bf16.msra.mxu0 %v6054_v20  ;;  %v2048_v20 = vmul.f32 %v6765_v0, %v6937_v60 }
0x1406   :  { %v5649_v36 = vpop.f32.mrb[12].mxu0 }
0x1407   :  { %v1646_v38 = vpop.f32.mrb[13].mxu0  ;;  %v1656_v41 = vmul.f32 %v5649_v36, %v6650_v14 }
0x1408   :  { %v1655_v44 = vmul.f32 %v6650_v14, %v1646_v38 }
0x140a   :  { %v5663_v39 = vpop.f32.mrb[14].mxu0 }
0x140b   :  { %v1850_v42 = vmul.f32 %v5663_v39, %v6709_v52  ;;  %v1840_v43 = vpop.f32.mrb[15].mxu0  ;;  %v7039_v39 = vld [vmem:[%s7569_s1 + $0x8] sm:$0xff] }
0x140c   :  { %v1849_v45 = vmul.f32 %v6709_v52, %v1840_v43 }
0x140d   :  { %v1852_v46 = vadd.f32 %v1850_v42, %v1656_v41 }
0x140e   :  { %v1851_v47 = vadd.f32 %v1849_v45, %v1655_v44 }
0x1417   :  { %v5670_v48 = vpop.f32.mrb[16].mxu0 }
0x1418   :  { %v1937_v50 = vmul.f32 0.35355338, %v5670_v48  ;;  %v1927_v51 = vpop.f32.mrb[17].mxu0 }
0x1419   :  { %v1936_v53 = vmul.f32 0.35355338, %v1927_v51 }
0x141a   :  { %v1939_v54 = vadd.f32 %v1937_v50, %v6680_v25 }
0x141b   :  { %v1938_v58 = vadd.f32 %v1936_v53, %v6685_v28 }
0x141c   :  { %v1943_v59 = vsel %vm259_vm2, %v1939_v54, -inf }
0x141d   :  { %1944 = vmax.xlane.f32.xlu0 %v1943_v59  ;;  %v1940_v61 = vsel %vm259_vm2, %v1938_v58, -inf }
0x141e   :  { %1941 = vmax.xlane.f32.xlu1 %v1940_v61 }
0x14aa   :  { %v1945_v1 = vpop.xlane.xlu0 %1944 }
0x14ab   :  { %v1947_v14 = vsub.f32 %v1939_v54, %v1945_v1  ;;  %v1942_v2 = vpop.xlane.xlu1 %1941  ;;  %v5168_v54 = vld [vmem:[%s7570_s5 + $0x20] sm:$0xff] }
0x14ac   :  { %v1946_v52 = vsub.f32 %v1938_v58, %v1942_v2  ;;  %v5169_v58 = vld [vmem:[%s7570_s5 + $0x28] sm:$0xff] }
0x14ad   :  { %v1950_v4 = vmul.f32 1.442695, %v1947_v14  ;;  %v7051_v59 = vpack.c.bf16 %v5169_v58, %v5168_v54  ;;  %v5192_v54 = vld [vmem:[%s7573_s11 + $0x60] sm:$0xff]  ;;  %v5193_v58 = vld [vmem:[%s7573_s11 + $0x68] sm:$0xff] }
0x14ae   :  { %v1948_v5 = vmul.f32 1.442695, %v1946_v52 }
0x14af   :  { %6089 = vmatprep.subr.bf16.mxu0 %v7051_v59 }
0x14b0   :  { %6386 = vpow2.f32 %v1948_v5  ;;  %v5170_v5 = vld [vmem:[%s7570_s5 + $0x30] sm:$0xff] }
0x14b1   :  { %6388 = vpow2.f32 %v1950_v4 }
0x14ba   :  { %v6387_v10 = vpop.eup %6386 }
0x14bb   :  { %v1952_v11 = vsel %vm259_vm2, %v6387_v10, 0.0  ;;  %v6389_v25 = vpop.eup %6388 }
0x14bc   :  { %1953 = vadd.xlane.f32.xlu0 %v1952_v11  ;;  %v1955_v28 = vsel %vm259_vm2, %v6389_v25, 0.0 }
0x14c0   :  { %1956 = vadd.xlane.f32.xlu0 %v1955_v28 }
0x1549   :  { %v1954_v13 = vpop.xlane.xlu0 %1953 }
0x154a   :  { %6390 = vrcp.f32 %v1954_v13 }
0x154d   :  { %v1957_v15 = vpop.xlane.xlu0 %1956 }
0x154e   :  { %6392 = vrcp.f32 %v1957_v15 }
0x1554   :  { %v6391_v16 = vpop.eup %6390 }
0x1555   :  { %v1960_v17 = vmul.f32 %v6391_v16, %v6387_v10  ;;  %v5171_v10 = vld [vmem:[%s7570_s5 + $0x38] sm:$0xff] }
0x1556   :  { %v7063_v11 = vpack.c.bf16 %v5171_v10, %v5170_v5 }
0x1557   :  { %5675 = vmatprep.mubr.msk.f32.mxu1 %vm259_vm2, %v1960_v17 }
0x1558   :  { %v6393_v9 = vpop.eup %6392 }
0x1559   :  { %v1961_v7 = vmul.f32 %v6393_v9, %v6389_v25  ;;  %v5173_v9 = vld [vmem:[%s7571_s6 + $0x1] ss:$0 sm:$0xff] }
0x155b   :  { %5676 = vmatmul.mubr.msk.f32.vlgmr.msra.gmra.mrb[18].mxu1 %vm259_vm2, %v1961_v7 }
0x155c   :  { %6083 = vmatpush3.bf16.xpose.msk.msra.mxu1 %vm6662_vm1, %v6950_v8  ;;  %5682 = vmatprep.mubr.msk.f32.mxu1 %vm73_vm0, %v2047_v18  ;;  %v7032_v8 = vld [vmem:[%s7569_s1] sm:$0xff] }
0x1563   :  { %5683 = vmatmul.mubr.msk.f32.vlgmr.msra.gmra.mrb[20].mxu1 %vm73_vm0, %v2048_v20 }
0x162e   :  { %v5677_v22 = vpop.f32.mrb[18].mxu1 }
0x162f   :  { %v2044_v63 = vmul.f32 %v5677_v22, %v6737_v27  ;;  %v2034_v12 = vpop.f32.mrb[19].mxu1 }
0x1630   :  { %v2043_v24 = vmul.f32 %v6737_v27, %v2034_v12 }
0x1631   :  { %v2046_v62 = vadd.f32 %v2044_v63, %v1852_v46 }
0x1632   :  { %v2045_v26 = vadd.f32 %v2043_v24, %v1851_v47 }
0x1636   :  { %v5684_v30 = vpop.f32.mrb[20].mxu1 }
0x1637   :  { %v2121_v32 = vpop.f32.mrb[21].mxu1  ;;  %v2131_v35 = vmul.f32 0.35355338, %v5684_v30 }
0x1638   :  { %v2130_v36 = vmul.f32 0.35355338, %v2121_v32 }
0x1639   :  { %v2133_v27 = vadd.f32 %v7039_v39, %v2131_v35 }
0x163a   :  { %v2132_v60 = vadd.f32 %v7032_v8, %v2130_v36 }
0x163b   :  { %v2137_v41 = vsel %vm259_vm2, %v2133_v27, -inf }
0x163c   :  { %v2134_v38 = vsel %vm259_vm2, %v2132_v60, -inf }
0x163d   :  { %2135 = vmax.xlane.f32.xlu0 %v2134_v38 }
0x1641   :  { %2138 = vmax.xlane.f32.xlu0 %v2137_v41  ;;  %v5181_v41 = vld [vmem:[%s7572_s9 + $0x28] sm:$0xff] }
0x16ca   :  { %v2136_v42 = vpop.xlane.xlu0 %2135 }
0x16cb   :  { %v2140_v43 = vsub.f32 %v2132_v60, %v2136_v42 }
0x16cd   :  { %v2142_v44 = vmul.f32 1.442695, %v2140_v43  ;;  %v5182_v43 = vld [vmem:[%s7572_s9 + $0x30] sm:$0xff] }
0x16ce   :  { %v2139_v45 = vpop.xlane.xlu0 %2138 }
0x16cf   :  { %6394 = vpow2.f32 %v2142_v44  ;;  %v2141_v46 = vsub.f32 %v2133_v27, %v2139_v45  ;;  %v5183_v44 = vld [vmem:[%s7572_s9 + $0x38] sm:$0xff] }
0x16d0   :  { %v7096_v45 = vpack.c.bf16 %v5183_v44, %v5182_v43 }
0x16d1   :  { %v2144_v47 = vmul.f32 1.442695, %v2141_v46  ;;  %v5188_v46 = vld [vmem:[%s7573_s11 + $0x40] sm:$0xff] }
0x16d3   :  { %6396 = vpow2.f32 %v2144_v47  ;;  %v5189_v47 = vld [vmem:[%s7573_s11 + $0x48] sm:$0xff] }
0x16d9   :  { %v6395_v48 = vpop.eup %6394 }
0x16da   :  { %v2146_v50 = vsel %vm259_vm2, %v6395_v48, 0.0 }
0x16db   :  { %2147 = vadd.xlane.f32.xlu0 %v2146_v50  ;;  %v7110_v50 = vpack.c.bf16 %v5189_v47, %v5188_v46 }
0x16dd   :  { %v6397_v51 = vpop.eup %6396 }
0x16de   :  { %v2149_v53 = vsel %vm259_vm2, %v6397_v51, 0.0 }
0x16df   :  { %2150 = vadd.xlane.f32.xlu0 %v2149_v53 }
0x1768   :  { %v2148_v61 = vpop.xlane.xlu0 %2147 }
0x1769   :  { %6398 = vrcp.f32 %v2148_v61  ;;  %v7126_v61 = vpack.c.bf16 %v5193_v58, %v5192_v54 }
0x176c   :  { %v2151_v1 = vpop.xlane.xlu0 %2150 }
0x176d   :  { %6400 = vrcp.f32 %v2151_v1 }
0x1773   :  { %v6399_v14 = vpop.eup %6398 }
0x1774   :  { %v2154_v2 = vmul.f32 %v6399_v14, %v6395_v48  ;;  %v5190_v48 = vld [vmem:[%s7573_s11 + $0x50] sm:$0xff] }
0x1776   :  { %5689 = vmatprep.mubr.msk.f32.mxu0 %vm259_vm2, %v2154_v2 }
0x1777   :  { %v6401_v52 = vpop.eup %6400 }
0x1778   :  { %v2155_v4 = vmul.f32 %v6401_v52, %v6397_v51  ;;  %v5191_v51 = vld [vmem:[%s7573_s11 + $0x58] sm:$0xff] }
0x1779   :  { %v7115_v53 = vpack.c.bf16 %v5191_v51, %v5190_v48 }
0x177a   :  { %5690 = vmatmul.mubr.msk.f32.vlgmr.msra.gmra.mrb[18].mxu0 %vm259_vm2, %v2155_v4 }
0x177b   :  { %6091 = vmatpush3.bf16.msra.mxu0 %v7051_v59 }
0x177c   :  { %6093 = vmatprep.subr.bf16.mxu0 %v7063_v11 }
0x177f   :  { %6095 = vmatpush3.bf16.msra.mxu0 %v7063_v11 }
0x1780   :  { %6105 = vmatprep.subr.bf16.mxu0 %v7110_v50 }
0x184d   :  { %v5691_v25 = vpop.f32.mrb[18].mxu0 }
0x184e   :  { %v2238_v28 = vmul.f32 %v5691_v25, %v6765_v0  ;;  %v2228_v13 = vpop.f32.mrb[19].mxu0  ;;  %v5178_v25 = vld [vmem:[%s7574_s7 + $0x1] ss:$0 sm:$0xff] }
0x184f   :  { %v2237_v15 = vmul.f32 %v6765_v0, %v2228_v13 }
0x1850   :  { %v2240_v16 = vadd.f32 %v2238_v28, %v2046_v62 }
0x1851   :  { %v2239_v17 = vadd.f32 %v2237_v15, %v2045_v26 }
0x1853   :  { %5700 = vmatprep.mubr.msk.f32.mxu0 %vm73_vm0, %v2239_v17 }
0x1854   :  { %5701 = vmatmul.mubr.msk.f32.vlgmr.msra.gmra.mrb[20].mxu0 %vm73_vm0, %v2240_v16  ;;  %v5179_v16 = vld [vmem:[%s7575_s8 + $0x1] ss:$0 sm:$0xff] }
0x1855   :  { %6107 = vmatpush3.bf16.msra.mxu0 %v7110_v50 }
0x1856   :  { %6109 = vmatprep.subr.bf16.mxu0 %v7115_v53 }
0x1859   :  { %6111 = vmatpush3.bf16.msra.mxu0 %v7115_v53 }
0x185a   :  { %6113 = vmatprep.subr.bf16.mxu0 %v7126_v61 }
0x185d   :  { %6115 = vmatpush3.bf16.msra.mxu0 %v7126_v61 }
0x1927   :  { %v5702_v7 = vpop.f32.mrb[20].mxu0 }
0x1928   :  { %v2332_v18 = vadd.f32 %v5702_v7, %v5173_v9  ;;  %v2326_v20 = vpop.f32.mrb[21].mxu0 }
0x1929   :  { %v2327_v22 = vadd.f32 %v5173_v9, %v2326_v20  ;;  %v5194_v20 = vld [vmem:[%s7573_s11 + $0x70] sm:$0xff] }
0x192a   :  { %v2336_v63 = vadd.f32 %v2332_v18, %v6928_v57 }
0x192b   :  { %v2335_v12 = vadd.f32 %v2327_v22, %v6926_v55  ;;  %v5180_v55 = vld [vmem:[%s7572_s9 + $0x20] sm:$0xff]  ;;  %v5195_v22 = vld [vmem:[%s7573_s11 + $0x78] sm:$0xff] }
0x192c   :  { %v2344_v0 = vsel %vm73_vm0, %v2336_v63, 0.0  ;;  %v7086_v42 = vpack.c.bf16 %v5181_v41, %v5180_v55 }
0x192d   :  { %2345 = vadd.xlane.f32.xlu1 %v2344_v0  ;;  %v2341_v24 = vsel %vm73_vm0, %v2335_v12, 0.0 }
0x192e   :  { %2342 = vadd.xlane.f32.xlu0 %v2341_v24  ;;  %6097 = vmatprep.subr.bf16.mxu1 %v7086_v42 }
0x192f   :  { %6099 = vmatpush3.bf16.msra.mxu1 %v7086_v42 }
0x1930   :  { %6101 = vmatprep.subr.bf16.mxu1 %v7096_v45 }
0x1933   :  { %6103 = vmatpush3.bf16.msra.mxu1 %v7096_v45 }
0x1934   :  { %6121 = vmatprep.subr.bf16.mxu1 %v6617_v3 }
0x19ba   :  { %v2346_v62 = vpop.xlane.xlu1 %2345 }
0x19bb   :  { %v2348_v26 = vmul.f32 0.03125, %v2346_v62  ;;  %v2343_v30 = vpop.xlane.xlu0 %2342 }
0x19bc   :  { %v2347_v32 = vmul.f32 0.03125, %v2343_v30  ;;  %v5197_v30 = vld [vmem:[%s7577_s12 + $0x1] ss:$0 sm:$0xff] }
0x19bd   :  { %v2350_v35 = vsub.f32 %v2336_v63, %v2348_v26  ;;  %v7148_v63 = vpack.c.bf16 %v5195_v22, %v5194_v20  ;;  %v6492_v22 = vld [vmem:[%s7588_s20] sm:$0xff] }
0x19be   :  { %v2349_v36 = vsub.f32 %v2335_v12, %v2347_v32 }
0x19bf   :  { %v2352_v60 = vmul.f32 %v2350_v35, %v2350_v35  ;;  %6117 = vmatprep.subr.bf16.mxu0 %v7148_v63 }
0x19c0   :  { %v2351_v38 = vmul.f32 %v2349_v36, %v2349_v36  ;;  %6119 = vmatpush3.bf16.msra.mxu0 %v7148_v63 }
0x19c1   :  { %v2356_v27 = vsel %vm73_vm0, %v2352_v60, 0.0 }
0x19c2   :  { %2357 = vadd.xlane.f32.xlu1 %v2356_v27  ;;  %v2353_v57 = vsel %vm73_vm0, %v2351_v38, 0.0 }
0x19c3   :  { %2354 = vadd.xlane.f32.xlu0 %v2353_v57 }
0x1a4f   :  { %v2358_v1 = vpop.xlane.xlu1 %2357 }
0x1a50   :  { %v2360_v14 = vmul.f32 0.03125, %v2358_v1  ;;  %v2355_v2 = vpop.xlane.xlu0 %2354 }
0x1a51   :  { %v2359_v52 = vmul.f32 0.03125, %v2355_v2 }
0x1a52   :  { %v2362_v4 = vadd.f32 1e-05, %v2360_v14 }
0x1a53   :  { %v2361_v5 = vadd.f32 1e-05, %v2359_v52 }
0x1a54   :  { %6402 = vrsqrt.f32 %v2362_v4 }
0x1a55   :  { %6404 = vrsqrt.f32 %v2361_v5 }
0x1a5e   :  { %v6403_v10 = vpop.eup %6402 }
0x1a5f   :  { %v6405_v28 = vpop.eup %6404  ;;  %v2366_v13 = vmul.f32 %v6403_v10, %v2350_v35 }
0x1a60   :  { %v2365_v15 = vmul.f32 %v6405_v28, %v2349_v36  ;;  %v5202_v28 = vld [vmem:[%s7578_s13 + $0x1] ss:$0 sm:$0xff] }
0x1a61   :  { %v2374_v17 = vmul.f32 %v5178_v25, %v2366_v13 }
0x1a62   :  { %v2373_v9 = vmul.f32 %v5178_v25, %v2365_v15 }
0x1a63   :  { %v2382_v18 = vadd.f32 %v5179_v16, %v2374_v17  ;;  %v5203_v17 = vld [vmem:[%s7579_s14 + $0x1] ss:$0 sm:$0xff] }
0x1a64   :  { %v2381_v7 = vadd.f32 %v5179_v16, %v2373_v9 }
0x1a66   :  { %5711 = vmatprep.mubr.msk.f32.mxu1 %vm73_vm0, %v2381_v7 }
0x1a67   :  { %5712 = vmatmul.mubr.msk.f32.vlgmr.msra.gmra.mrb[22].mxu1 %vm73_vm0, %v2382_v18 }
0x1a68   :  { %6123 = vmatpush3.bf16.msra.mxu1 %v6617_v3  ;;  %v5185_v3 = vld [vmem:[%s7576_s10 + $0x1] ss:$0 sm:$0xff] }
0x1a69   :  { %6125 = vmatprep.subr.bf16.mxu1 %v6625_v6 }
0x1a6c   :  { %6127 = vmatpush3.bf16.msra.mxu1 %v6625_v6 }
0x1b3a   :  { %v5713_v12 = vpop.f32.mrb[22].mxu1 }
0x1b3b   :  { %v2474_v6 = vadd.f32 %v5713_v12, %v5185_v3  ;;  %v2468_v0 = vpop.f32.mrb[23].mxu1  ;;  %v6493_v12 = vld [vmem:[%s7588_s20 + $0x8] sm:$0xff] }
0x1b3c   :  { %v2469_v24 = vadd.f32 %v5185_v3, %v2468_v0 }
0x1b3d   :  { %v2478_v26 = vmax.f32 %v2474_v6, 0.0 }
0x1b3e   :  { %v2477_v62 = vmax.f32 %v2469_v24, 0.0  ;;  %v6494_v24 = vld [vmem:[%s7567_s4] ss:$0 sm:$0xff] }
0x1b40   :  { %5730 = vmatprep.mubr.msk.f32.mxu0 %vm1227_vm3, %v2477_v62 }
0x1b41   :  { %5731 = vmatmul.mubr.msk.f32.vlgmr.msra.gmra.mrb[22].mxu0 %vm1227_vm3, %v2478_v26 }
0x1c14   :  { %v5732_v32 = vpop.f32.mrb[22].mxu0 }
0x1c15   :  { %v2574_v35 = vadd.f32 %v5732_v32, %v5197_v30  ;;  %v2568_v36 = vpop.f32.mrb[23].mxu0 }
0x1c16   :  { %v2569_v60 = vadd.f32 %v5197_v30, %v2568_v36 }
0x1c17   :  { %v2578_v38 = vadd.f32 %v2574_v35, %v2382_v18  ;;  %v7198_v35 = vld [vmem:[%s7568_s2] ss:$0 sm:$0xff] }
0x1c18   :  { %v2577_v27 = vadd.f32 %v2569_v60, %v2381_v7 }
0x1c19   :  { %v2586_v57 = vsel %vm73_vm0, %v2578_v38, 0.0 }
0x1c1a   :  { %2587 = vadd.xlane.f32.xlu1 %v2586_v57  ;;  %v2583_v55 = vsel %vm73_vm0, %v2577_v27, 0.0 }
0x1c1b   :  { %2584 = vadd.xlane.f32.xlu0 %v2583_v55 }
0x1ca7   :  { %v2588_v41 = vpop.xlane.xlu1 %2587 }
0x1ca8   :  { %v2590_v43 = vmul.f32 0.03125, %v2588_v41  ;;  %v2585_v44 = vpop.xlane.xlu0 %2584  ;;  %v7221_v41 = vld [vmem:[%s7568_s2 + $0x1] ss:$0 sm:$0xff] }
0x1ca9   :  { %v2589_v46 = vmul.f32 0.03125, %v2585_v44 }
0x1caa   :  { %v2592_v47 = vsub.f32 %v2578_v38, %v2590_v43 }
0x1cab   :  { %v2591_v48 = vsub.f32 %v2577_v27, %v2589_v46 }
0x1cac   :  { %v2594_v51 = vmul.f32 %v2592_v47, %v2592_v47 }
0x1cad   :  { %v2593_v54 = vmul.f32 %v2591_v48, %v2591_v48 }
0x1cae   :  { %v2598_v58 = vsel %vm73_vm0, %v2594_v51, 0.0 }
0x1caf   :  { %2599 = vadd.xlane.f32.xlu1 %v2598_v58  ;;  %v2595_v1 = vsel %vm73_vm0, %v2593_v54, 0.0 }
0x1cb0   :  { %2596 = vadd.xlane.f32.xlu0 %v2595_v1 }
0x1d3c   :  { %v2600_v14 = vpop.xlane.xlu1 %2599 }
0x1d3d   :  { %v2602_v2 = vmul.f32 0.03125, %v2600_v14  ;;  %v2597_v52 = vpop.xlane.xlu0 %2596 }
0x1d3e   :  { %v2601_v4 = vmul.f32 0.03125, %v2597_v52 }
0x1d3f   :  { %v2604_v5 = vadd.f32 1e-05, %v2602_v2 }
0x1d40   :  { %v2603_v10 = vadd.f32 1e-05, %v2601_v4 }
0x1d41   :  { %6406 = vrsqrt.f32 %v2604_v5 }
0x1d42   :  { %6408 = vrsqrt.f32 %v2603_v10 }
0x1d4b   :  { %v6407_v25 = vpop.eup %6406 }
0x1d4c   :  { %v6409_v13 = vpop.eup %6408  ;;  %v2608_v15 = vmul.f32 %v6407_v25, %v2592_v47 }
0x1d4d   :  { %v2607_v16 = vmul.f32 %v6409_v13, %v2591_v48 }
0x1d4e   :  { %v2616_v9 = vmul.f32 %v5202_v28, %v2608_v15 }
0x1d4f   :  { %v2615_v7 = vmul.f32 %v5202_v28, %v2607_v16 }
0x1d50   :  { %v2624_v18 = vadd.f32 %v5203_v17, %v2616_v9 }
0x1d51   :  { %v2623_v20 = vadd.f32 %v5203_v17, %v2615_v7 }
0x1d52   :  { %v7178_v6 = vadd.f32 %v6493_v12, %v2624_v18 }
0x1d53   :  { %v7173_v3 = vadd.f32 %v6492_v22, %v2623_v20 }
0x1d55   :  { %5741 = vmatprep.mubr.msk.f32.mxu1 %vm73_vm0, %v7173_v3 }
0x1d56   :  { %5742 = vmatmul.mubr.msk.f32.vlgmr.msra.gmra.mrb[24].mxu1 %vm73_vm0, %v7178_v6 }
0x1e29   :  { %v5743_v0 = vpop.f32.mrb[24].mxu1 }
0x1e2a   :  { %v7187_v62 = vadd.f32 %v6494_v24, %v5743_v0  ;;  %v2699_v26 = vpop.f32.mrb[25].mxu1 }
0x1e2b   :  { %v7189_v30 = vadd.f32 %v6494_v24, %v2699_v26 }
0x1e2c   :  { %v2709_v55 = vmul.f32 %v7198_v35, %v7187_v62  ;;  %v2919_v44 = vmul.f32 %v7221_v41, %v7187_v62 }
0x1e2d   :  { %v7193_v32 = vpack.i.bf16 %v7187_v62, %v7189_v30  ;;  %v2708_v36 = vmul.f32 %v7198_v35, %v7189_v30  ;;  %v2918_v43 = vmul.f32 %v7221_v41, %v7189_v30 }
0x1e2f   :  { %6311 = vrot.lane.b32.xlu0 %v7193_v32, %s6516_s28  ;;  %5748 = vmatprep.mubr.msk.f32.mxu1 %vm73_vm0, %v2708_v36 }
0x1ea1   :  { %v6312_v60 = vpop.permute.xlu0 %6311 }
0x1ea2   :  { %v6314_v38 = vunpack.i.h.bf16 %v6312_v60  ;;  %v6313_v27 = vunpack.i.l.bf16 %v6312_v60 }
0x1ea4   :  { %v7205_v57 = vpack.c.bf16 %v6314_v38, %v6313_v27 }
0x1ea6   :  { %6130 = vmatprep.subr.msk.bf16.mxu1 %vm6662_vm1, %v7205_v57 }
0x1ea7   :  { %6133 = vmatpush3.bf16.xpose.msk.msra.mxu1 %vm6662_vm1, %v7205_v57 }
0x1ea8   :  { %6140 = vmatprep.subr.msk.bf16.mxu1 %vm6662_vm1, %v7205_v57 }
0x1eae   :  { %5749 = vmatmul.mubr.msk.f32.vlgmr.msra.gmra.mrb[26].mxu1 %vm73_vm0, %v2709_v55 }
0x1eaf   :  { %6143 = vmatpush3.bf16.xpose.msk.msra.mxu1 %vm6662_vm1, %v7205_v57  ;;  %5762 = vmatprep.mubr.msk.f32.mxu1 %vm73_vm0, %v2918_v43 }
0x1eb6   :  { %5763 = vmatmul.mubr.msk.f32.vlgmr.msra.gmra.mrb[28].mxu1 %vm73_vm0, %v2919_v44 }
0x1f81   :  { %v5750_v46 = vpop.f32.mrb[26].mxu1 }
0x1f82   :  { %v2792_v47 = vpop.f32.mrb[27].mxu1  ;;  %v2802_v48 = vmul.f32 0.35355338, %v5750_v46 }
0x1f83   :  { %v2801_v51 = vmul.f32 0.35355338, %v2792_v47 }
0x1f84   :  { %v2804_v1 = vadd.f32 %v7039_v39, %v2802_v48 }
0x1f85   :  { %v2803_v54 = vadd.f32 %v7032_v8, %v2801_v51 }
0x1f86   :  { %v2808_v5 = vsel %vm259_vm2, %v2804_v1, -inf }
0x1f87   :  { %v2805_v58 = vsel %vm259_vm2, %v2803_v54, -inf }
0x1f88   :  { %2806 = vmax.xlane.f32.xlu1 %v2805_v58 }
0x1f89   :  { %v5764_v14 = vpop.f32.mrb[28].mxu1 }
0x1f8a   :  { %v2992_v2 = vpop.f32.mrb[29].mxu1  ;;  %v3002_v52 = vmul.f32 0.35355338, %v5764_v14 }
0x1f8b   :  { %v3001_v4 = vmul.f32 0.35355338, %v2992_v2 }
0x1f8c   :  { %2809 = vmax.xlane.f32.xlu1 %v2808_v5  ;;  %v3004_v28 = vadd.f32 %v7039_v39, %v3002_v52 }
0x1f8d   :  { %v3003_v10 = vadd.f32 %v7032_v8, %v3001_v4 }
0x1f8e   :  { %v3008_v13 = vsel %vm259_vm2, %v3004_v28, -inf }
0x1f8f   :  { %v3005_v25 = vsel %vm259_vm2, %v3003_v10, -inf }
0x1f90   :  { %3006 = vmax.xlane.f32.xlu1 %v3005_v25 }
0x1f94   :  { %3009 = vmax.xlane.f32.xlu1 %v3008_v13 }
0x2015   :  { %v2807_v15 = vpop.xlane.xlu1 %2806 }
0x2016   :  { %v2811_v16 = vsub.f32 %v2803_v54, %v2807_v15  ;;  %v7259_v15 = vld [vmem:[%s7568_s2 + $0x2] ss:$0 sm:$0xff] }
0x2018   :  { %v2813_v17 = vmul.f32 1.442695, %v2811_v16  ;;  %v3112_v16 = vmul.f32 %v7259_v15, %v7189_v30 }
0x2019   :  { %v2810_v9 = vpop.xlane.xlu1 %2809 }
0x201a   :  { %6410 = vpow2.f32 %v2813_v17  ;;  %v2812_v7 = vsub.f32 %v2804_v1, %v2810_v9  ;;  %v3113_v17 = vmul.f32 %v7259_v15, %v7187_v62 }
0x201c   :  { %v2815_v18 = vmul.f32 1.442695, %v2812_v7 }
0x201d   :  { %v3007_v20 = vpop.xlane.xlu1 %3006 }
0x201e   :  { %6412 = vpow2.f32 %v2815_v18  ;;  %v3011_v22 = vsub.f32 %v3003_v10, %v3007_v20 }
0x2020   :  { %v3013_v26 = vmul.f32 1.442695, %v3011_v22 }
0x2021   :  { %v3010_v12 = vpop.xlane.xlu1 %3009 }
0x2022   :  { %v3012_v0 = vsub.f32 %v3004_v28, %v3010_v12 }
0x2024   :  { %v6411_v24 = vpop.eup %6410  ;;  %v3015_v36 = vmul.f32 1.442695, %v3012_v0 }
0x2025   :  { %v2817_v60 = vsel %vm259_vm2, %v6411_v24, 0.0 }
0x2026   :  { %6414 = vpow2.f32 %v3015_v36  ;;  %2818 = vadd.xlane.f32.xlu1 %v2817_v60 }
0x2027   :  { %6416 = vpow2.f32 %v3013_v26 }
0x2028   :  { %v6413_v38 = vpop.eup %6412 }
0x2029   :  { %v2820_v27 = vsel %vm259_vm2, %v6413_v38, 0.0 }
0x202a   :  { %2821 = vadd.xlane.f32.xlu0 %v2820_v27 }
0x2030   :  { %v6415_v55 = vpop.eup %6414 }
0x2031   :  { %v3020_v43 = vsel %vm259_vm2, %v6415_v55, 0.0  ;;  %v6417_v44 = vpop.eup %6416 }
0x2032   :  { %3021 = vadd.xlane.f32.xlu1 %v3020_v43  ;;  %v3017_v46 = vsel %vm259_vm2, %v6417_v44, 0.0 }
0x2036   :  { %3018 = vadd.xlane.f32.xlu1 %v3017_v46 }
0x2047   :  { %6316 = vrot.lane.b32.xlu1 %v7193_v32, %s6517_s19 }
0x20b3   :  { %v2819_v47 = vpop.xlane.xlu1 %2818 }
0x20b4   :  { %6418 = vrcp.f32 %v2819_v47 }
0x20b7   :  { %v2822_v51 = vpop.xlane.xlu0 %2821 }
0x20b8   :  { %6420 = vrcp.f32 %v2822_v51 }
0x20be   :  { %v6419_v48 = vpop.eup %6418 }
0x20bf   :  { %v3022_v54 = vpop.xlane.xlu1 %3021  ;;  %v2825_v58 = vmul.f32 %v6419_v48, %v6411_v24 }
0x20c1   :  { %5755 = vmatprep.mubr.msk.f32.mxu0 %vm259_vm2, %v2825_v58 }
0x20c2   :  { %v6421_v5 = vpop.eup %6420 }
0x20c3   :  { %v3019_v1 = vpop.xlane.xlu1 %3018  ;;  %v2826_v10 = vmul.f32 %v6421_v5, %v6413_v38 }
0x20c4   :  { %6422 = vrcp.f32 %v3019_v1 }
0x20c5   :  { %6424 = vrcp.f32 %v3022_v54 }
0x20c7   :  { %v6317_v14 = vpop.permute.xlu1 %6316 }
0x20c8   :  { %v6319_v2 = vunpack.i.h.bf16 %v6317_v14  ;;  %v6318_v52 = vunpack.i.l.bf16 %v6317_v14 }
0x20ca   :  { %v6134_v4 = vpack.c.bf16 %v6319_v2, %v6318_v52 }
0x20cc   :  { %6135 = vmatprep.subr.bf16.mxu0 %v6134_v4  ;;  %6155 = vmatprep.subr.bf16.mxu1 %v6134_v4 }
0x20cd   :  { %6137 = vmatpush3.bf16.msra.mxu0 %v6134_v4  ;;  %6157 = vmatpush3.bf16.msra.mxu1 %v6134_v4 }
0x20ce   :  { %v6423_v32 = vpop.eup %6422  ;;  %6145 = vmatprep.subr.bf16.mxu0 %v6134_v4  ;;  %6160 = vmatprep.subr.msk.bf16.mxu1 %vm6662_vm1, %v7205_v57 }
0x20cf   :  { %v6425_v25 = vpop.eup %6424  ;;  %v3025_v28 = vmul.f32 %v6423_v32, %v6417_v44 }
0x20d0   :  { %5756 = vmatmul.mubr.msk.f32.vlgmr.msra.gmra.mrb[24].mxu0 %vm259_vm2, %v2826_v10  ;;  %v3026_v13 = vmul.f32 %v6425_v25, %v6415_v55 }
0x20d1   :  { %6147 = vmatpush3.bf16.msra.mxu0 %v6134_v4  ;;  %5769 = vmatprep.mubr.msk.f32.mxu0 %vm259_vm2, %v3025_v28 }
0x20d2   :  { %6150 = vmatprep.subr.msk.bf16.mxu0 %vm6662_vm1, %v7205_v57 }
0x20d4   :  { %5770 = vmatmul.mubr.msk.f32.vlgmr.msra.gmra.mrb[26].mxu0 %vm259_vm2, %v3026_v13 }
0x20d5   :  { %5776 = vmatprep.mubr.msk.f32.mxu0 %vm73_vm0, %v3112_v16 }
0x20da   :  { %6153 = vmatpush3.bf16.xpose.msk.msra.mxu0 %vm6662_vm1, %v7205_v57 }
0x20db   :  { %6165 = vmatprep.subr.bf16.mxu0 %v6134_v4 }
0x20e1   :  { %5777 = vmatmul.mubr.msk.f32.vlgmr.msra.gmra.mrb[28].mxu0 %vm73_vm0, %v3113_v17  ;;  %v7286_v17 = vld [vmem:[%s7568_s2 + $0x3] ss:$0 sm:$0xff] }
0x20e2   :  { %6167 = vmatpush3.bf16.msra.mxu0 %v6134_v4 }
0x20e3   :  { %6169 = vmatprep.subr.bf16.mxu0 %v6791_v40 }
0x21a3   :  { %v5757_v9 = vpop.f32.mrb[24].mxu0 }
0x21a4   :  { %v2905_v7 = vpop.f32.mrb[25].mxu0  ;;  %v2915_v20 = vmul.f32 %v7198_v35, %v5757_v9  ;;  %v3306_v9 = vmul.f32 %v7286_v17, %v7189_v30 }
0x21a5   :  { %v2914_v0 = vmul.f32 %v7198_v35, %v2905_v7  ;;  %v3307_v7 = vmul.f32 %v7286_v17, %v7187_v62 }
0x21a7   :  { %v5771_v18 = vpop.f32.mrb[26].mxu0 }
0x21a8   :  { %v3109_v22 = vmul.f32 %v7221_v41, %v5771_v18  ;;  %v3099_v12 = vpop.f32.mrb[27].mxu0 }
0x21a9   :  { %v3108_v24 = vmul.f32 %v7221_v41, %v3099_v12 }
0x21aa   :  { %v3111_v26 = vadd.f32 %v3109_v22, %v2915_v20 }
0x21ab   :  { %v3110_v36 = vadd.f32 %v3108_v24, %v2914_v0 }
0x21b4   :  { %v5778_v60 = vpop.f32.mrb[28].mxu0 }
0x21b5   :  { %v3196_v38 = vmul.f32 0.35355338, %v5778_v60  ;;  %v3186_v27 = vpop.f32.mrb[29].mxu0 }
0x21b6   :  { %v3195_v55 = vmul.f32 0.35355338, %v3186_v27 }
0x21b7   :  { %v3198_v43 = vadd.f32 %v7039_v39, %v3196_v38 }
0x21b8   :  { %v3197_v44 = vadd.f32 %v7032_v8, %v3195_v55 }
0x21b9   :  { %v3202_v46 = vsel %vm259_vm2, %v3198_v43, -inf }
0x21ba   :  { %3203 = vmax.xlane.f32.xlu0 %v3202_v46  ;;  %v3199_v47 = vsel %vm259_vm2, %v3197_v44, -inf }
0x21bb   :  { %3200 = vmax.xlane.f32.xlu1 %v3199_v47 }
0x2247   :  { %v3204_v48 = vpop.xlane.xlu0 %3203 }
0x2248   :  { %v3206_v51 = vsub.f32 %v3198_v43, %v3204_v48  ;;  %v3201_v54 = vpop.xlane.xlu1 %3200 }
0x2249   :  { %v3205_v58 = vsub.f32 %v3197_v44, %v3201_v54 }
0x224a   :  { %v3209_v1 = vmul.f32 1.442695, %v3206_v51 }
0x224b   :  { %v3207_v14 = vmul.f32 1.442695, %v3205_v58 }
0x224d   :  { %6426 = vpow2.f32 %v3207_v14 }
0x224e   :  { %6428 = vpow2.f32 %v3209_v1 }
0x2257   :  { %v6427_v2 = vpop.eup %6426 }
0x2258   :  { %v3211_v52 = vsel %vm259_vm2, %v6427_v2, 0.0  ;;  %v6429_v4 = vpop.eup %6428 }
0x2259   :  { %3212 = vadd.xlane.f32.xlu0 %v3211_v52  ;;  %v3214_v5 = vsel %vm259_vm2, %v6429_v4, 0.0 }
0x225d   :  { %3215 = vadd.xlane.f32.xlu0 %v3214_v5 }
0x22e6   :  { %v3213_v32 = vpop.xlane.xlu0 %3212 }
0x22e7   :  { %6430 = vrcp.f32 %v3213_v32 }
0x22ea   :  { %v3216_v10 = vpop.xlane.xlu0 %3215 }
0x22eb   :  { %6432 = vrcp.f32 %v3216_v10 }
0x22f1   :  { %v6431_v25 = vpop.eup %6430 }
0x22f2   :  { %v3219_v28 = vmul.f32 %v6431_v25, %v6427_v2 }
0x22f4   :  { %5783 = vmatprep.mubr.msk.f32.mxu1 %vm259_vm2, %v3219_v28 }
0x22f5   :  { %v6433_v13 = vpop.eup %6432 }
0x22f6   :  { %v3220_v16 = vmul.f32 %v6433_v13, %v6429_v4 }
0x22f8   :  { %5784 = vmatmul.mubr.msk.f32.vlgmr.msra.gmra.mrb[30].mxu1 %vm259_vm2, %v3220_v16 }
0x22f9   :  { %6163 = vmatpush3.bf16.xpose.msk.msra.mxu1 %vm6662_vm1, %v7205_v57  ;;  %5790 = vmatprep.mubr.msk.f32.mxu1 %vm73_vm0, %v3306_v9 }
0x22fa   :  { %6177 = vmatprep.subr.bf16.mxu1 %v6826_v19 }
0x2300   :  { %5791 = vmatmul.mubr.msk.f32.vlgmr.msra.gmra.mrb[32].mxu1 %vm73_vm0, %v3307_v7 }
0x2301   :  { %6179 = vmatpush3.bf16.msra.mxu1 %v6826_v19 }
0x2302   :  { %6181 = vmatprep.subr.bf16.mxu1 %v6836_v23 }
0x2305   :  { %6183 = vmatpush3.bf16.msra.mxu1 %v6836_v23 }
0x2306   :  { %6201 = vmatprep.subr.bf16.mxu1 %v6906_v33 }
0x23cb   :  { %v5785_v30 = vpop.f32.mrb[30].mxu1 }
0x23cc   :  { %v3303_v57 = vmul.f32 %v7259_v15, %v5785_v30  ;;  %v3293_v18 = vpop.f32.mrb[31].mxu1 }
0x23cd   :  { %v3302_v20 = vmul.f32 %v7259_v15, %v3293_v18 }
0x23ce   :  { %v3305_v22 = vadd.f32 %v3303_v57, %v3111_v26 }
0x23cf   :  { %v3304_v12 = vadd.f32 %v3302_v20, %v3110_v36 }
0x23d3   :  { %v5792_v0 = vpop.f32.mrb[32].mxu1 }
0x23d4   :  { %v3380_v62 = vpop.f32.mrb[33].mxu1  ;;  %v3390_v24 = vmul.f32 0.35355338, %v5792_v0 }
0x23d5   :  { %v3389_v60 = vmul.f32 0.35355338, %v3380_v62 }
0x23d6   :  { %v3392_v23 = vadd.f32 %v7039_v39, %v3390_v24 }
0x23d7   :  { %v3391_v19 = vadd.f32 %v7032_v8, %v3389_v60 }
0x23d8   :  { %v3396_v27 = vsel %vm259_vm2, %v3392_v23, -inf }
0x23d9   :  { %v3393_v38 = vsel %vm259_vm2, %v3391_v19, -inf }
0x23da   :  { %3394 = vmax.xlane.f32.xlu0 %v3393_v38 }
0x23de   :  { %3397 = vmax.xlane.f32.xlu0 %v3396_v27 }
0x2467   :  { %v3395_v55 = vpop.xlane.xlu0 %3394 }
0x2468   :  { %v3399_v43 = vsub.f32 %v3391_v19, %v3395_v55 }
0x246a   :  { %v3401_v44 = vmul.f32 1.442695, %v3399_v43 }
0x246b   :  { %v3398_v46 = vpop.xlane.xlu0 %3397 }
0x246c   :  { %6434 = vpow2.f32 %v3401_v44  ;;  %v3400_v26 = vsub.f32 %v3392_v23, %v3398_v46  ;;  %v6500_v44 = vld [vmem:[%s7574_s7] ss:$0 sm:$0xff] }
0x246e   :  { %v3403_v36 = vmul.f32 1.442695, %v3400_v26 }
0x2470   :  { %6436 = vpow2.f32 %v3403_v36  ;;  %v6501_v36 = vld [vmem:[%s7575_s8] ss:$0 sm:$0xff] }
0x2476   :  { %v6435_v47 = vpop.eup %6434 }
0x2477   :  { %v3405_v48 = vsel %vm259_vm2, %v6435_v47, 0.0 }
0x2478   :  { %3406 = vadd.xlane.f32.xlu0 %v3405_v48 }
0x247a   :  { %v6437_v8 = vpop.eup %6436 }
0x247b   :  { %v3408_v51 = vsel %vm259_vm2, %v6437_v8, 0.0 }
0x247c   :  { %3409 = vadd.xlane.f32.xlu0 %v3408_v51  ;;  %v6502_v51 = vld [vmem:[%s7576_s10] ss:$0 sm:$0xff] }
0x2505   :  { %v3407_v39 = vpop.xlane.xlu0 %3406 }
0x2506   :  { %6438 = vrcp.f32 %v3407_v39 }
0x2509   :  { %v3410_v54 = vpop.xlane.xlu0 %3409 }
0x250a   :  { %6440 = vrcp.f32 %v3410_v54 }
0x2510   :  { %v6439_v58 = vpop.eup %6438 }
0x2511   :  { %v3413_v1 = vmul.f32 %v6439_v58, %v6435_v47 }
0x2513   :  { %5797 = vmatprep.mubr.msk.f32.mxu0 %vm259_vm2, %v3413_v1 }
0x2514   :  { %v6441_v14 = vpop.eup %6440 }
0x2515   :  { %v3414_v2 = vmul.f32 %v6441_v14, %v6437_v8 }
0x2517   :  { %5798 = vmatmul.mubr.msk.f32.vlgmr.msra.gmra.mrb[30].mxu0 %vm259_vm2, %v3414_v2 }
0x2518   :  { %6171 = vmatpush3.bf16.msra.mxu0 %v6791_v40 }
0x2519   :  { %6173 = vmatprep.subr.bf16.mxu0 %v6803_v49 }
0x251c   :  { %6175 = vmatpush3.bf16.msra.mxu0 %v6803_v49  ;;  %v6499_v49 = vld [vmem:[%s7571_s6] ss:$0 sm:$0xff] }
0x251d   :  { %6185 = vmatprep.subr.bf16.mxu0 %v6849_v29 }
0x25ea   :  { %v5799_v52 = vpop.f32.mrb[30].mxu0 }
0x25eb   :  { %v3497_v4 = vmul.f32 %v7286_v17, %v5799_v52  ;;  %v3487_v5 = vpop.f32.mrb[31].mxu0 }
0x25ec   :  { %v3496_v32 = vmul.f32 %v7286_v17, %v3487_v5 }
0x25ed   :  { %v3499_v10 = vadd.f32 %v3497_v4, %v3305_v22 }
0x25ee   :  { %v3498_v25 = vadd.f32 %v3496_v32, %v3304_v12 }
0x25f0   :  { %5808 = vmatprep.mubr.msk.f32.mxu0 %vm73_vm0, %v3498_v25 }
0x25f1   :  { %5809 = vmatmul.mubr.msk.f32.vlgmr.msra.gmra.mrb[32].mxu0 %vm73_vm0, %v3499_v10 }
0x25f2   :  { %6187 = vmatpush3.bf16.msra.mxu0 %v6849_v29 }
0x25f3   :  { %6189 = vmatprep.subr.bf16.mxu0 %v6854_v31 }
0x25f6   :  { %6191 = vmatpush3.bf16.msra.mxu0 %v6854_v31 }
0x25f7   :  { %6193 = vmatprep.subr.bf16.mxu0 %v6865_v34 }
0x25fa   :  { %6195 = vmatpush3.bf16.msra.mxu0 %v6865_v34 }
0x25fb   :  { %6197 = vmatprep.subr.bf16.mxu0 %v6884_v56 }
0x25fe   :  { %6199 = vmatpush3.bf16.msra.mxu0 %v6884_v56 }
0x26c4   :  { %v5810_v40 = vpop.f32.mrb[32].mxu0 }
0x26c5   :  { %v3578_v28 = vadd.f32 %v6499_v49, %v5810_v40  ;;  %v3572_v13 = vpop.f32.mrb[33].mxu0 }
0x26c6   :  { %v3573_v29 = vadd.f32 %v6499_v49, %v3572_v13 }
0x26c7   :  { %v3582_v16 = vadd.f32 %v3578_v28, %v7178_v6 }
0x26c8   :  { %v3581_v31 = vadd.f32 %v3573_v29, %v7173_v3 }
0x26c9   :  { %v3586_v9 = vsel %vm73_vm0, %v3582_v16, 0.0 }
0x26ca   :  { %3587 = vadd.xlane.f32.xlu1 %v3586_v9  ;;  %v3583_v34 = vsel %vm73_vm0, %v3581_v31, 0.0 }
0x26cb   :  { %3584 = vadd.xlane.f32.xlu0 %v3583_v34 }
0x2757   :  { %v3588_v7 = vpop.xlane.xlu1 %3587 }
0x2758   :  { %v3590_v56 = vmul.f32 0.03125, %v3588_v7  ;;  %v3585_v30 = vpop.xlane.xlu0 %3584 }
0x2759   :  { %v3589_v57 = vmul.f32 0.03125, %v3585_v30 }
0x275a   :  { %v3592_v18 = vsub.f32 %v3582_v16, %v3590_v56 }
0x275b   :  { %v3591_v20 = vsub.f32 %v3581_v31, %v3589_v57 }
0x275c   :  { %v3594_v22 = vmul.f32 %v3592_v18, %v3592_v18 }
0x275d   :  { %v3593_v12 = vmul.f32 %v3591_v20, %v3591_v20 }
0x275e   :  { %v3598_v0 = vsel %vm73_vm0, %v3594_v22, 0.0 }
0x275f   :  { %3599 = vadd.xlane.f32.xlu1 %v3598_v0  ;;  %v3595_v6 = vsel %vm73_vm0, %v3593_v12, 0.0 }
0x2760   :  { %3596 = vadd.xlane.f32.xlu0 %v3595_v6 }
0x27ec   :  { %v3600_v3 = vpop.xlane.xlu1 %3599 }
0x27ed   :  { %v3602_v62 = vmul.f32 0.03125, %v3600_v3  ;;  %v3597_v24 = vpop.xlane.xlu0 %3596 }
0x27ee   :  { %v3601_v60 = vmul.f32 0.03125, %v3597_v24 }
0x27ef   :  { %v3604_v19 = vadd.f32 1e-05, %v3602_v62  ;;  %v6504_v62 = vld [vmem:[%s7578_s13] ss:$0 sm:$0xff] }
0x27f0   :  { %v3603_v38 = vadd.f32 1e-05, %v3601_v60 }
0x27f1   :  { %6442 = vrsqrt.f32 %v3604_v19  ;;  %v6505_v19 = vld [vmem:[%s7579_s14] ss:$0 sm:$0xff] }
0x27f2   :  { %6444 = vrsqrt.f32 %v3603_v38 }
0x27fb   :  { %v6443_v23 = vpop.eup %6442 }
0x27fc   :  { %v6445_v27 = vpop.eup %6444  ;;  %v3608_v55 = vmul.f32 %v6443_v23, %v3592_v18 }
0x27fd   :  { %v3607_v43 = vmul.f32 %v6445_v27, %v3591_v20 }
0x27fe   :  { %v3610_v46 = vmul.f32 %v6500_v44, %v3608_v55  ;;  %v6506_v55 = vld [vmem:[%s7567_s4 + $0x1] ss:$0 sm:$0xff] }
0x27ff   :  { %v3609_v26 = vmul.f32 %v6500_v44, %v3607_v43 }
0x2800   :  { %v3612_v48 = vadd.f32 %v6501_v36, %v3610_v46 }
0x2801   :  { %v3611_v47 = vadd.f32 %v6501_v36, %v3609_v26 }
0x2803   :  { %5819 = vmatprep.mubr.msk.f32.mxu1 %vm73_vm0, %v3611_v47 }
0x2804   :  { %5820 = vmatmul.mubr.msk.f32.vlgmr.msra.gmra.mrb[34].mxu1 %vm73_vm0, %v3612_v48 }
0x2805   :  { %6203 = vmatpush3.bf16.msra.mxu1 %v6906_v33  ;;  %v6503_v33 = vld [vmem:[%s7577_s12] ss:$0 sm:$0xff] }
0x2806   :  { %6205 = vmatprep.subr.bf16.mxu1 %v6916_v37 }
0x2809   :  { %6207 = vmatpush3.bf16.msra.mxu1 %v6916_v37 }
0x28d7   :  { %v5821_v8 = vpop.f32.mrb[34].mxu1 }
0x28d8   :  { %v3691_v39 = vadd.f32 %v6502_v51, %v5821_v8  ;;  %v3685_v54 = vpop.f32.mrb[35].mxu1 }
0x28d9   :  { %v3686_v58 = vadd.f32 %v6502_v51, %v3685_v54 }
0x28da   :  { %v3695_v14 = vmax.f32 %v3691_v39, 0.0 }
0x28db   :  { %v3694_v1 = vmax.f32 %v3686_v58, 0.0 }
0x28dd   :  { %5838 = vmatprep.mubr.msk.f32.mxu0 %vm1227_vm3, %v3694_v1 }
0x28de   :  { %5839 = vmatmul.mubr.msk.f32.vlgmr.msra.gmra.mrb[34].mxu0 %vm1227_vm3, %v3695_v14 }
0x29b1   :  { %v5840_v2 = vpop.f32.mrb[34].mxu0 }
0x29b2   :  { %v3774_v37 = vadd.f32 %v6503_v33, %v5840_v2  ;;  %v3768_v52 = vpop.f32.mrb[35].mxu0 }
0x29b3   :  { %v3769_v4 = vadd.f32 %v6503_v33, %v3768_v52 }
0x29b4   :  { %v3778_v5 = vadd.f32 %v3774_v37, %v3612_v48  ;;  %v7416_v37 = vld [vmem:[%s7569_s1] sm:$0xff] }
0x29b5   :  { %v3777_v32 = vadd.f32 %v3769_v4, %v3611_v47 }
0x29b6   :  { %v3782_v10 = vsel %vm73_vm0, %v3778_v5, 0.0 }
0x29b7   :  { %3783 = vadd.xlane.f32.xlu1 %v3782_v10  ;;  %v3779_v25 = vsel %vm73_vm0, %v3777_v32, 0.0 }
0x29b8   :  { %3780 = vadd.xlane.f32.xlu0 %v3779_v25 }
0x2a44   :  { %v3784_v40 = vpop.xlane.xlu1 %3783 }
0x2a45   :  { %v3786_v49 = vmul.f32 0.03125, %v3784_v40  ;;  %v3781_v28 = vpop.xlane.xlu0 %3780 }
0x2a46   :  { %v3785_v13 = vmul.f32 0.03125, %v3781_v28 }
0x2a47   :  { %v3788_v29 = vsub.f32 %v3778_v5, %v3786_v49  ;;  %v7423_v5 = vld [vmem:[%s7569_s1 + $0x8] sm:$0xff] }
0x2a48   :  { %v3787_v16 = vsub.f32 %v3777_v32, %v3785_v13 }
0x2a49   :  { %v3790_v31 = vmul.f32 %v3788_v29, %v3788_v29 }
0x2a4a   :  { %v3789_v9 = vmul.f32 %v3787_v16, %v3787_v16 }
0x2a4b   :  { %v3794_v34 = vsel %vm73_vm0, %v3790_v31, 0.0 }
0x2a4c   :  { %3795 = vadd.xlane.f32.xlu1 %v3794_v34  ;;  %v3791_v7 = vsel %vm73_vm0, %v3789_v9, 0.0 }
0x2a4d   :  { %3792 = vadd.xlane.f32.xlu0 %v3791_v7 }
0x2ad9   :  { %v3796_v56 = vpop.xlane.xlu1 %3795 }
0x2ada   :  { %v3798_v30 = vmul.f32 0.03125, %v3796_v56  ;;  %v3793_v57 = vpop.xlane.xlu0 %3792 }
0x2adb   :  { %v3797_v18 = vmul.f32 0.03125, %v3793_v57 }
0x2adc   :  { %v3800_v20 = vadd.f32 1e-05, %v3798_v30 }
0x2add   :  { %v3799_v22 = vadd.f32 1e-05, %v3797_v18 }
0x2ade   :  { %6446 = vrsqrt.f32 %v3800_v20 }
0x2adf   :  { %6448 = vrsqrt.f32 %v3799_v22 }
0x2ae8   :  { %v6447_v12 = vpop.eup %6446 }
0x2ae9   :  { %v6449_v0 = vpop.eup %6448  ;;  %v3804_v6 = vmul.f32 %v6447_v12, %v3788_v29 }
0x2aea   :  { %v3803_v3 = vmul.f32 %v6449_v0, %v3787_v16 }
0x2aeb   :  { %v3806_v24 = vmul.f32 %v6504_v62, %v3804_v6 }
0x2aec   :  { %v3805_v60 = vmul.f32 %v6504_v62, %v3803_v3 }
0x2aed   :  { %v7368_v23 = vadd.f32 %v6505_v19, %v3806_v24 }
0x2aee   :  { %v7366_v38 = vadd.f32 %v6505_v19, %v3805_v60 }
0x2af0   :  { %5849 = vmatprep.mubr.msk.f32.mxu1 %vm73_vm0, %v7366_v38 }
0x2af1   :  { %5850 = vmatmul.mubr.msk.f32.vlgmr.msra.gmra.mrb[36].mxu1 %vm73_vm0, %v7368_v23 }
0x2bc4   :  { %v5851_v27 = vpop.f32.mrb[36].mxu1 }
0x2bc5   :  { %v7377_v43 = vadd.f32 %v6506_v55, %v5851_v27  ;;  %v3881_v44 = vpop.f32.mrb[37].mxu1 }
0x2bc6   :  { %v7379_v46 = vadd.f32 %v6506_v55, %v3881_v44 }
0x2bc7   :  { %v3891_v39 = vmul.f32 %v7198_v35, %v7377_v43  ;;  %v4101_v58 = vmul.f32 %v7221_v41, %v7377_v43 }
0x2bc8   :  { %v7383_v26 = vpack.i.bf16 %v7377_v43, %v7379_v46  ;;  %v3890_v36 = vmul.f32 %v7198_v35, %v7379_v46  ;;  %v4100_v54 = vmul.f32 %v7221_v41, %v7379_v46 }
0x2bca   :  { %6321 = vrot.lane.b32.xlu0 %v7383_v26, %s6516_s28  ;;  %5856 = vmatprep.mubr.msk.f32.mxu1 %vm73_vm0, %v3890_v36 }
0x2c3c   :  { %v6322_v47 = vpop.permute.xlu0 %6321 }
0x2c3d   :  { %v6324_v48 = vunpack.i.h.bf16 %v6322_v47  ;;  %v6323_v8 = vunpack.i.l.bf16 %v6322_v47 }
0x2c3f   :  { %v7390_v51 = vpack.c.bf16 %v6324_v48, %v6323_v8 }
0x2c41   :  { %6210 = vmatprep.subr.msk.bf16.mxu1 %vm6662_vm1, %v7390_v51 }
0x2c42   :  { %6213 = vmatpush3.bf16.xpose.msk.msra.mxu1 %vm6662_vm1, %v7390_v51 }
0x2c43   :  { %6220 = vmatprep.subr.msk.bf16.mxu1 %vm6662_vm1, %v7390_v51 }
0x2c49   :  { %5857 = vmatmul.mubr.msk.f32.vlgmr.msra.gmra.mrb[38].mxu1 %vm73_vm0, %v3891_v39 }
0x2c4a   :  { %6223 = vmatpush3.bf16.xpose.msk.msra.mxu1 %vm6662_vm1, %v7390_v51  ;;  %5870 = vmatprep.mubr.msk.f32.mxu1 %vm73_vm0, %v4100_v54 }
0x2c51   :  { %5871 = vmatmul.mubr.msk.f32.vlgmr.msra.gmra.mrb[40].mxu1 %vm73_vm0, %v4101_v58 }
0x2d1c   :  { %v5858_v1 = vpop.f32.mrb[38].mxu1 }
0x2d1d   :  { %v3974_v14 = vpop.f32.mrb[39].mxu1  ;;  %v3984_v2 = vmul.f32 0.35355338, %v5858_v1 }
0x2d1e   :  { %v3983_v33 = vmul.f32 0.35355338, %v3974_v14 }
0x2d1f   :  { %v3986_v32 = vadd.f32 %v7423_v5, %v3984_v2 }
0x2d20   :  { %v3985_v52 = vadd.f32 %v7416_v37, %v3983_v33 }
0x2d21   :  { %v3990_v28 = vsel %vm259_vm2, %v3986_v32, -inf }
0x2d22   :  { %v3987_v4 = vsel %vm259_vm2, %v3985_v52, -inf }
0x2d23   :  { %3988 = vmax.xlane.f32.xlu1 %v3987_v4 }
0x2d24   :  { %v5872_v10 = vpop.f32.mrb[40].mxu1 }
0x2d25   :  { %v4174_v25 = vpop.f32.mrb[41].mxu1  ;;  %v4184_v40 = vmul.f32 0.35355338, %v5872_v10 }
0x2d26   :  { %v4183_v49 = vmul.f32 0.35355338, %v4174_v25  ;;  %v4294_v25 = vmul.f32 %v7259_v15, %v7379_v46 }
0x2d27   :  { %3991 = vmax.xlane.f32.xlu1 %v3990_v28  ;;  %v4186_v16 = vadd.f32 %v7423_v5, %v4184_v40  ;;  %v4295_v40 = vmul.f32 %v7259_v15, %v7377_v43 }
0x2d28   :  { %v4185_v13 = vadd.f32 %v7416_v37, %v4183_v49 }
0x2d29   :  { %v4190_v31 = vsel %vm259_vm2, %v4186_v16, -inf }
0x2d2a   :  { %v4187_v29 = vsel %vm259_vm2, %v4185_v13, -inf }
0x2d2b   :  { %4188 = vmax.xlane.f32.xlu1 %v4187_v29 }
0x2d2f   :  { %4191 = vmax.xlane.f32.xlu1 %v4190_v31 }
0x2db0   :  { %v3989_v9 = vpop.xlane.xlu1 %3988 }
0x2db1   :  { %v3993_v34 = vsub.f32 %v3985_v52, %v3989_v9 }
0x2db3   :  { %v3995_v7 = vmul.f32 1.442695, %v3993_v34 }
0x2db4   :  { %v3992_v56 = vpop.xlane.xlu1 %3991 }
0x2db5   :  { %6450 = vpow2.f32 %v3995_v7  ;;  %v3994_v30 = vsub.f32 %v3986_v32, %v3992_v56 }
0x2db7   :  { %v3997_v57 = vmul.f32 1.442695, %v3994_v30 }
0x2db8   :  { %v4189_v18 = vpop.xlane.xlu1 %4188 }
0x2db9   :  { %6452 = vpow2.f32 %v3997_v57  ;;  %v4193_v20 = vsub.f32 %v4185_v13, %v4189_v18 }
0x2dbb   :  { %v4195_v6 = vmul.f32 1.442695, %v4193_v20 }
0x2dbc   :  { %v4192_v22 = vpop.xlane.xlu1 %4191 }
0x2dbd   :  { %v4194_v12 = vsub.f32 %v4186_v16, %v4192_v22 }
0x2dbf   :  { %v6451_v0 = vpop.eup %6450  ;;  %v4197_v3 = vmul.f32 1.442695, %v4194_v12 }
0x2dc0   :  { %v3999_v62 = vsel %vm259_vm2, %v6451_v0, 0.0 }
0x2dc1   :  { %6454 = vpow2.f32 %v4197_v3  ;;  %4000 = vadd.xlane.f32.xlu1 %v3999_v62 }
0x2dc2   :  { %6456 = vpow2.f32 %v4195_v6 }
0x2dc3   :  { %v6453_v24 = vpop.eup %6452 }
0x2dc4   :  { %v4002_v60 = vsel %vm259_vm2, %v6453_v24, 0.0 }
0x2dc5   :  { %4003 = vadd.xlane.f32.xlu0 %v4002_v60 }
0x2dcb   :  { %v6455_v19 = vpop.eup %6454 }
0x2dcc   :  { %v4202_v27 = vsel %vm259_vm2, %v6455_v19, 0.0  ;;  %v6457_v55 = vpop.eup %6456 }
0x2dcd   :  { %4203 = vadd.xlane.f32.xlu1 %v4202_v27  ;;  %v4199_v44 = vsel %vm259_vm2, %v6457_v55, 0.0 }
0x2dd1   :  { %4200 = vadd.xlane.f32.xlu1 %v4199_v44 }
0x2de2   :  { %6326 = vrot.lane.b32.xlu1 %v7383_v26, %s6517_s19 }
0x2e4e   :  { %v4001_v36 = vpop.xlane.xlu1 %4000 }
0x2e4f   :  { %6458 = vrcp.f32 %v4001_v36 }
0x2e52   :  { %v4004_v48 = vpop.xlane.xlu0 %4003 }
0x2e53   :  { %6460 = vrcp.f32 %v4004_v48 }
0x2e59   :  { %v6459_v47 = vpop.eup %6458 }
0x2e5a   :  { %v4204_v8 = vpop.xlane.xlu1 %4203  ;;  %v4007_v39 = vmul.f32 %v6459_v47, %v6451_v0 }
0x2e5c   :  { %5863 = vmatprep.mubr.msk.f32.mxu0 %vm259_vm2, %v4007_v39 }
0x2e5d   :  { %v6461_v33 = vpop.eup %6460 }
0x2e5e   :  { %v4201_v54 = vpop.xlane.xlu1 %4200  ;;  %v4008_v52 = vmul.f32 %v6461_v33, %v6453_v24 }
0x2e5f   :  { %6462 = vrcp.f32 %v4201_v54 }
0x2e60   :  { %6464 = vrcp.f32 %v4204_v8 }
0x2e62   :  { %v6327_v58 = vpop.permute.xlu1 %6326 }
0x2e63   :  { %v6329_v1 = vunpack.i.h.bf16 %v6327_v58  ;;  %v6328_v14 = vunpack.i.l.bf16 %v6327_v58  ;;  %v4488_v58 = vmul.f32 %v7286_v17, %v7379_v46 }
0x2e65   :  { %v6214_v2 = vpack.c.bf16 %v6329_v1, %v6328_v14  ;;  %v4489_v1 = vmul.f32 %v7286_v17, %v7377_v43 }
0x2e67   :  { %6215 = vmatprep.subr.bf16.mxu0 %v6214_v2  ;;  %6235 = vmatprep.subr.bf16.mxu1 %v6214_v2 }
0x2e68   :  { %6217 = vmatpush3.bf16.msra.mxu0 %v6214_v2  ;;  %6237 = vmatpush3.bf16.msra.mxu1 %v6214_v2 }
0x2e69   :  { %v6463_v26 = vpop.eup %6462  ;;  %6225 = vmatprep.subr.bf16.mxu0 %v6214_v2  ;;  %6240 = vmatprep.subr.msk.bf16.mxu1 %vm6662_vm1, %v7390_v51 }
0x2e6a   :  { %v6465_v4 = vpop.eup %6464  ;;  %v4207_v32 = vmul.f32 %v6463_v26, %v6457_v55 }
0x2e6b   :  { %5864 = vmatmul.mubr.msk.f32.vlgmr.msra.gmra.mrb[36].mxu0 %vm259_vm2, %v4008_v52  ;;  %v4208_v10 = vmul.f32 %v6465_v4, %v6455_v19 }
0x2e6c   :  { %6227 = vmatpush3.bf16.msra.mxu0 %v6214_v2  ;;  %5877 = vmatprep.mubr.msk.f32.mxu0 %vm259_vm2, %v4207_v32 }
0x2e6d   :  { %6230 = vmatprep.subr.msk.bf16.mxu0 %vm6662_vm1, %v7390_v51 }
0x2e6f   :  { %5878 = vmatmul.mubr.msk.f32.vlgmr.msra.gmra.mrb[38].mxu0 %vm259_vm2, %v4208_v10 }
0x2e70   :  { %5884 = vmatprep.mubr.msk.f32.mxu0 %vm73_vm0, %v4294_v25 }
0x2e75   :  { %6233 = vmatpush3.bf16.xpose.msk.msra.mxu0 %vm6662_vm1, %v7390_v51 }
0x2e76   :  { %6245 = vmatprep.subr.bf16.mxu0 %v6214_v2 }
0x2e7c   :  { %5885 = vmatmul.mubr.msk.f32.vlgmr.msra.gmra.mrb[40].mxu0 %vm73_vm0, %v4295_v40 }
0x2e7d   :  { %6247 = vmatpush3.bf16.msra.mxu0 %v6214_v2 }
0x2e7e   :  { %6249 = vmatprep.subr.bf16.mxu0 %v7051_v59 }
0x2f3e   :  { %v5865_v49 = vpop.f32.mrb[36].mxu0 }
0x2f3f   :  { %v4087_v28 = vpop.f32.mrb[37].mxu0  ;;  %v4097_v29 = vmul.f32 %v7198_v35, %v5865_v49 }
0x2f40   :  { %v4096_v9 = vmul.f32 %v7198_v35, %v4087_v28 }
0x2f42   :  { %v5879_v13 = vpop.f32.mrb[38].mxu0 }
0x2f43   :  { %v4291_v16 = vmul.f32 %v7221_v41, %v5879_v13  ;;  %v4281_v31 = vpop.f32.mrb[39].mxu0 }
0x2f44   :  { %v4290_v34 = vmul.f32 %v7221_v41, %v4281_v31 }
0x2f45   :  { %v4293_v7 = vadd.f32 %v4291_v16, %v4097_v29 }
0x2f46   :  { %v4292_v56 = vadd.f32 %v4290_v34, %v4096_v9 }
0x2f4f   :  { %v5886_v30 = vpop.f32.mrb[40].mxu0 }
0x2f50   :  { %v4378_v57 = vmul.f32 0.35355338, %v5886_v30  ;;  %v4368_v18 = vpop.f32.mrb[41].mxu0 }
0x2f51   :  { %v4377_v20 = vmul.f32 0.35355338, %v4368_v18 }
0x2f52   :  { %v4380_v22 = vadd.f32 %v7423_v5, %v4378_v57 }
0x2f53   :  { %v4379_v12 = vadd.f32 %v7416_v37, %v4377_v20 }
0x2f54   :  { %v4384_v0 = vsel %vm259_vm2, %v4380_v22, -inf }
0x2f55   :  { %4385 = vmax.xlane.f32.xlu0 %v4384_v0  ;;  %v4381_v6 = vsel %vm259_vm2, %v4379_v12, -inf }
0x2f56   :  { %4382 = vmax.xlane.f32.xlu1 %v4381_v6 }
0x2fe2   :  { %v4386_v3 = vpop.xlane.xlu0 %4385 }
0x2fe3   :  { %v4388_v35 = vsub.f32 %v4380_v22, %v4386_v3  ;;  %v4383_v62 = vpop.xlane.xlu1 %4382 }
0x2fe4   :  { %v4387_v41 = vsub.f32 %v4379_v12, %v4383_v62 }
0x2fe5   :  { %v4391_v24 = vmul.f32 1.442695, %v4388_v35 }
0x2fe6   :  { %v4389_v60 = vmul.f32 1.442695, %v4387_v41 }
0x2fe8   :  { %6466 = vpow2.f32 %v4389_v60 }
0x2fe9   :  { %6468 = vpow2.f32 %v4391_v24 }
0x2ff2   :  { %v6467_v19 = vpop.eup %6466 }
0x2ff3   :  { %v4393_v27 = vsel %vm259_vm2, %v6467_v19, 0.0  ;;  %v6469_v55 = vpop.eup %6468 }
0x2ff4   :  { %4394 = vadd.xlane.f32.xlu0 %v4393_v27  ;;  %v4396_v44 = vsel %vm259_vm2, %v6469_v55, 0.0 }
0x2ff8   :  { %4397 = vadd.xlane.f32.xlu0 %v4396_v44 }
0x3081   :  { %v4395_v36 = vpop.xlane.xlu0 %4394 }
0x3082   :  { %6470 = vrcp.f32 %v4395_v36 }
0x3085   :  { %v4398_v47 = vpop.xlane.xlu0 %4397 }
0x3086   :  { %6472 = vrcp.f32 %v4398_v47 }
0x308c   :  { %v6471_v48 = vpop.eup %6470 }
0x308d   :  { %v4401_v8 = vmul.f32 %v6471_v48, %v6467_v19 }
0x308f   :  { %5891 = vmatprep.mubr.msk.f32.mxu1 %vm259_vm2, %v4401_v8 }
0x3090   :  { %v6473_v39 = vpop.eup %6472 }
0x3091   :  { %v4402_v54 = vmul.f32 %v6473_v39, %v6469_v55 }
0x3093   :  { %5892 = vmatmul.mubr.msk.f32.vlgmr.msra.gmra.mrb[42].mxu1 %vm259_vm2, %v4402_v54 }
0x3094   :  { %6243 = vmatpush3.bf16.xpose.msk.msra.mxu1 %vm6662_vm1, %v7390_v51  ;;  %5898 = vmatprep.mubr.msk.f32.mxu1 %vm73_vm0, %v4488_v58 }
0x3095   :  { %6257 = vmatprep.subr.bf16.mxu1 %v7086_v42 }
0x309b   :  { %5899 = vmatmul.mubr.msk.f32.vlgmr.msra.gmra.mrb[44].mxu1 %vm73_vm0, %v4489_v1 }
0x309c   :  { %6259 = vmatpush3.bf16.msra.mxu1 %v7086_v42 }
0x309d   :  { %6261 = vmatprep.subr.bf16.mxu1 %v7096_v45 }
0x30a0   :  { %6263 = vmatpush3.bf16.msra.mxu1 %v7096_v45 }
0x3166   :  { %v5893_v46 = vpop.f32.mrb[42].mxu1 }
0x3167   :  { %v4485_v14 = vmul.f32 %v7259_v15, %v5893_v46  ;;  %v4475_v21 = vpop.f32.mrb[43].mxu1 }
0x3168   :  { %v4484_v51 = vmul.f32 %v7259_v15, %v4475_v21 }
0x3169   :  { %v4487_v2 = vadd.f32 %v4485_v14, %v4293_v7  ;;  %v6510_v14 = vld [vmem:[%s7574_s7 + $0x1] ss:$0 sm:$0xff] }
0x316a   :  { %v4486_v33 = vadd.f32 %v4484_v51, %v4292_v56 }
0x316e   :  { %v5900_v26 = vpop.f32.mrb[44].mxu1 }
0x316f   :  { %v4562_v52 = vpop.f32.mrb[45].mxu1  ;;  %v4572_v4 = vmul.f32 0.35355338, %v5900_v26 }
0x3170   :  { %v4571_v43 = vmul.f32 0.35355338, %v4562_v52 }
0x3171   :  { %v4574_v10 = vadd.f32 %v7423_v5, %v4572_v4  ;;  %v6512_v4 = vld [vmem:[%s7576_s10 + $0x1] ss:$0 sm:$0xff] }
0x3172   :  { %v4573_v32 = vadd.f32 %v7416_v37, %v4571_v43 }
0x3173   :  { %v4578_v45 = vsel %vm259_vm2, %v4574_v10, -inf }
0x3174   :  { %v4575_v42 = vsel %vm259_vm2, %v4573_v32, -inf }
0x3175   :  { %4576 = vmax.xlane.f32.xlu0 %v4575_v42 }
0x3179   :  { %4579 = vmax.xlane.f32.xlu0 %v4578_v45 }
0x3202   :  { %v4577_v25 = vpop.xlane.xlu0 %4576 }
0x3203   :  { %v4581_v40 = vsub.f32 %v4573_v32, %v4577_v25 }
0x3205   :  { %v4583_v49 = vmul.f32 1.442695, %v4581_v40  ;;  %v6513_v40 = vld [vmem:[%s7577_s12 + $0x1] ss:$0 sm:$0xff] }
0x3206   :  { %v4580_v15 = vpop.xlane.xlu0 %4579 }
0x3207   :  { %6474 = vpow2.f32 %v4583_v49  ;;  %v4582_v28 = vsub.f32 %v4574_v10, %v4580_v15 }
0x3209   :  { %v4585_v13 = vmul.f32 1.442695, %v4582_v28 }
0x320b   :  { %6476 = vpow2.f32 %v4585_v13 }
0x3211   :  { %v6475_v29 = vpop.eup %6474 }
0x3212   :  { %v4587_v16 = vsel %vm259_vm2, %v6475_v29, 0.0 }
0x3213   :  { %4588 = vadd.xlane.f32.xlu0 %v4587_v16 }
0x3215   :  { %v6477_v37 = vpop.eup %6476 }
0x3216   :  { %v4590_v31 = vsel %vm259_vm2, %v6477_v37, 0.0 }
0x3217   :  { %4591 = vadd.xlane.f32.xlu0 %v4590_v31 }
0x32a0   :  { %v4589_v5 = vpop.xlane.xlu0 %4588 }
0x32a1   :  { %6478 = vrcp.f32 %v4589_v5 }
0x32a4   :  { %v4592_v9 = vpop.xlane.xlu0 %4591 }
0x32a5   :  { %6480 = vrcp.f32 %v4592_v9 }
0x32ab   :  { %v6479_v34 = vpop.eup %6478 }
0x32ac   :  { %v4595_v7 = vmul.f32 %v6479_v34, %v6475_v29 }
0x32ae   :  { %5905 = vmatprep.mubr.msk.f32.mxu0 %vm259_vm2, %v4595_v7 }
0x32af   :  { %v6481_v56 = vpop.eup %6480 }
0x32b0   :  { %v4596_v30 = vmul.f32 %v6481_v56, %v6477_v37 }
0x32b2   :  { %5906 = vmatmul.mubr.msk.f32.vlgmr.msra.gmra.mrb[42].mxu0 %vm259_vm2, %v4596_v30 }
0x32b3   :  { %6251 = vmatpush3.bf16.msra.mxu0 %v7051_v59 }
0x32b4   :  { %6253 = vmatprep.subr.bf16.mxu0 %v7063_v11 }
0x32b7   :  { %6255 = vmatpush3.bf16.msra.mxu0 %v7063_v11  ;;  %v6509_v11 = vld [vmem:[%s7571_s6 + $0x1] ss:$0 sm:$0xff] }
0x32b8   :  { %6265 = vmatprep.subr.bf16.mxu0 %v7110_v50 }
0x3385   :  { %v5907_v57 = vpop.f32.mrb[42].mxu0 }
0x3386   :  { %v4679_v18 = vmul.f32 %v7286_v17, %v5907_v57  ;;  %v4669_v20 = vpop.f32.mrb[43].mxu0 }
0x3387   :  { %v4678_v22 = vmul.f32 %v7286_v17, %v4669_v20 }
0x3388   :  { %v4681_v12 = vadd.f32 %v4679_v18, %v4487_v2  ;;  %v6511_v2 = vld [vmem:[%s7575_s8 + $0x1] ss:$0 sm:$0xff] }
0x3389   :  { %v4680_v0 = vadd.f32 %v4678_v22, %v4486_v33  ;;  %v4991_v22 = vld [vmem:[%s7580_s15] sm:$0xff] }
0x338b   :  { %5916 = vmatprep.mubr.msk.f32.mxu0 %vm73_vm0, %v4680_v0 }
0x338c   :  { %5917 = vmatmul.mubr.msk.f32.vlgmr.msra.gmra.mrb[44].mxu0 %vm73_vm0, %v4681_v12  ;;  %v4992_v12 = vld [vmem:[%s7580_s15 + $0x8] sm:$0xff] }
0x338d   :  { %6267 = vmatpush3.bf16.msra.mxu0 %v7110_v50  ;;  %v6280_v0 = vpack.c.bf16 %v4992_v12, %v4991_v22 }
0x338e   :  { %6269 = vmatprep.subr.bf16.mxu0 %v7115_v53 }
0x338f   :  { %6281 = vmatprep.subr.bf16.mxu1 %v6280_v0 }
0x3391   :  { %6271 = vmatpush3.bf16.msra.mxu0 %v7115_v53 }
0x3392   :  { %6273 = vmatprep.subr.bf16.mxu0 %v7126_v61 }
0x3395   :  { %6275 = vmatpush3.bf16.msra.mxu0 %v7126_v61 }
0x3396   :  { %6277 = vmatprep.subr.bf16.mxu0 %v7148_v63 }
0x3399   :  { %6279 = vmatpush3.bf16.msra.mxu0 %v7148_v63 }
0x345f   :  { %v5918_v59 = vpop.f32.mrb[44].mxu0 }
0x3460   :  { %v4760_v17 = vadd.f32 %v6509_v11, %v5918_v59  ;;  %v4754_v6 = vpop.f32.mrb[45].mxu0  ;;  %v4993_v59 = vld [vmem:[%s7580_s15 + $0x10] sm:$0xff] }
0x3461   :  { %v4755_v50 = vadd.f32 %v6509_v11, %v4754_v6  ;;  %v4994_v11 = vld [vmem:[%s7580_s15 + $0x18] sm:$0xff] }
0x3462   :  { %v4764_v3 = vadd.f32 %v4760_v17, %v7368_v23  ;;  %v6284_v17 = vpack.c.bf16 %v4994_v11, %v4993_v59 }
0x3463   :  { %v4763_v53 = vadd.f32 %v4755_v50, %v7366_v38 }
0x3464   :  { %v4768_v35 = vsel %vm73_vm0, %v4764_v3, 0.0 }
0x3465   :  { %4769 = vadd.xlane.f32.xlu1 %v4768_v35  ;;  %v4765_v61 = vsel %vm73_vm0, %v4763_v53, 0.0 }
0x3466   :  { %4766 = vadd.xlane.f32.xlu0 %v4765_v61 }
0x34f2   :  { %v4770_v62 = vpop.xlane.xlu1 %4769 }
0x34f3   :  { %v4772_v63 = vmul.f32 0.03125, %v4770_v62  ;;  %v4767_v41 = vpop.xlane.xlu0 %4766 }
0x34f4   :  { %v4771_v24 = vmul.f32 0.03125, %v4767_v41 }
0x34f5   :  { %v4774_v60 = vsub.f32 %v4764_v3, %v4772_v63 }
0x34f6   :  { %v4773_v19 = vsub.f32 %v4763_v53, %v4771_v24 }
0x34f7   :  { %v4776_v27 = vmul.f32 %v4774_v60, %v4774_v60 }
0x34f8   :  { %v4775_v55 = vmul.f32 %v4773_v19, %v4773_v19 }
0x34f9   :  { %v4780_v44 = vsel %vm73_vm0, %v4776_v27, 0.0 }
0x34fa   :  { %4781 = vadd.xlane.f32.xlu1 %v4780_v44  ;;  %v4777_v23 = vsel %vm73_vm0, %v4775_v55, 0.0  ;;  %v6515_v55 = vld [vmem:[%s7579_s14 + $0x1] ss:$0 sm:$0xff] }
0x34fb   :  { %4778 = vadd.xlane.f32.xlu0 %v4777_v23 }
0x3587   :  { %v4782_v38 = vpop.xlane.xlu1 %4781 }
0x3588   :  { %v4784_v36 = vmul.f32 0.03125, %v4782_v38  ;;  %v4779_v47 = vpop.xlane.xlu0 %4778  ;;  %v5268_v38 = vld [vmem:[%s7581_s16] ss:$0 sm:$0xff] }
0x3589   :  { %v4783_v48 = vmul.f32 0.03125, %v4779_v47 }
0x358a   :  { %v4786_v8 = vadd.f32 1e-05, %v4784_v36 }
0x358b   :  { %v4785_v39 = vadd.f32 1e-05, %v4783_v48 }
0x358c   :  { %6482 = vrsqrt.f32 %v4786_v8 }
0x358d   :  { %6484 = vrsqrt.f32 %v4785_v39 }
0x3596   :  { %v6483_v54 = vpop.eup %6482 }
0x3597   :  { %v6485_v58 = vpop.eup %6484  ;;  %v4790_v1 = vmul.f32 %v6483_v54, %v4774_v60  ;;  %v6514_v60 = vld [vmem:[%s7578_s13 + $0x1] ss:$0 sm:$0xff] }
0x3598   :  { %v4789_v46 = vmul.f32 %v6485_v58, %v4773_v19 }
0x3599   :  { %v4792_v21 = vmul.f32 %v6510_v14, %v4790_v1 }
0x359a   :  { %v4791_v51 = vmul.f32 %v6510_v14, %v4789_v46 }
0x359b   :  { %v4794_v26 = vadd.f32 %v6511_v2, %v4792_v21 }
0x359c   :  { %v4793_v33 = vadd.f32 %v6511_v2, %v4791_v51 }
0x359e   :  { %5927 = vmatprep.mubr.msk.f32.mxu1 %vm73_vm0, %v4793_v33 }
0x359f   :  { %5928 = vmatmul.mubr.msk.f32.vlgmr.msra.gmra.mrb[46].mxu1 %vm73_vm0, %v4794_v26 }
0x35a0   :  { %6283 = vmatpush3.bf16.msra.mxu1 %v6280_v0 }
0x35a1   :  { %6285 = vmatprep.subr.bf16.mxu1 %v6284_v17 }
0x35a4   :  { %6287 = vmatpush3.bf16.msra.mxu1 %v6284_v17 }
0x3672   :  { %v5929_v52 = vpop.f32.mrb[46].mxu1 }
0x3673   :  { %v4873_v43 = vadd.f32 %v6512_v4, %v5929_v52  ;;  %v4867_v32 = vpop.f32.mrb[47].mxu1 }
0x3674   :  { %v4868_v42 = vadd.f32 %v6512_v4, %v4867_v32 }
0x3675   :  { %v4877_v45 = vmax.f32 %v4873_v43, 0.0 }
0x3676   :  { %v4876_v10 = vmax.f32 %v4868_v42, 0.0 }
0x3678   :  { %5946 = vmatprep.mubr.msk.f32.mxu0 %vm1227_vm3, %v4876_v10 }
0x3679   :  { %5947 = vmatmul.mubr.msk.f32.vlgmr.msra.gmra.mrb[46].mxu0 %vm1227_vm3, %v4877_v45 }
0x374c   :  { %v5948_v25 = vpop.f32.mrb[46].mxu0 }
0x374d   :  { %v4956_v49 = vadd.f32 %v6513_v40, %v5948_v25  ;;  %v4950_v15 = vpop.f32.mrb[47].mxu0 }
0x374e   :  { %v4951_v28 = vadd.f32 %v6513_v40, %v4950_v15 }
0x374f   :  { %v4960_v13 = vadd.f32 %v4956_v49, %v4794_v26 }
0x3750   :  { %v4959_v29 = vadd.f32 %v4951_v28, %v4793_v33 }
0x3751   :  { %v4964_v16 = vsel %vm73_vm0, %v4960_v13, 0.0 }
0x3752   :  { %4965 = vadd.xlane.f32.xlu1 %v4964_v16  ;;  %v4961_v37 = vsel %vm73_vm0, %v4959_v29, 0.0 }
0x3753   :  { %4962 = vadd.xlane.f32.xlu0 %v4961_v37 }
0x37df   :  { %v4966_v31 = vpop.xlane.xlu1 %4965 }
0x37e0   :  { %v4968_v5 = vmul.f32 0.03125, %v4966_v31  ;;  %v4963_v9 = vpop.xlane.xlu0 %4962 }
0x37e1   :  { %v4967_v34 = vmul.f32 0.03125, %v4963_v9 }
0x37e2   :  { %v4970_v7 = vsub.f32 %v4960_v13, %v4968_v5 }
0x37e3   :  { %v4969_v56 = vsub.f32 %v4959_v29, %v4967_v34 }
0x37e4   :  { %v4972_v30 = vmul.f32 %v4970_v7, %v4970_v7 }
0x37e5   :  { %v4971_v57 = vmul.f32 %v4969_v56, %v4969_v56 }
0x37e6   :  { %v4976_v18 = vsel %vm73_vm0, %v4972_v30, 0.0 }
0x37e7   :  { %4977 = vadd.xlane.f32.xlu1 %v4976_v18  ;;  %v4973_v20 = vsel %vm73_vm0, %v4971_v57, 0.0 }
0x37e8   :  { %4974 = vadd.xlane.f32.xlu0 %v4973_v20 }
0x3874   :  { %v4978_v6 = vpop.xlane.xlu1 %4977 }
0x3875   :  { %v4980_v50 = vmul.f32 0.03125, %v4978_v6  ;;  %v4975_v3 = vpop.xlane.xlu0 %4974 }
0x3876   :  { %v4979_v53 = vmul.f32 0.03125, %v4975_v3 }
0x3877   :  { %v4982_v35 = vadd.f32 1e-05, %v4980_v50 }
0x3878   :  { %v4981_v61 = vadd.f32 1e-05, %v4979_v53 }
0x3879   :  { %6486 = vrsqrt.f32 %v4982_v35 }
0x387a   :  { %6488 = vrsqrt.f32 %v4981_v61 }
0x3883   :  { %v6487_v62 = vpop.eup %6486 }
0x3884   :  { %v6489_v63 = vpop.eup %6488  ;;  %v4986_v41 = vmul.f32 %v6487_v62, %v4970_v7 }
0x3885   :  { %v4985_v24 = vmul.f32 %v6489_v63, %v4969_v56 }
0x3886   :  { %v4988_v19 = vmul.f32 %v6514_v60, %v4986_v41 }
0x3887   :  { %v4987_v27 = vmul.f32 %v6514_v60, %v4985_v24 }
0x3888   :  { %v4990_v23 = vadd.f32 %v6515_v55, %v4988_v19 }
0x3889   :  { %v4989_v44 = vadd.f32 %v6515_v55, %v4987_v27 }
0x388b   :  { %5957 = vmatprep.mubr.msk.f32.mxu1 %vm73_vm0, %v4989_v44 }
0x388c   :  { %5958 = vmatmul.mubr.msk.f32.vlgmr.msra.gmra.mrb[48].mxu1 %vm73_vm0, %v4990_v23 }
0x395f   :  { %v5959_v36 = vpop.f32.mrb[48].mxu1 }
0x3960   :  { %v5080_v47 = vadd.f32 %v5959_v36, %v5268_v38  ;;  %v5074_v48 = vpop.f32.mrb[49].mxu1 }
0x3961   :  { %v5075_v8 = vadd.f32 %v5268_v38, %v5074_v48 }
0x3962   :  { %5084 = vst [vmem:[%s7582_s17 + $0x8] sm:$0xff] %v5080_v47 }
0x3963   :  { %5083 = vst [vmem:[%s7582_s17] sm:$0xff] %v5075_v8 }

</bundles_post_ra>
